<compile_context>
chip_gen: v5e
topology: v5e:2x2
jax: 0.10.0
libtpu: 0.0.40
codegen_flags: <defaults>
</compile_context>

<pallas_src>
import jax
import jax.numpy as jnp
from jax import lax
from jax.experimental import pallas as pl
from jax.experimental.pallas import tpu as pltpu

POOL_SIZES = [5, 9, 13]          # as in the module __init__ (cascade assumes these)
MAX_PAD = max(POOL_SIZES) // 2   # 6


def _maxpool5_valid(a, axis):
    """5-wide, stride-1 'valid' running max along `axis` (log-depth shift tree)."""
    n = a.shape[axis]

    def sl(arr, off, size):
        idx = [slice(None)] * arr.ndim
        idx[axis] = slice(off, off + size)
        return arr[tuple(idx)]

    m2 = jnp.maximum(sl(a, 0, n - 1), sl(a, 1, n - 1))      # width-2 maxima
    m4 = jnp.maximum(sl(m2, 0, n - 3), sl(m2, 2, n - 3))    # width-4 maxima
    return jnp.maximum(sl(m4, 0, n - 4), sl(a, 4, n - 4))   # width-5 maxima


def _maxpool5_2d(a):
    """Separable 5x5 stride-1 'valid' max-pool: (Hq, Wq, C) -> (Hq-4, Wq-4, C)."""
    return _maxpool5_valid(_maxpool5_valid(a, axis=0), axis=1)


def _spp_kernel(x_ref, out_ref, xp_ref):
    """x_ref: (H, W, TC).  out_ref: (4, H, W, TC).  xp_ref: (H+12, W+12, TC) scratch."""
    H, W, _ = x_ref.shape
    P = MAX_PAD

    x = x_ref[...]

    # -inf padded copy of the input tile (MaxPool2d's implicit pad value).
    xp_ref[...] = jnp.full(xp_ref.shape, -jnp.inf, dtype=xp_ref.dtype)
    xp_ref[P:P + H, P:P + W, :] = x
    xp = xp_ref[...]

    # Cascade: each stage keeps exactly the halo it still needs, so the
    # composition m5∘m5 = m9 and m5∘m5∘m5 = m13 is exact at the image borders.
    t1 = _maxpool5_2d(xp)    # (H+8, W+8, TC): maxpool5 evaluated with a 4-wide halo
    t2 = _maxpool5_2d(t1)    # (H+4, W+4, TC): maxpool9 evaluated with a 2-wide halo
    t3 = _maxpool5_2d(t2)    # (H,   W,   TC): maxpool13

    # forward() iterates maxpools[::-1] -> [13, 9, 5], then appends x.
    out_ref[0] = t3
    out_ref[1] = t2[2:2 + H, 2:2 + W, :]
    out_ref[2] = t1[4:4 + H, 4:4 + W, :]
    out_ref[3] = x


def spatial_pyramid_pooling(x):
    """x: (B, C, H, W) -> (B, 4C, H, W), matching the PyTorch module."""
    B, C, H, W = x.shape
    TC = 128 if C % 128 == 0 else C          # channel tile on the lane axis
    Hp, Wp = H + 2 * MAX_PAD, W + 2 * MAX_PAD

    # Wrapper glue: channels-last so C sits on the lanes inside the kernel.
    x_cl = jnp.transpose(x, (0, 2, 3, 1))    # (B, H, W, C)

    out_cl = pl.pallas_call(
        _spp_kernel,
        out_shape=jax.ShapeDtypeStruct((B, 4, H, W, C), x.dtype),
        grid_spec=pltpu.PrefetchScalarGridSpec(
            num_scalar_prefetch=0,
            grid=(B, C // TC),
            in_specs=[
                pl.BlockSpec((None, H, W, TC), lambda b, c: (b, 0, 0, c)),
            ],
            out_specs=pl.BlockSpec((None, 4, H, W, TC),
                                   lambda b, c: (b, 0, 0, 0, c)),
            scratch_shapes=[pltpu.VMEM((Hp, Wp, TC), x.dtype)],
        ),
        compiler_params=pltpu.CompilerParams(
            dimension_semantics=("parallel", "parallel"),
            vmem_limit_bytes=32 * 1024 * 1024,
        ),
    )(x_cl)

    # (B, 4, H, W, C) -> (B, 4, C, H, W) -> (B, 4C, H, W) == cat([m13, m9, m5, x], dim=1)
    return jnp.transpose(out_cl, (0, 1, 4, 2, 3)).reshape(B, 4 * C, H, W)


def _reference_spp(x):
    """Pure-JAX reference matching the PyTorch forward exactly."""
    feats = []
    for k in POOL_SIZES[::-1]:
        p = k // 2
        feats.append(
            lax.reduce_window(
                x, -jnp.inf, lax.max,
                window_dimensions=(1, 1, k, k),
                window_strides=(1, 1, 1, 1),
                padding=[(0, 0), (0, 0), (p, p), (p, p)],
            )
        )
    feats.append(x)
    return jnp.concatenate(feats, axis=1)


if __name__ == "__main__":
    key = jax.random.PRNGKey(0)

    # Small NCHW test (channel tile == C since 4 % 128 != 0).
    B, C, H, W = 2, 4, 16, 16
    x = jax.random.normal(key, (B, C, H, W), dtype=jnp.float32)
    out = jax.block_until_ready(spatial_pyramid_pooling(x))
    assert out.shape == (B, 4 * C, H, W), out.shape
    assert jnp.allclose(out, _reference_spp(x), atol=1e-6, rtol=1e-6), \
        "mismatch vs reference (small C)"

    # Exercise the 128-channel lane tile + multi-step channel grid.
    B2, C2, H2, W2 = 1, 256, 8, 8
    x2 = jax.random.normal(jax.random.PRNGKey(0), (B2, C2, H2, W2), jnp.float32)
    out2 = jax.block_until_ready(spatial_pyramid_pooling(x2))
    assert out2.shape == (B2, 4 * C2, H2, W2), out2.shape
    assert jnp.allclose(out2, _reference_spp(x2), atol=1e-6, rtol=1e-6), \
        "mismatch vs reference (tiled C)"

    print("KERNEL_OK")
</pallas_src>

<mosaic_0001>
module attributes {stable_mosaic.version = 11 : i64} {
  func.func @_spp_kernel(%arg0: i32, %arg1: i32, %arg2: memref<1x16x16x4xf32, #tpu.memory_space<vmem>>, %arg3: memref<1x4x16x16x4xf32, #tpu.memory_space<vmem>>, %arg4: memref<28x28x4xf32, #tpu.memory_space<vmem>>) attributes {dimension_semantics = [#tpu.dimension_semantics<parallel>, #tpu.dimension_semantics<parallel>], iteration_bounds = array<i64: 2, 1>, scalar_prefetch = 0 : i64, scratch_operands = 1 : i64, tpu.core_type = #tpu.core_type<tc>, window_params = [{transform_indices = @transform_0, window_bounds = array<i64: 1, 16, 16, 4>}, {transform_indices = @transform_1, window_bounds = array<i64: 1, 4, 16, 16, 4>}]} {
    %c0 = arith.constant 0 : index
    %c0_0 = arith.constant 0 : index
    %c0_1 = arith.constant 0 : index
    %c0_2 = arith.constant 0 : index
    %0 = vector.load %arg2[%c0, %c0_0, %c0_1, %c0_2] : memref<1x16x16x4xf32, #tpu.memory_space<vmem>>, vector<1x16x16x4xf32>
    %1 = vector.shape_cast %0 : vector<1x16x16x4xf32> to vector<16x16x4xf32>
    %cst = arith.constant 0xFF800000 : f32
    %2 = vector.broadcast %cst : f32 to vector<28x28x4xf32>
    %c0_3 = arith.constant 0 : index
    %c0_4 = arith.constant 0 : index
    %c0_5 = arith.constant 0 : index
    %3 = vector.load %arg4[%c0_3, %c0_4, %c0_5] : memref<28x28x4xf32, #tpu.memory_space<vmem>>, vector<28x28x4xf32>
    tpu.vector_store %arg4[%c0_3, %c0_4, %c0_5], %2 {strides = array<i32>} : memref<28x28x4xf32, #tpu.memory_space<vmem>>, vector<28x28x4xf32>,
    %c6 = arith.constant 6 : index
    %c6_6 = arith.constant 6 : index
    %c0_7 = arith.constant 0 : index
    %4 = vector.load %arg4[%c6, %c6_6, %c0_7] : memref<28x28x4xf32, #tpu.memory_space<vmem>>, vector<16x16x4xf32>
    tpu.vector_store %arg4[%c6, %c6_6, %c0_7], %1 {strides = array<i32>} : memref<28x28x4xf32, #tpu.memory_space<vmem>>, vector<16x16x4xf32>,
    %c0_8 = arith.constant 0 : index
    %c0_9 = arith.constant 0 : index
    %c0_10 = arith.constant 0 : index
    %5 = vector.load %arg4[%c0_8, %c0_9, %c0_10] : memref<28x28x4xf32, #tpu.memory_space<vmem>>, vector<28x28x4xf32>
    %6 = vector.extract_strided_slice %5 {offsets = [0, 0, 0], sizes = [27, 28, 4], strides = [1, 1, 1]} : vector<28x28x4xf32> to vector<27x28x4xf32>
    %7 = vector.extract_strided_slice %5 {offsets = [1, 0, 0], sizes = [27, 28, 4], strides = [1, 1, 1]} : vector<28x28x4xf32> to vector<27x28x4xf32>
    %8 = arith.maximumf %6, %7 : vector<27x28x4xf32>
    %9 = vector.extract_strided_slice %8 {offsets = [0, 0, 0], sizes = [25, 28, 4], strides = [1, 1, 1]} : vector<27x28x4xf32> to vector<25x28x4xf32>
    %10 = vector.extract_strided_slice %8 {offsets = [2, 0, 0], sizes = [25, 28, 4], strides = [1, 1, 1]} : vector<27x28x4xf32> to vector<25x28x4xf32>
    %11 = arith.maximumf %9, %10 : vector<25x28x4xf32>
    %12 = vector.extract_strided_slice %11 {offsets = [0, 0, 0], sizes = [24, 28, 4], strides = [1, 1, 1]} : vector<25x28x4xf32> to vector<24x28x4xf32>
    %13 = vector.extract_strided_slice %5 {offsets = [4, 0, 0], sizes = [24, 28, 4], strides = [1, 1, 1]} : vector<28x28x4xf32> to vector<24x28x4xf32>
    %14 = arith.maximumf %12, %13 : vector<24x28x4xf32>
    %15 = vector.extract_strided_slice %14 {offsets = [0, 0, 0], sizes = [24, 27, 4], strides = [1, 1, 1]} : vector<24x28x4xf32> to vector<24x27x4xf32>
    %16 = vector.extract_strided_slice %14 {offsets = [0, 1, 0], sizes = [24, 27, 4], strides = [1, 1, 1]} : vector<24x28x4xf32> to vector<24x27x4xf32>
    %17 = arith.maximumf %15, %16 : vector<24x27x4xf32>
    %18 = vector.extract_strided_slice %17 {offsets = [0, 0, 0], sizes = [24, 25, 4], strides = [1, 1, 1]} : vector<24x27x4xf32> to vector<24x25x4xf32>
    %19 = vector.extract_strided_slice %17 {offsets = [0, 2, 0], sizes = [24, 25, 4], strides = [1, 1, 1]} : vector<24x27x4xf32> to vector<24x25x4xf32>
    %20 = arith.maximumf %18, %19 : vector<24x25x4xf32>
    %21 = vector.extract_strided_slice %20 {offsets = [0, 0, 0], sizes = [24, 24, 4], strides = [1, 1, 1]} : vector<24x25x4xf32> to vector<24x24x4xf32>
    %22 = vector.extract_strided_slice %14 {offsets = [0, 4, 0], sizes = [24, 24, 4], strides = [1, 1, 1]} : vector<24x28x4xf32> to vector<24x24x4xf32>
    %23 = arith.maximumf %21, %22 : vector<24x24x4xf32>
    %24 = vector.extract_strided_slice %23 {offsets = [0, 0, 0], sizes = [23, 24, 4], strides = [1, 1, 1]} : vector<24x24x4xf32> to vector<23x24x4xf32>
    %25 = vector.extract_strided_slice %23 {offsets = [1, 0, 0], sizes = [23, 24, 4], strides = [1, 1, 1]} : vector<24x24x4xf32> to vector<23x24x4xf32>
    %26 = arith.maximumf %24, %25 : vector<23x24x4xf32>
    %27 = vector.extract_strided_slice %26 {offsets = [0, 0, 0], sizes = [21, 24, 4], strides = [1, 1, 1]} : vector<23x24x4xf32> to vector<21x24x4xf32>
    %28 = vector.extract_strided_slice %26 {offsets = [2, 0, 0], sizes = [21, 24, 4], strides = [1, 1, 1]} : vector<23x24x4xf32> to vector<21x24x4xf32>
    %29 = arith.maximumf %27, %28 : vector<21x24x4xf32>
    %30 = vector.extract_strided_slice %29 {offsets = [0, 0, 0], sizes = [20, 24, 4], strides = [1, 1, 1]} : vector<21x24x4xf32> to vector<20x24x4xf32>
    %31 = vector.extract_strided_slice %23 {offsets = [4, 0, 0], sizes = [20, 24, 4], strides = [1, 1, 1]} : vector<24x24x4xf32> to vector<20x24x4xf32>
    %32 = arith.maximumf %30, %31 : vector<20x24x4xf32>
    %33 = vector.extract_strided_slice %32 {offsets = [0, 0, 0], sizes = [20, 23, 4], strides = [1, 1, 1]} : vector<20x24x4xf32> to vector<20x23x4xf32>
    %34 = vector.extract_strided_slice %32 {offsets = [0, 1, 0], sizes = [20, 23, 4], strides = [1, 1, 1]} : vector<20x24x4xf32> to vector<20x23x4xf32>
    %35 = arith.maximumf %33, %34 : vector<20x23x4xf32>
    %36 = vector.extract_strided_slice %35 {offsets = [0, 0, 0], sizes = [20, 21, 4], strides = [1, 1, 1]} : vector<20x23x4xf32> to vector<20x21x4xf32>
    %37 = vector.extract_strided_slice %35 {offsets = [0, 2, 0], sizes = [20, 21, 4], strides = [1, 1, 1]} : vector<20x23x4xf32> to vector<20x21x4xf32>
    %38 = arith.maximumf %36, %37 : vector<20x21x4xf32>
    %39 = vector.extract_strided_slice %38 {offsets = [0, 0, 0], sizes = [20, 20, 4], strides = [1, 1, 1]} : vector<20x21x4xf32> to vector<20x20x4xf32>
    %40 = vector.extract_strided_slice %32 {offsets = [0, 4, 0], sizes = [20, 20, 4], strides = [1, 1, 1]} : vector<20x24x4xf32> to vector<20x20x4xf32>
    %41 = arith.maximumf %39, %40 : vector<20x20x4xf32>
    %42 = vector.extract_strided_slice %41 {offsets = [0, 0, 0], sizes = [19, 20, 4], strides = [1, 1, 1]} : vector<20x20x4xf32> to vector<19x20x4xf32>
    %43 = vector.extract_strided_slice %41 {offsets = [1, 0, 0], sizes = [19, 20, 4], strides = [1, 1, 1]} : vector<20x20x4xf32> to vector<19x20x4xf32>
    %44 = arith.maximumf %42, %43 : vector<19x20x4xf32>
    %45 = vector.extract_strided_slice %44 {offsets = [0, 0, 0], sizes = [17, 20, 4], strides = [1, 1, 1]} : vector<19x20x4xf32> to vector<17x20x4xf32>
    %46 = vector.extract_strided_slice %44 {offsets = [2, 0, 0], sizes = [17, 20, 4], strides = [1, 1, 1]} : vector<19x20x4xf32> to vector<17x20x4xf32>
    %47 = arith.maximumf %45, %46 : vector<17x20x4xf32>
    %48 = vector.extract_strided_slice %47 {offsets = [0, 0, 0], sizes = [16, 20, 4], strides = [1, 1, 1]} : vector<17x20x4xf32> to vector<16x20x4xf32>
    %49 = vector.extract_strided_slice %41 {offsets = [4, 0, 0], sizes = [16, 20, 4], strides = [1, 1, 1]} : vector<20x20x4xf32> to vector<16x20x4xf32>
    %50 = arith.maximumf %48, %49 : vector<16x20x4xf32>
    %51 = vector.extract_strided_slice %50 {offsets = [0, 0, 0], sizes = [16, 19, 4], strides = [1, 1, 1]} : vector<16x20x4xf32> to vector<16x19x4xf32>
    %52 = vector.extract_strided_slice %50 {offsets = [0, 1, 0], sizes = [16, 19, 4], strides = [1, 1, 1]} : vector<16x20x4xf32> to vector<16x19x4xf32>
    %53 = arith.maximumf %51, %52 : vector<16x19x4xf32>
    %54 = vector.extract_strided_slice %53 {offsets = [0, 0, 0], sizes = [16, 17, 4], strides = [1, 1, 1]} : vector<16x19x4xf32> to vector<16x17x4xf32>
    %55 = vector.extract_strided_slice %53 {offsets = [0, 2, 0], sizes = [16, 17, 4], strides = [1, 1, 1]} : vector<16x19x4xf32> to vector<16x17x4xf32>
    %56 = arith.maximumf %54, %55 : vector<16x17x4xf32>
    %57 = vector.extract_strided_slice %56 {offsets = [0, 0, 0], sizes = [16, 16, 4], strides = [1, 1, 1]} : vector<16x17x4xf32> to vector<16x16x4xf32>
    %58 = vector.extract_strided_slice %50 {offsets = [0, 4, 0], sizes = [16, 16, 4], strides = [1, 1, 1]} : vector<16x20x4xf32> to vector<16x16x4xf32>
    %59 = arith.maximumf %57, %58 : vector<16x16x4xf32>
    %c0_11 = arith.constant 0 : index
    %c0_12 = arith.constant 0 : index
    %c0_13 = arith.constant 0 : index
    %c0_14 = arith.constant 0 : index
    %c0_15 = arith.constant 0 : index
    %60 = vector.load %arg3[%c0_11, %c0_12, %c0_13, %c0_14, %c0_15] : memref<1x4x16x16x4xf32, #tpu.memory_space<vmem>>, vector<1x1x16x16x4xf32>
    %61 = vector.shape_cast %60 : vector<1x1x16x16x4xf32> to vector<16x16x4xf32>
    %62 = vector.shape_cast %59 : vector<16x16x4xf32> to vector<1x1x16x16x4xf32>
    tpu.vector_store %arg3[%c0_11, %c0_12, %c0_13, %c0_14, %c0_15], %62 {strides = array<i32>} : memref<1x4x16x16x4xf32, #tpu.memory_space<vmem>>, vector<1x1x16x16x4xf32>,
    %63 = vector.extract_strided_slice %41 {offsets = [2, 2, 0], sizes = [16, 16, 4], strides = [1, 1, 1]} : vector<20x20x4xf32> to vector<16x16x4xf32>
    %c0_16 = arith.constant 0 : index
    %c1 = arith.constant 1 : index
    %c0_17 = arith.constant 0 : index
    %c0_18 = arith.constant 0 : index
    %c0_19 = arith.constant 0 : index
    %64 = vector.load %arg3[%c0_16, %c1, %c0_17, %c0_18, %c0_19] : memref<1x4x16x16x4xf32, #tpu.memory_space<vmem>>, vector<1x1x16x16x4xf32>
    %65 = vector.shape_cast %64 : vector<1x1x16x16x4xf32> to vector<16x16x4xf32>
    %66 = vector.shape_cast %63 : vector<16x16x4xf32> to vector<1x1x16x16x4xf32>
    tpu.vector_store %arg3[%c0_16, %c1, %c0_17, %c0_18, %c0_19], %66 {strides = array<i32>} : memref<1x4x16x16x4xf32, #tpu.memory_space<vmem>>, vector<1x1x16x16x4xf32>,
    %67 = vector.extract_strided_slice %23 {offsets = [4, 4, 0], sizes = [16, 16, 4], strides = [1, 1, 1]} : vector<24x24x4xf32> to vector<16x16x4xf32>
    %c0_20 = arith.constant 0 : index
    %c2 = arith.constant 2 : index
    %c0_21 = arith.constant 0 : index
    %c0_22 = arith.constant 0 : index
    %c0_23 = arith.constant 0 : index
    %68 = vector.load %arg3[%c0_20, %c2, %c0_21, %c0_22, %c0_23] : memref<1x4x16x16x4xf32, #tpu.memory_space<vmem>>, vector<1x1x16x16x4xf32>
    %69 = vector.shape_cast %68 : vector<1x1x16x16x4xf32> to vector<16x16x4xf32>
    %70 = vector.shape_cast %67 : vector<16x16x4xf32> to vector<1x1x16x16x4xf32>
    tpu.vector_store %arg3[%c0_20, %c2, %c0_21, %c0_22, %c0_23], %70 {strides = array<i32>} : memref<1x4x16x16x4xf32, #tpu.memory_space<vmem>>, vector<1x1x16x16x4xf32>,
    %c0_24 = arith.constant 0 : index
    %c3 = arith.constant 3 : index
    %c0_25 = arith.constant 0 : index
    %c0_26 = arith.constant 0 : index
    %c0_27 = arith.constant 0 : index
    %71 = vector.load %arg3[%c0_24, %c3, %c0_25, %c0_26, %c0_27] : memref<1x4x16x16x4xf32, #tpu.memory_space<vmem>>, vector<1x1x16x16x4xf32>
    %72 = vector.shape_cast %71 : vector<1x1x16x16x4xf32> to vector<16x16x4xf32>
    %73 = vector.shape_cast %1 : vector<16x16x4xf32> to vector<1x1x16x16x4xf32>
    tpu.vector_store %arg3[%c0_24, %c3, %c0_25, %c0_26, %c0_27], %73 {strides = array<i32>} : memref<1x4x16x16x4xf32, #tpu.memory_space<vmem>>, vector<1x1x16x16x4xf32>,
    return
  }
  func.func @transform_0(%arg0: i32, %arg1: i32) -> (i32, i32, i32, i32) {
    %c0_i32 = arith.constant 0 : i32
    %c0_i32_0 = arith.constant 0 : i32
    %c0_i32_1 = arith.constant 0 : i32
    return %arg0, %c0_i32, %c0_i32_0, %arg1 : i32, i32, i32, i32
  }
  func.func @transform_1(%arg0: i32, %arg1: i32) -> (i32, i32, i32, i32, i32) {
    %c0_i32 = arith.constant 0 : i32
    %c0_i32_0 = arith.constant 0 : i32
    %c0_i32_1 = arith.constant 0 : i32
    %c0_i32_2 = arith.constant 0 : i32
    return %arg0, %c0_i32, %c0_i32_0, %c0_i32_1, %arg1 : i32, i32, i32, i32, i32
  }
}

</mosaic_0001>

<bundles_post_ra>
// kernel: tpu_custom_call.1
= control target key start
LH: loop header
LB: loop body
LE: loop exit
PB: predicated region body
PF: predicated region fallthrough
CT: control target
= control target key end

     0   :  { %s4048_s6 = smov 0   ;;  %s4050_s7 = smov 0   ;;  %s7732_s0 = inlined_call_operand.vmem [shape: f32[2,16,16,4], index: 0, kind: input, shape index: {}]   ;;  %s7733_s1 = inlined_call_operand.vmem [shape: f32[2,4,16,16,4], index: 1, kind: output, shape index: {}]  }
   0x1   :  { %s4052_s8 = smov 0  }
   0x2 LB: > { %s23_s9 = sadd.s32 1, %s4031_s7  ;;  %p3843_p0 = scmp.ge.s32.totalorder %s4035_s8, 1  ;;  %s4035_s8 = sphi %s4052_s8, %s11_s8   ;;  %s4031_s7 = sphi %s4050_s7, %s8363_s7   ;;  %s4027_s6 = sphi %s4048_s6, %s8362_s6  }
   0x3   : > { %p25_p1 = scmp.ge.s32.totalorder %s23_s9, 2  ;;  %p106_p2 = scmp.lt.s32.totalorder %s4035_s8, 3 }
   0x5   : > { %s8365_s9 = smov (%p25_p1, %s23_s9), 0  ;;  %p107_p3 = pnand %p3843_p0, %p106_p2 }
   0x7   : > { %110 = sbr.rel (%p107_p3) target bundleno = 749 (0x2ed), region = 24 }
   0xc   : > { %vm180_vm0 = vcmask 31744   ;;  %v4037_v0 = vmov -inf   ;;  %vm184_vm1 = vcmask 27648   ;;  %p132_p4 = scmp.lt.s32.totalorder %s4027_s6, 1  ;;  %vm831_vm2 = vcmask 1046528  }
   0xd   : > { %181 = vst.msk [vmem:[#allocation2] sm:$0xff] %vm180_vm0, %v4037_v0  ;;  %vm1288_vm3 = vcmask 1045504   ;;  %vm1601_vm4 = vcmask 1043456   ;;  %vm3674_vm5 = vcmask 31748   ;;  %vm3626_vm6 = vcmask 25600  }
   0xe   : > { %182 = vst.msk [vmem:[#allocation2 + $0x8] sm:$0xff] %vm180_vm0, %v4037_v0  ;;  %s8367_s6 = smov (!%p132_p4, %s4027_s6), 1  ;;  %vm3623_vm7 = vcmask 31746  }
   0xf   : > { %183 = vst.msk [vmem:[#allocation2 + $0x10] sm:$0xff] %vm180_vm0, %v4037_v0  ;;  %s3978_s10 = sshll.u32 %s8367_s6, 8  ;;  %s3979_s14 = sshll.u32 %s8367_s6, 10 }
  0x10   : > { %186 = vst.msk [vmem:[#allocation2 + $0x20] sm:$0xff] %vm180_vm0, %v4037_v0  ;;  %s4323_s13 = scalar_lea.vmem %s7732_s0, %s3978_s10  ;;  %s4340_s17 = scalar_lea.vmem %s7733_s1, %s3979_s14 }
  0x11   : > { %187 = vst.msk [vmem:[#allocation2 + $0x28] sm:$0xff] %vm180_vm0, %v4037_v0  ;;  %v148_v33 = vld [vmem:[%s4323_s13] sm:$0xff]  ;;  %v149_v34 = vld [vmem:[%s4323_s13 + $0x8] sm:$0xff]  ;;  %v150_v36 = vld [vmem:[%s4323_s13 + $0x10] sm:$0xff] }
  0x12   : > { %188 = vst.msk [vmem:[#allocation2 + $0x30] sm:$0xff] %vm180_vm0, %v4037_v0  ;;  %v151_v41 = vld [vmem:[%s4323_s13 + $0x18] sm:$0xff]  ;;  %v152_v46 = vld [vmem:[%s4323_s13 + $0x20] sm:$0xff]  ;;  %v153_v50 = vld [vmem:[%s4323_s13 + $0x28] sm:$0xff] }
  0x13   : > { %190 = vst.msk [vmem:[#allocation2 + $0x40] sm:$0xff] %vm180_vm0, %v4037_v0  ;;  %v154_v53 = vld [vmem:[%s4323_s13 + $0x30] sm:$0xff]  ;;  %v155_v55 = vld [vmem:[%s4323_s13 + $0x38] sm:$0xff]  ;;  %v156_v56 = vld [vmem:[%s4323_s13 + $0x40] sm:$0xff] }
  0x14   : > { %191 = vst.msk [vmem:[#allocation2 + $0x48] sm:$0xff] %vm180_vm0, %v4037_v0  ;;  %v157_v57 = vld [vmem:[%s4323_s13 + $0x48] sm:$0xff]  ;;  %v158_v58 = vld [vmem:[%s4323_s13 + $0x50] sm:$0xff]  ;;  %v159_v61 = vld [vmem:[%s4323_s13 + $0x58] sm:$0xff] }
  0x15   : > { %192 = vst.msk [vmem:[#allocation2 + $0x50] sm:$0xff] %vm180_vm0, %v4037_v0 }
  0x16   : > { %194 = vst.msk [vmem:[#allocation2 + $0x60] sm:$0xff] %vm180_vm0, %v4037_v0  ;;  %v329_v1 = vld [vmem:[#allocation2 + $0x10] sm:$0xff] }
  0x17   : > { %195 = vst.msk [vmem:[#allocation2 + $0x68] sm:$0xff] %vm180_vm0, %v4037_v0 }
  0x18   : > { %196 = vst.msk [vmem:[#allocation2 + $0x70] sm:$0xff] %vm180_vm0, %v4037_v0 }
  0x19   : > { %198 = vst.msk [vmem:[#allocation2 + $0x80] sm:$0xff] %vm180_vm0, %v4037_v0  ;;  %v333_v2 = vld [vmem:[#allocation2 + $0x30] sm:$0xff] }
  0x1a   : > { %199 = vst.msk [vmem:[#allocation2 + $0x88] sm:$0xff] %vm180_vm0, %v4037_v0  ;;  %v441_v6 = vmax.f32 %v329_v1, %v333_v2 }
  0x1b   : > { %200 = vst.msk [vmem:[#allocation2 + $0x90] sm:$0xff] %vm180_vm0, %v4037_v0 }
  0x1c   : > { %202 = vst.msk [vmem:[#allocation2 + $0xa0] sm:$0xff] %vm180_vm0, %v4037_v0  ;;  %v337_v3 = vld [vmem:[#allocation2 + $0x50] sm:$0xff] }
  0x1d   : > { %203 = vst.msk [vmem:[#allocation2 + $0xa8] sm:$0xff] %vm180_vm0, %v4037_v0  ;;  %v445_v7 = vmax.f32 %v333_v2, %v337_v3 }
  0x1e   : > { %204 = vst.msk [vmem:[#allocation2 + $0xb0] sm:$0xff] %vm180_vm0, %v4037_v0 }
  0x1f   : > { %206 = vst.msk [vmem:[#allocation2 + $0xc0] sm:$0xff] %vm180_vm0, %v4037_v0  ;;  %v341_v4 = vld [vmem:[#allocation2 + $0x70] sm:$0xff] }
  0x20   : > { %207 = vst.msk [vmem:[#allocation2 + $0xc8] sm:$0xff] %vm180_vm0, %v4037_v0  ;;  %v4184_v8 = vmax.f32 %v337_v3, %v341_v4  ;;  %v160_v3 = vld [vmem:[%s4323_s13 + $0x60] sm:$0xff] }
  0x21   : > { %208 = vst.msk [vmem:[#allocation2 + $0xd0] sm:$0xff] %vm180_vm0, %v4037_v0 }
  0x22   : > { %210 = vst.msk [vmem:[#allocation2 + $0xe0] sm:$0xff] %vm180_vm0, %v4037_v0  ;;  %v4176_v5 = vld [vmem:[#allocation2 + $0x90] sm:$0xff]  ;;  %v545_v10 = vmax.f32 %v441_v6, %v4184_v8 }
  0x23   : > { %211 = vst.msk [vmem:[#allocation2 + $0xe8] sm:$0xff] %vm180_vm0, %v4037_v0  ;;  %v4187_v9 = vmax.f32 %v341_v4, %v4176_v5 }
  0x24   : > { %212 = vst.msk [vmem:[#allocation2 + $0xf0] sm:$0xff] %vm180_vm0, %v4037_v0  ;;  %v4202_v13 = vmax.f32 %v545_v10, %v4176_v5  ;;  %v161_v10 = vld [vmem:[%s4323_s13 + $0x68] sm:$0xff] }
  0x25   : > { %214 = vst.msk [vmem:[#allocation2 + $0x100] sm:$0xff] %vm180_vm0, %v4037_v0  ;;  %v549_v11 = vmax.f32 %v445_v7, %v4187_v9  ;;  %v4197_v12 = vld [vmem:[#allocation2 + $0xb0] sm:$0xff] }
  0x26   : > { %215 = vst.msk [vmem:[#allocation2 + $0x108] sm:$0xff] %vm180_vm0, %v4037_v0  ;;  %v4350_v37 = vmax.f32 %v4176_v5, %v4197_v12 }
  0x27   : > { %216 = vst.msk [vmem:[#allocation2 + $0x110] sm:$0xff] %vm180_vm0, %v4037_v0  ;;  %v4205_v14 = vmax.f32 %v549_v11, %v4197_v12 }
  0x28   : > { %218 = vst.msk [vmem:[#allocation2 + $0x120] sm:$0xff] %vm180_vm0, %v4037_v0  ;;  %v553_v48 = vmax.f32 %v4184_v8, %v4350_v37 }
  0x29   : > { %219 = vst.msk [vmem:[#allocation2 + $0x128] sm:$0xff] %vm180_vm0, %v4037_v0 }
  0x2a   : > { %220 = vst.msk [vmem:[#allocation2 + $0x130] sm:$0xff] %vm180_vm0, %v4037_v0 }
  0x2b   : > { %222 = vst.msk [vmem:[#allocation2 + $0x140] sm:$0xff] %vm180_vm0, %v4037_v0 }
  0x2c   : > { %223 = vst.msk [vmem:[#allocation2 + $0x148] sm:$0xff] %vm180_vm0, %v4037_v0 }
  0x2d   : > { %224 = vst.msk [vmem:[#allocation2 + $0x150] sm:$0xff] %vm180_vm0, %v4037_v0 }
  0x2e   : > { %226 = vst.msk [vmem:[#allocation2 + $0x160] sm:$0xff] %vm180_vm0, %v4037_v0 }
  0x2f   : > { %227 = vst.msk [vmem:[#allocation2 + $0x168] sm:$0xff] %vm180_vm0, %v4037_v0 }
  0x30   : > { %228 = vst.msk [vmem:[#allocation2 + $0x170] sm:$0xff] %vm180_vm0, %v4037_v0 }
  0x31   : > { %230 = vst.msk [vmem:[#allocation2 + $0x180] sm:$0xff] %vm180_vm0, %v4037_v0 }
  0x32   : > { %231 = vst.msk [vmem:[#allocation2 + $0x188] sm:$0xff] %vm180_vm0, %v4037_v0 }
  0x33   : > { %232 = vst.msk [vmem:[#allocation2 + $0x190] sm:$0xff] %vm180_vm0, %v4037_v0 }
  0x34   : > { %234 = vst.msk [vmem:[#allocation2 + $0x1a0] sm:$0xff] %vm180_vm0, %v4037_v0 }
  0x35   : > { %235 = vst.msk [vmem:[#allocation2 + $0x1a8] sm:$0xff] %vm180_vm0, %v4037_v0 }
  0x36   : > { %236 = vst.msk [vmem:[#allocation2 + $0x1b0] sm:$0xff] %vm180_vm0, %v4037_v0 }
  0x37   : > { %238 = vst.msk [vmem:[#allocation2 + $0x1c0] sm:$0xff] %vm180_vm0, %v4037_v0 }
  0x38   : > { %239 = vst.msk [vmem:[#allocation2 + $0x1c8] sm:$0xff] %vm180_vm0, %v4037_v0 }
  0x39   : > { %240 = vst.msk [vmem:[#allocation2 + $0x1d0] sm:$0xff] %vm180_vm0, %v4037_v0 }
  0x3a   : > { %242 = vst.msk [vmem:[#allocation2 + $0x1e0] sm:$0xff] %vm180_vm0, %v4037_v0 }
  0x3b   : > { %243 = vst.msk [vmem:[#allocation2 + $0x1e8] sm:$0xff] %vm180_vm0, %v4037_v0 }
  0x3c   : > { %244 = vst.msk [vmem:[#allocation2 + $0x1f0] sm:$0xff] %vm180_vm0, %v4037_v0 }
  0x3d   : > { %246 = vst.msk [vmem:[#allocation2 + $0x200] sm:$0xff] %vm180_vm0, %v4037_v0 }
  0x3e   : > { %247 = vst.msk [vmem:[#allocation2 + $0x208] sm:$0xff] %vm180_vm0, %v4037_v0 }
  0x3f   : > { %248 = vst.msk [vmem:[#allocation2 + $0x210] sm:$0xff] %vm180_vm0, %v4037_v0 }
  0x40   : > { %250 = vst.msk [vmem:[#allocation2 + $0x220] sm:$0xff] %vm180_vm0, %v4037_v0 }
  0x41   : > { %251 = vst.msk [vmem:[#allocation2 + $0x228] sm:$0xff] %vm180_vm0, %v4037_v0 }
  0x42   : > { %252 = vst.msk [vmem:[#allocation2 + $0x230] sm:$0xff] %vm180_vm0, %v4037_v0 }
  0x43   : > { %254 = vst.msk [vmem:[#allocation2 + $0x240] sm:$0xff] %vm180_vm0, %v4037_v0 }
  0x44   : > { %255 = vst.msk [vmem:[#allocation2 + $0x248] sm:$0xff] %vm180_vm0, %v4037_v0 }
  0x45   : > { %256 = vst.msk [vmem:[#allocation2 + $0x250] sm:$0xff] %vm180_vm0, %v4037_v0 }
  0x46   : > { %258 = vst.msk [vmem:[#allocation2 + $0x260] sm:$0xff] %vm180_vm0, %v4037_v0 }
  0x47   : > { %259 = vst.msk [vmem:[#allocation2 + $0x268] sm:$0xff] %vm180_vm0, %v4037_v0 }
  0x48   : > { %260 = vst.msk [vmem:[#allocation2 + $0x270] sm:$0xff] %vm180_vm0, %v4037_v0 }
  0x49   : > { %262 = vst.msk [vmem:[#allocation2 + $0x280] sm:$0xff] %vm180_vm0, %v4037_v0 }
  0x4a   : > { %263 = vst.msk [vmem:[#allocation2 + $0x288] sm:$0xff] %vm180_vm0, %v4037_v0 }
  0x4b   : > { %264 = vst.msk [vmem:[#allocation2 + $0x290] sm:$0xff] %vm180_vm0, %v4037_v0 }
  0x4c   : > { %266 = vst.msk [vmem:[#allocation2 + $0x2a0] sm:$0xff] %vm180_vm0, %v4037_v0 }
  0x4d   : > { %267 = vst.msk [vmem:[#allocation2 + $0x2a8] sm:$0xff] %vm180_vm0, %v4037_v0 }
  0x4e   : > { %268 = vst.msk [vmem:[#allocation2 + $0x2b0] sm:$0xff] %vm180_vm0, %v4037_v0 }
  0x4f   : > { %270 = vst.msk [vmem:[#allocation2 + $0x2c0] sm:$0xff] %vm180_vm0, %v4037_v0 }
  0x50   : > { %271 = vst.msk [vmem:[#allocation2 + $0x2c8] sm:$0xff] %vm180_vm0, %v4037_v0 }
  0x51   : > { %272 = vst.msk [vmem:[#allocation2 + $0x2d0] sm:$0xff] %vm180_vm0, %v4037_v0 }
  0x52   : > { %274 = vst.msk [vmem:[#allocation2 + $0x2e0] sm:$0xff] %vm180_vm0, %v4037_v0 }
  0x53   : > { %275 = vst.msk [vmem:[#allocation2 + $0x2e8] sm:$0xff] %vm180_vm0, %v4037_v0 }
  0x54   : > { %276 = vst.msk [vmem:[#allocation2 + $0x2f0] sm:$0xff] %vm180_vm0, %v4037_v0 }
  0x55   : > { %278 = vst.msk [vmem:[#allocation2 + $0x300] sm:$0xff] %vm180_vm0, %v4037_v0 }
  0x56   : > { %279 = vst.msk [vmem:[#allocation2 + $0x308] sm:$0xff] %vm180_vm0, %v4037_v0 }
  0x57   : > { %280 = vst.msk [vmem:[#allocation2 + $0x310] sm:$0xff] %vm180_vm0, %v4037_v0 }
  0x58   : > { %282 = vst.msk [vmem:[#allocation2 + $0x320] sm:$0xff] %vm180_vm0, %v4037_v0  ;;  %v4414_v59 = vld [vmem:[#allocation2 + $0x2d0] sm:$0xff] }
  0x59   : > { %283 = vst.msk [vmem:[#allocation2 + $0x328] sm:$0xff] %vm180_vm0, %v4037_v0 }
  0x5a   : > { %284 = vst.msk [vmem:[#allocation2 + $0x330] sm:$0xff] %vm180_vm0, %v4037_v0 }
  0x5b   : > { %286 = vst.msk [vmem:[#allocation2 + $0x340] sm:$0xff] %vm180_vm0, %v4037_v0  ;;  %v421_v60 = vld [vmem:[#allocation2 + $0x2f0] sm:$0xff] }
  0x5c   : > { %287 = vst.msk [vmem:[#allocation2 + $0x348] sm:$0xff] %vm180_vm0, %v4037_v0  ;;  %v4428_v4 = vmax.f32 %v4414_v59, %v421_v60 }
  0x5d   : > { %288 = vst.msk [vmem:[#allocation2 + $0x350] sm:$0xff] %vm180_vm0, %v4037_v0 }
  0x5e   : > { %290 = vst.msk [vmem:[#allocation2 + $0x360] sm:$0xff] %vm180_vm0, %v4037_v0  ;;  %v4419_v62 = vld [vmem:[#allocation2 + $0x310] sm:$0xff] }
  0x5f   : > { %291 = vst.msk [vmem:[#allocation2 + $0x368] sm:$0xff] %vm180_vm0, %v4037_v0  ;;  %v4432_v5 = vmax.f32 %v421_v60, %v4419_v62  ;;  %v344_v60 = vld [vmem:[#allocation2 + $0x88] sm:$0xff] }
  0x60   : > { %292 = vst.msk [vmem:[#allocation2 + $0x370] sm:$0xff] %vm180_vm0, %v4037_v0 }
  0x61   : > { %185 = vst.msk [vmem:[#allocation2 + $0x18] sm:$0xf] %vm184_vm1, %v4037_v0  ;;  %v4421_v63 = vld [vmem:[#allocation2 + $0x330] sm:$0xff] }
  0x62   : > { %189 = vst.msk [vmem:[#allocation2 + $0x38] sm:$0xf] %vm184_vm1, %v4037_v0  ;;  %v537_v6 = vmax.f32 %v4419_v62, %v4421_v63 }
  0x63   : > { %193 = vst.msk [vmem:[#allocation2 + $0x58] sm:$0xf] %vm184_vm1, %v4037_v0 }
  0x64   : > { %197 = vst.msk [vmem:[#allocation2 + $0x78] sm:$0xf] %vm184_vm1, %v4037_v0 }
  0x65   : > { %201 = vst.msk [vmem:[#allocation2 + $0x98] sm:$0xf] %vm184_vm1, %v4037_v0 }
  0x66   : > { %205 = vst.msk [vmem:[#allocation2 + $0xb8] sm:$0xf] %vm184_vm1, %v4037_v0 }
  0x67   : > { %209 = vst.msk [vmem:[#allocation2 + $0xd8] sm:$0xf] %vm184_vm1, %v4037_v0 }
  0x68   : > { %v330_v15 = vld [vmem:[#allocation2 + $0x18] sm:$0xf]  ;;  %213 = vst.msk [vmem:[#allocation2 + $0xf8] sm:$0xf] %vm184_vm1, %v4037_v0 }
  0x69   : > { %217 = vst.msk [vmem:[#allocation2 + $0x118] sm:$0xf] %vm184_vm1, %v4037_v0  ;;  %v334_v16 = vld [vmem:[#allocation2 + $0x38] sm:$0xf] }
  0x6a   : > { %221 = vst.msk [vmem:[#allocation2 + $0x138] sm:$0xf] %vm184_vm1, %v4037_v0  ;;  %v338_v17 = vld [vmem:[#allocation2 + $0x58] sm:$0xf]  ;;  %v442_v18 = vmax.f32 %v330_v15, %v334_v16  ;;  %v162_v15 = vld [vmem:[%s4323_s13 + $0x70] sm:$0xff] }
  0x6b   : > { %225 = vst.msk [vmem:[#allocation2 + $0x158] sm:$0xf] %vm184_vm1, %v4037_v0  ;;  %v342_v19 = vld [vmem:[#allocation2 + $0x78] sm:$0xf]  ;;  %v446_v20 = vmax.f32 %v334_v16, %v338_v17  ;;  %v633_v16 = vmax.f32 %v4428_v4, %v537_v6 }
  0x6c   : > { %229 = vst.msk [vmem:[#allocation2 + $0x178] sm:$0xf] %vm184_vm1, %v4037_v0  ;;  %v346_v21 = vld [vmem:[#allocation2 + $0x98] sm:$0xf]  ;;  %v450_v22 = vmax.f32 %v338_v17, %v342_v19 }
  0x6d   : > { %233 = vst.msk [vmem:[#allocation2 + $0x198] sm:$0xf] %vm184_vm1, %v4037_v0  ;;  %v4280_v23 = vld [vmem:[#allocation2 + $0xb8] sm:$0xf]  ;;  %v4282_v24 = vmax.f32 %v342_v19, %v346_v21 }
  0x6e   : > { %237 = vst.msk [vmem:[#allocation2 + $0x1b8] sm:$0xf] %vm184_vm1, %v4037_v0  ;;  %v4287_v25 = vmax.f32 %v346_v21, %v4280_v23  ;;  %v546_v26 = vmax.f32 %v442_v18, %v450_v22  ;;  %v4300_v30 = vld [vmem:[#allocation2 + $0xd8] sm:$0xf] }
  0x6f   : > { %241 = vst.msk [vmem:[#allocation2 + $0x1d8] sm:$0xf] %vm184_vm1, %v4037_v0  ;;  %v550_v27 = vmax.f32 %v446_v20, %v4282_v24  ;;  %v4439_v8 = vmax.f32 %v4280_v23, %v4300_v30  ;;  %v163_v20 = vld [vmem:[%s4323_s13 + $0x78] sm:$0xff] }
  0x70   : > { %245 = vst.msk [vmem:[#allocation2 + $0x1f8] sm:$0xf] %vm184_vm1, %v4037_v0  ;;  %v554_v28 = vmax.f32 %v450_v22, %v4287_v25  ;;  %v4295_v29 = vmax.f32 %v546_v26, %v346_v21  ;;  %v437_v21 = vld [vmem:[#allocation2 + $0x370] sm:$0xff]  ;;  %v4468_v26 = vld [vmem:[#allocation2 + $0xf8] sm:$0xf] }
  0x71   : > { %249 = vst.msk [vmem:[#allocation2 + $0x218] sm:$0xf] %vm184_vm1, %v4037_v0  ;;  %v4303_v31 = vmax.f32 %v550_v27, %v4280_v23  ;;  %v558_v19 = vmax.f32 %v4282_v24, %v4439_v8  ;;  %v164_v27 = vld [vmem:[%s4323_s13 + $0x80] sm:$0xff] }
  0x72   : > { %7959 = vst [vmem:[#allocation3_spill] sm:$0xff] %v4295_v29  ;;  %v4308_v32 = vmax.f32 %v554_v28, %v4300_v30  ;;  %v165_v28 = vld [vmem:[%s4323_s13 + $0x88] sm:$0xff] }
  0x73   : > { %253 = vst.msk [vmem:[#allocation2 + $0x238] sm:$0xf] %vm184_vm1, %v4037_v0 }
  0x74   : > { %257 = vst.msk [vmem:[#allocation2 + $0x258] sm:$0xf] %vm184_vm1, %v4037_v0 }
  0x75   : > { %261 = vst.msk [vmem:[#allocation2 + $0x278] sm:$0xf] %vm184_vm1, %v4037_v0 }
  0x76   : > { %265 = vst.msk [vmem:[#allocation2 + $0x298] sm:$0xf] %vm184_vm1, %v4037_v0 }
  0x77   : > { %269 = vst.msk [vmem:[#allocation2 + $0x2b8] sm:$0xf] %vm184_vm1, %v4037_v0 }
  0x78   : > { %273 = vst.msk [vmem:[#allocation2 + $0x2d8] sm:$0xf] %vm184_vm1, %v4037_v0 }
  0x79   : > { %277 = vst.msk [vmem:[#allocation2 + $0x2f8] sm:$0xf] %vm184_vm1, %v4037_v0 }
  0x7a   : > { %281 = vst.msk [vmem:[#allocation2 + $0x318] sm:$0xf] %vm184_vm1, %v4037_v0 }
  0x7b   : > { %285 = vst.msk [vmem:[#allocation2 + $0x338] sm:$0xf] %vm184_vm1, %v4037_v0 }
  0x7c   : > { %289 = vst.msk [vmem:[#allocation2 + $0x358] sm:$0xf] %vm184_vm1, %v4037_v0 }
  0x7d   : > { %293 = vst.msk [vmem:[#allocation2 + $0x378] sm:$0xf] %vm184_vm1, %v4037_v0  ;;  %v433_v0 = vld [vmem:[#allocation2 + $0x350] sm:$0xff]  ;;  %v410_v1 = vld [vmem:[#allocation2 + $0x298] sm:$0xf] }
  0x7e   : > { %295 = vst.msk [vmem:[#allocation2 + $0xc6] sm:$0xff] %vm180_vm0, %v148_v33  ;;  %v414_v2 = vld [vmem:[#allocation2 + $0x2b8] sm:$0xf]  ;;  %v541_v7 = vmax.f32 %v4421_v63, %v433_v0 }
  0x7f   : > { %v4343_v35 = vld [vmem:[#allocation2 + $0x2d8] sm:$0xf]  ;;  %3944 = vst.msk [vmem:[%s4340_s17 + $0x300] sm:$0xff] %vm180_vm0, %v148_v33  ;;  %v4444_v11 = vmax.f32 %v410_v1, %v414_v2  ;;  %v4477_v33 = vmax.f32 %v633_v16, %v433_v0 }
  0x80   : > { %v422_v38 = vld [vmem:[#allocation2 + $0x2f8] sm:$0xf]  ;;  %296 = vst.msk [vmem:[#allocation2 + $0xce] sm:$0xff] %vm180_vm0, %v149_v34  ;;  %v637_v17 = vmax.f32 %v4432_v5, %v541_v7  ;;  %v4454_v18 = vmax.f32 %v414_v2, %v4343_v35 }
  0x81   : > { %v4353_v39 = vld [vmem:[#allocation2 + $0x318] sm:$0xf]  ;;  %v4356_v40 = vmax.f32 %v4343_v35, %v422_v38  ;;  %3945 = vst.msk [vmem:[%s4340_s17 + $0x308] sm:$0xff] %vm180_vm0, %v149_v34  ;;  %v166_v35 = vld [vmem:[%s4323_s13 + $0x90] sm:$0xff] }
  0x82   : > { %v4361_v42 = vld [vmem:[#allocation2 + $0x338] sm:$0xf]  ;;  %v4364_v43 = vmax.f32 %v422_v38, %v4353_v39  ;;  %297 = vst.msk [vmem:[#allocation2 + $0xe6] sm:$0xff] %vm180_vm0, %v150_v36  ;;  %v4479_v34 = vmax.f32 %v637_v17, %v437_v21  ;;  %v328_v38 = vld [vmem:[#allocation2 + $0x8] sm:$0xff] }
  0x83   : > { %v4367_v44 = vld [vmem:[#allocation2 + $0x358] sm:$0xf]  ;;  %v538_v45 = vmax.f32 %v4353_v39, %v4361_v42  ;;  %3946 = vst.msk [vmem:[%s4340_s17 + $0x310] sm:$0xff] %vm180_vm0, %v150_v36  ;;  %v626_v22 = vmax.f32 %v4444_v11, %v4356_v40  ;;  %v327_v36 = vld [vmem:[#allocation2] sm:$0xff] }
  0x84   : > { %v542_v47 = vmax.f32 %v4361_v42, %v4367_v44  ;;  %298 = vst.msk [vmem:[#allocation2 + $0xee] sm:$0xff] %vm180_vm0, %v151_v41  ;;  %v630_v24 = vmax.f32 %v4454_v18, %v4364_v43  ;;  %v167_v7 = vld [vmem:[%s4323_s13 + $0x98] sm:$0xff] }
  0x85   : > { %v4380_v49 = vmax.f32 %v4356_v40, %v538_v45  ;;  %3947 = vst.msk [vmem:[%s4340_s17 + $0x318] sm:$0xff] %vm180_vm0, %v151_v41  ;;  %v331_v40 = vld [vmem:[#allocation2 + $0x20] sm:$0xff]  ;;  %v4488_v41 = vmax.f32 %v626_v22, %v4353_v39  ;;  %v332_v45 = vld [vmem:[#allocation2 + $0x28] sm:$0xff] }
  0x86   : > { %v4386_v51 = vmax.f32 %v4364_v43, %v542_v47  ;;  %299 = vst.msk [vmem:[#allocation2 + $0x106] sm:$0xff] %vm180_vm0, %v152_v46  ;;  %v336_v47 = vld [vmem:[#allocation2 + $0x48] sm:$0xff]  ;;  %v339_v39 = vld [vmem:[#allocation2 + $0x60] sm:$0xff] }
  0x87   : > { %v4389_v52 = vld [vmem:[#allocation2 + $0xd0] sm:$0xff]  ;;  %3948 = vst.msk [vmem:[%s4340_s17 + $0x320] sm:$0xff] %vm180_vm0, %v152_v46  ;;  %v335_v46 = vld [vmem:[#allocation2 + $0x40] sm:$0xff]  ;;  %v352_v22 = vld [vmem:[#allocation2 + $0xc8] sm:$0xff] }
  0x88   : > { %v4395_v54 = vmax.f32 %v553_v48, %v4389_v52  ;;  %300 = vst.msk [vmem:[#allocation2 + $0x10e] sm:$0xff] %vm180_vm0, %v153_v50  ;;  %v4465_v23 = vmax.f32 %v4197_v12, %v4389_v52  ;;  %v4482_v12 = vmax.f32 %v558_v19, %v4468_v26  ;;  %v439_v48 = vmax.f32 %v327_v36, %v331_v40  ;;  %v168_v19 = vld [vmem:[%s4323_s13 + $0xa0] sm:$0xff] }
  0x89   : > { %3949 = vst.msk [vmem:[%s4340_s17 + $0x328] sm:$0xff] %vm180_vm0, %v153_v50  ;;  %v4495_v50 = vmax.f32 %v4300_v30, %v4468_v26  ;;  %v348_v30 = vld [vmem:[#allocation2 + $0xa8] sm:$0xff]  ;;  %v447_v0 = vmax.f32 %v335_v46, %v339_v39 }
  0x8a   : > { %301 = vst.msk [vmem:[#allocation2 + $0x126] sm:$0xff] %vm180_vm0, %v154_v53  ;;  %v557_v43 = vmax.f32 %v4187_v9, %v4465_v23  ;;  %v343_v9 = vld [vmem:[#allocation2 + $0x80] sm:$0xff]  ;;  %v456_v16 = vmax.f32 %v344_v60, %v348_v30 }
  0x8b   : > { %3950 = vst.msk [vmem:[%s4340_s17 + $0x330] sm:$0xff] %vm180_vm0, %v154_v53  ;;  %v4498_v53 = vmax.f32 %v630_v24, %v4361_v42  ;;  %v451_v42 = vmax.f32 %v339_v39, %v343_v9  ;;  %v562_v2 = vmax.f32 %v4287_v25, %v4495_v50  ;;  %v4509_v6 = vld [vmem:[#allocation2 + $0xf0] sm:$0xff]  ;;  %v4523_v24 = vld [vmem:[#allocation2 + $0xe0] sm:$0xff] }
  0x8c   : > { %302 = vst.msk [vmem:[#allocation2 + $0x12e] sm:$0xff] %vm180_vm0, %v155_v55  ;;  %v4515_v17 = vmax.f32 %v557_v43, %v4509_v6 }
  0x8d   : > { %3951 = vst.msk [vmem:[%s4340_s17 + $0x338] sm:$0xff] %vm180_vm0, %v155_v55  ;;  %v340_v55 = vld [vmem:[#allocation2 + $0x68] sm:$0xff] }
  0x8e   : > { %303 = vst.msk [vmem:[#allocation2 + $0x146] sm:$0xff] %vm180_vm0, %v156_v56  ;;  %v448_v1 = vmax.f32 %v336_v47, %v340_v55 }
  0x8f   : > { %3952 = vst.msk [vmem:[%s4340_s17 + $0x340] sm:$0xff] %vm180_vm0, %v156_v56  ;;  %v440_v56 = vmax.f32 %v328_v38, %v332_v45 }
  0x90   : > { %304 = vst.msk [vmem:[#allocation2 + $0x14e] sm:$0xff] %vm180_vm0, %v157_v57  ;;  %v552_v36 = vmax.f32 %v448_v1, %v456_v16 }
  0x91   : > { %3953 = vst.msk [vmem:[%s4340_s17 + $0x348] sm:$0xff] %vm180_vm0, %v157_v57  ;;  %v443_v57 = vmax.f32 %v331_v40, %v335_v46  ;;  %v544_v25 = vmax.f32 %v440_v56, %v448_v1  ;;  %v4529_v40 = vld [vmem:[#allocation2 + $0xe8] sm:$0xff]  ;;  %v4540_v46 = vmax.f32 %v4389_v52, %v4509_v6 }
  0x92   : > { %7960 = vst [vmem:[#allocation4_spill] sm:$0xff] %v4421_v63  ;;  %v177_v63 = vld [vmem:[%s4323_s13 + $0xe8] sm:$0xff] }
  0x93   : > { %305 = vst.msk [vmem:[#allocation2 + $0x166] sm:$0xff] %vm180_vm0, %v158_v58  ;;  %v547_v21 = vmax.f32 %v443_v57, %v451_v42 }
  0x94   : > { %3954 = vst.msk [vmem:[%s4340_s17 + $0x350] sm:$0xff] %vm180_vm0, %v158_v58  ;;  %v444_v58 = vmax.f32 %v332_v45, %v336_v47  ;;  %v4533_v45 = vmax.f32 %v348_v30, %v352_v22  ;;  %v169_v47 = vld [vmem:[%s4323_s13 + $0xa8] sm:$0xff] }
  0x95   : > { %306 = vst.msk [vmem:[#allocation2 + $0x16e] sm:$0xff] %vm180_vm0, %v159_v61 }
  0x96   : > { %3955 = vst.msk [vmem:[%s4340_s17 + $0x358] sm:$0xff] %vm180_vm0, %v159_v61  ;;  %v347_v61 = vld [vmem:[#allocation2 + $0xa0] sm:$0xff] }
  0x97   : > { %7961 = vst [vmem:[#allocation5_spill] sm:$0xff] %v4444_v11  ;;  %v4552_v56 = vmax.f32 %v547_v21, %v347_v61 }
  0x98   : > { %307 = vst.msk [vmem:[#allocation2 + $0x186] sm:$0xff] %vm180_vm0, %v160_v3 }
  0x99   : > { %3956 = vst.msk [vmem:[%s4340_s17 + $0x360] sm:$0xff] %vm180_vm0, %v160_v3  ;;  %v4507_v3 = vmax.f32 %v4380_v49, %v4367_v44  ;;  %v4519_v44 = vld [vmem:[#allocation2 + $0x118] sm:$0xf]  ;;  %v351_v49 = vld [vmem:[#allocation2 + $0xc0] sm:$0xff] }
  0x9a   : > { %308 = vst.msk [vmem:[#allocation2 + $0x18e] sm:$0xff] %vm180_vm0, %v161_v10  ;;  %v4526_v38 = vmax.f32 %v562_v2, %v4519_v44  ;;  %v4531_v43 = vmax.f32 %v347_v61, %v351_v49 }
  0x9b   : > { %7962 = vst [vmem:[#allocation6_spill] sm:$0xff] %v4454_v18 }
  0x9c   : > { %3957 = vst.msk [vmem:[%s4340_s17 + $0x368] sm:$0xff] %vm180_vm0, %v161_v10  ;;  %v452_v10 = vmax.f32 %v340_v55, %v344_v60  ;;  %v4550_v55 = vmax.f32 %v544_v25, %v344_v60  ;;  %v555_v57 = vmax.f32 %v451_v42, %v4531_v43  ;;  %v4563_v60 = vld [vmem:[#allocation2 + $0x100] sm:$0xff] }
  0x9d   : > { %309 = vst.msk [vmem:[#allocation2 + $0x1a6] sm:$0xff] %vm180_vm0, %v162_v15 }
  0x9e   : > { %3958 = vst.msk [vmem:[%s4340_s17 + $0x370] sm:$0xff] %vm180_vm0, %v162_v15  ;;  %v455_v15 = vmax.f32 %v343_v9, %v347_v61  ;;  %v4565_v61 = vld [vmem:[#allocation2 + $0x110] sm:$0xff]  ;;  %v833_v21 = vrot.slane %v4550_v55, 1 }
  0x9f   : > { %310 = vst.msk [vmem:[#allocation2 + $0x1ae] sm:$0xff] %vm180_vm0, %v163_v20 }
  0xa0   : > { %7963 = vst [vmem:[#allocation7_spill] sm:$0xff] %v4477_v33 }
  0xa1   : > { %7964 = vst [vmem:[#allocation8_spill] sm:$0xff] %v4479_v34 }
  0xa2   : > { %3959 = vst.msk [vmem:[%s4340_s17 + $0x378] sm:$0xff] %vm180_vm0, %v163_v20  ;;  %v543_v20 = vmax.f32 %v439_v48, %v447_v0  ;;  %v4546_v48 = vmax.f32 %v352_v22, %v4529_v40 }
  0xa3   : > { %7965 = vst [vmem:[#allocation9_spill] sm:$0xff] %v4488_v41  ;;  %v7971_v41 = vrot.slane %v4395_v54, 1 }
  0xa4   : > { %311 = vst.msk [vmem:[#allocation2 + $0x1c6] sm:$0xff] %vm180_vm0, %v164_v27  ;;  %v4548_v39 = vmax.f32 %v543_v20, %v343_v9  ;;  %v170_v9 = vld [vmem:[%s4323_s13 + $0xb0] sm:$0xff]  ;;  %v560_v1 = vmax.f32 %v456_v16, %v4546_v48 }
  0xa5   : > { %7966 = vst [vmem:[#allocation10_spill] sm:$0xff] %v4495_v50 }
  0xa6   : > { %3960 = vst.msk [vmem:[%s4340_s17 + $0x380] sm:$0xff] %vm180_vm0, %v164_v27  ;;  %v548_v27 = vmax.f32 %v444_v58, %v452_v10  ;;  %v556_v58 = vmax.f32 %v452_v10, %v4533_v45  ;;  %v4575_v10 = vld [vmem:[#allocation2 + $0x108] sm:$0xff]  ;;  %v832_v25 = vrot.slane %v4548_v39, 1 }
  0xa7   : > { %312 = vst.msk [vmem:[#allocation2 + $0x1ce] sm:$0xff] %vm180_vm0, %v165_v28  ;;  %v4593_v20 = vmax.f32 %v560_v1, %v4575_v10 }
  0xa8   : > { %7967 = vst [vmem:[#allocation11_spill] sm:$0xff] %v4507_v3  ;;  %v4568_v2 = vmax.f32 %v548_v27, %v348_v30  ;;  %v173_v3 = vld [vmem:[%s4323_s13 + $0xc8] sm:$0xff] }
  0xa9   : > { %3961 = vst.msk [vmem:[%s4340_s17 + $0x388] sm:$0xff] %vm180_vm0, %v165_v28  ;;  %v551_v28 = vmax.f32 %v447_v0, %v455_v15  ;;  %v561_v0 = vmax.f32 %v4350_v37, %v4540_v46  ;;  %v4578_v37 = vmax.f32 %v555_v57, %v4523_v24 }
  0xaa   : > { %313 = vst.msk [vmem:[#allocation2 + $0x1e6] sm:$0xff] %vm180_vm0, %v166_v35  ;;  %v840_v27 = vrot.slane %v4568_v2, 1 }
  0xab   : > { %3962 = vst.msk [vmem:[%s4340_s17 + $0x390] sm:$0xff] %vm180_vm0, %v166_v35  ;;  %v4536_v35 = vmax.f32 %v351_v49, %v4523_v24  ;;  %v4570_v42 = vmax.f32 %v551_v28, %v351_v49  ;;  %v4587_v30 = vmax.f32 %v561_v0, %v4565_v61  ;;  %v7737_v49 = vrot.slane %v4202_v13, 1 }
  0xac   : > { %314 = vst.msk [vmem:[#allocation2 + $0x1ee] sm:$0xff] %vm180_vm0, %v167_v7  ;;  %v7738_v28 = vrot.slane %v4205_v14, 1 }
  0xad   : > { %7968 = vst [vmem:[#allocation12_spill] sm:$0xff] %v4536_v35  ;;  %v559_v52 = vmax.f32 %v455_v15, %v4536_v35  ;;  %v4581_v15 = vmax.f32 %v556_v58, %v4529_v40  ;;  %v846_v57 = vrot.slane %v4570_v42, 1  ;;  %v836_v0 = vsel %vm831_vm2, %v833_v21, %v7737_v49 }
  0xae   : > { %7969 = vst [vmem:[#allocation13_spill] sm:$0xff] %v4540_v46  ;;  %v7741_v49 = vrot.slane %v4515_v17, 1  ;;  %v4642_v34 = vmax.f32 %v4550_v55, %v836_v0  ;;  %v175_v0 = vld [vmem:[%s4323_s13 + $0xd8] sm:$0xff] }
  0xaf   : > { %3963 = vst.msk [vmem:[%s4340_s17 + $0x398] sm:$0xff] %vm180_vm0, %v167_v7  ;;  %v4572_v7 = vmax.f32 %v552_v36, %v352_v22  ;;  %v4584_v16 = vmax.f32 %v559_v52, %v4563_v60  ;;  %v839_v22 = vrot.slane %v4552_v56, 1  ;;  %v172_v36 = vld [vmem:[%s4323_s13 + $0xc0] sm:$0xff] }
  0xb0   : > { %7970 = vst [vmem:[#allocation14_spill] sm:$0xff] %v4546_v48 }
  0xb1   : > { %315 = vst.msk [vmem:[#allocation2 + $0x206] sm:$0xff] %vm180_vm0, %v168_v19  ;;  %v847_v58 = vrot.slane %v4572_v7, 1  ;;  %v841_v1 = vsel %vm831_vm2, %v839_v22, %v840_v27  ;;  %v860_v22 = vrot.slane %v4584_v16, 1 }
  0xb2   : > { %3964 = vst.msk [vmem:[%s4340_s17 + $0x3a0] sm:$0xff] %vm180_vm0, %v168_v19  ;;  %v171_v19 = vld [vmem:[%s4323_s13 + $0xb8] sm:$0xff]  ;;  %v4645_v33 = vmax.f32 %v4552_v56, %v841_v1 }
  0xb3   : > { %316 = vst.msk [vmem:[#allocation2 + $0x20e] sm:$0xff] %vm180_vm0, %v169_v47  ;;  %v848_v52 = vsel %vm831_vm2, %v846_v57, %v847_v58  ;;  %v850_v18 = vsel %vm831_vm2, %v847_v58, %v7971_v41  ;;  %v174_v41 = vld [vmem:[%s4323_s13 + $0xd0] sm:$0xff] }
  0xb4   : > { %3965 = vst.msk [vmem:[%s4340_s17 + $0x3a8] sm:$0xff] %vm180_vm0, %v169_v47  ;;  %v834_v47 = vsel %vm831_vm2, %v832_v25, %v833_v21  ;;  %v853_v25 = vrot.slane %v4578_v37, 1  ;;  %v854_v21 = vrot.slane %v4581_v15, 1  ;;  %v4662_v1 = vmax.f32 %v4572_v7, %v850_v18 }
  0xb5   : > { %317 = vst.msk [vmem:[#allocation2 + $0x226] sm:$0xff] %vm180_vm0, %v170_v9  ;;  %v4632_v57 = vmax.f32 %v4548_v39, %v834_v47  ;;  %v7749_v18 = vrot.slane %v4642_v34, 2 }
  0xb6   : > { %3966 = vst.msk [vmem:[%s4340_s17 + $0x3b0] sm:$0xff] %vm180_vm0, %v170_v9  ;;  %v843_v9 = vsel %vm831_vm2, %v840_v27, %v7738_v28  ;;  %v861_v27 = vrot.slane %v4593_v20, 1  ;;  %v855_v58 = vsel %vm831_vm2, %v853_v25, %v854_v21  ;;  %v857_v28 = vsel %vm831_vm2, %v854_v21, %v7741_v49 }
  0xb7   : > { %318 = vst.msk [vmem:[#allocation2 + $0x22e] sm:$0xff] %vm180_vm0, %v171_v19  ;;  %v4653_v25 = vmax.f32 %v4568_v2, %v843_v9  ;;  %v4656_v21 = vmax.f32 %v4570_v42, %v848_v52  ;;  %v1108_v49 = vmax.f32 %v4578_v37, %v855_v58  ;;  %v176_v52 = vld [vmem:[%s4323_s13 + $0xe0] sm:$0xff] }
  0xb8   : > { %3967 = vst.msk [vmem:[%s4340_s17 + $0x3b8] sm:$0xff] %vm180_vm0, %v171_v19  ;;  %v7743_v19 = vrot.slane %v4587_v30, 1  ;;  %v862_v47 = vsel %vm831_vm2, %v860_v22, %v861_v27  ;;  %v4666_v22 = vmax.f32 %v4581_v15, %v857_v28  ;;  %v1296_v28 = vrot.slane %v4645_v33, 2 }
  0xb9   : > { %319 = vst.msk [vmem:[#allocation2 + $0x246] sm:$0xff] %vm180_vm0, %v172_v36  ;;  %v1112_v11 = vmax.f32 %v4584_v16, %v862_v47  ;;  %v1303_v58 = vrot.slane %v4656_v21, 2  ;;  %v7750_v47 = vrot.slane %v4662_v1, 2 }
  0xba   : > { %3968 = vst.msk [vmem:[%s4340_s17 + $0x3c0] sm:$0xff] %vm180_vm0, %v172_v36  ;;  %v864_v36 = vsel %vm831_vm2, %v861_v27, %v7743_v19  ;;  %v7751_v27 = vrot.slane %v4653_v25, 2  ;;  %v1310_v19 = vrot.slane %v1108_v49, 2 }
  0xbb   : > { %320 = vst.msk [vmem:[#allocation2 + $0x24e] sm:$0xff] %vm180_vm0, %v173_v3  ;;  %v4671_v9 = vmax.f32 %v4593_v20, %v864_v36  ;;  %v1317_v50 = vrot.slane %v1112_v11, 2  ;;  %v1305_v48 = vsel %vm1288_vm3, %v1303_v58, %v7750_v47  ;;  %v178_v58 = vld [vmem:[%s4323_s13 + $0xf0] sm:$0xff]  ;;  %v1602_v47 = vrot.slane %v4548_v39, 4 }
  0xbc   : > { %3969 = vst.msk [vmem:[%s4340_s17 + $0x3c8] sm:$0xff] %vm180_vm0, %v173_v3  ;;  %v1289_v3 = vrot.slane %v4632_v57, 2  ;;  %v1298_v46 = vsel %vm1288_vm3, %v1296_v28, %v7751_v27  ;;  %v1535_v28 = vmax.f32 %v4656_v21, %v1305_v48  ;;  %v7759_v27 = vrot.slane %v4550_v55, 4  ;;  %v179_v21 = vld [vmem:[%s4323_s13 + $0xf8] sm:$0xff] }
  0xbd   : > { %321 = vst.msk [vmem:[#allocation2 + $0x266] sm:$0xff] %vm180_vm0, %v174_v41  ;;  %v7760_v35 = vrot.slane %v4671_v9, 2  ;;  %v1616_v48 = vrot.slane %v4570_v42, 4  ;;  %v7756_v39 = vrot.slane %v4572_v7, 4 }
  0xbe   : > { %3970 = vst.msk [vmem:[%s4340_s17 + $0x3d0] sm:$0xff] %vm180_vm0, %v174_v41  ;;  %v1291_v36 = vsel %vm1288_vm3, %v1289_v3, %v7749_v18  ;;  %v7761_v41 = vrot.slane %v4666_v22, 2  ;;  %v1532_v18 = vmax.f32 %v4645_v33, %v1298_v46  ;;  %v1609_v33 = vrot.slane %v4552_v56, 4 }
  0xbf   : > { %322 = vst.msk [vmem:[#allocation2 + $0x26e] sm:$0xff] %vm180_vm0, %v175_v0  ;;  %v1529_v3 = vmax.f32 %v4632_v57, %v1291_v36  ;;  %v1319_v57 = vsel %vm1288_vm3, %v1317_v50, %v7760_v35  ;;  %v7758_v46 = vrot.slane %v4568_v2, 4  ;;  %v1604_v50 = vsel %vm1601_vm4, %v1602_v47, %v7759_v27 }
  0xc0   : > { %3971 = vst.msk [vmem:[%s4340_s17 + $0x3d8] sm:$0xff] %vm180_vm0, %v175_v0  ;;  %v1312_v0 = vsel %vm1288_vm3, %v1310_v19, %v7761_v41  ;;  %v1541_v19 = vmax.f32 %v1112_v11, %v1319_v57  ;;  %v7753_v56 = vrot.slane %v4593_v20, 4  ;;  %v7752_v57 = vrot.slane %v4295_v29, 1 }
  0xc1   : > { %323 = vst.msk [vmem:[#allocation2 + $0x286] sm:$0xff] %vm180_vm0, %v176_v52  ;;  %v1538_v36 = vmax.f32 %v1108_v49, %v1312_v0  ;;  %v1623_v49 = vrot.slane %v4578_v37, 4  ;;  %v1611_v11 = vsel %vm1601_vm4, %v1609_v33, %v7758_v46  ;;  %v1842_v42 = vmax.f32 %v1529_v3, %v1604_v50 }
  0xc2   : > { %3972 = vst.msk [vmem:[%s4340_s17 + $0x3e0] sm:$0xff] %vm180_vm0, %v176_v52  ;;  %v7754_v52 = vrot.slane %v4581_v15, 4  ;;  %v1618_v37 = vsel %vm1601_vm4, %v1616_v48, %v7756_v39  ;;  %v4739_v0 = vmax.f32 %v1532_v18, %v1611_v11  ;;  %v7755_v48 = vrot.slane %v4303_v31, 1 }
  0xc3   : > { %324 = vst.msk [vmem:[#allocation2 + $0x28e] sm:$0xff] %vm180_vm0, %v177_v63  ;;  %v4745_v3 = vmax.f32 %v1535_v28, %v1618_v37  ;;  %v7757_v50 = vrot.slane %v4308_v32, 1  ;;  %v7974_v28 = vrot.slane %v4202_v13, 1  ;;  %v858_v11 = vrot.slane %v4482_v12, 1 }
  0xc4   : > { %3973 = vst.msk [vmem:[%s4340_s17 + $0x3e8] sm:$0xff] %vm180_vm0, %v177_v63  ;;  %v1630_v63 = vrot.slane %v4584_v16, 4  ;;  %v1625_v47 = vsel %vm1601_vm4, %v1623_v49, %v7754_v52  ;;  %v1914_v18 = vmax.f32 %v1842_v42, %v4739_v0  ;;  %v7977_v37 = vrot.slane %v4395_v54, 1 }
  0xc5   : > { %325 = vst.msk [vmem:[#allocation2 + $0x2a6] sm:$0xff] %vm180_vm0, %v178_v58 }
  0xc6   : > { %3974 = vst.msk [vmem:[%s4340_s17 + $0x3f0] sm:$0xff] %vm180_vm0, %v178_v58  ;;  %v1632_v16 = vsel %vm1601_vm4, %v1630_v63, %v7753_v56  ;;  %v1851_v58 = vmax.f32 %v1538_v36, %v1625_v47  ;;  %v838_v36 = vsel %vm831_vm2, %v7974_v28, %v7752_v57  ;;  %v7976_v63 = vrot.slane %v4205_v14, 1 }
  0xc7   : > { %326 = vst.msk [vmem:[#allocation2 + $0x2ae] sm:$0xff] %vm180_vm0, %v179_v21  ;;  %v4750_v33 = vmax.f32 %v1541_v19, %v1632_v16  ;;  %v865_v19 = vrot.slane %v4526_v38, 1  ;;  %v852_v47 = vsel %vm831_vm2, %v7977_v37, %v7757_v50  ;;  %v4782_v16 = vmax.f32 %v4202_v13, %v838_v36 }
  0xc8   : > { %3975 = vst.msk [vmem:[%s4340_s17 + $0x3f8] sm:$0xff] %vm180_vm0, %v179_v21  ;;  %v4756_v49 = vmax.f32 %v4745_v3, %v1851_v58  ;;  %v845_v42 = vsel %vm831_vm2, %v7976_v63, %v7755_v48  ;;  %v7979_v28 = vrot.slane %v4515_v17, 1  ;;  %v7980_v56 = vrot.slane %v4587_v30, 1  ;;  %v438_v48 = vld [vmem:[#allocation2 + $0x378] sm:$0xf] }
  0xc9   : > { %7972 = vst [vmem:[#allocation15_spill] sm:$0xff] %v4750_v33  ;;  %v4766_v21 = vmax.f32 %v1851_v58, %v4750_v33  ;;  %v4792_v63 = vmax.f32 %v4205_v14, %v845_v42  ;;  %v4795_v37 = vmax.f32 %v4395_v54, %v852_v47  ;;  %v4819_v41 = vmax.f32 %v4386_v51, %v438_v48 }
  0xca   : > { %7973 = vst [vmem:[#allocation16_spill] sm:$0xff] %v4756_v49  ;;  %v1980_v58 = vmax.f32 %v1914_v18, %v4756_v49  ;;  %v859_v57 = vsel %vm831_vm2, %v7979_v28, %v858_v11  ;;  %v866_v52 = vsel %vm831_vm2, %v7980_v56, %v865_v19  ;;  %v409_v39 = vld [vmem:[#allocation2 + $0x290] sm:$0xff]  ;;  %v7763_v28 = vrot.slane %v4782_v16, 2 }
  0xcb   : > { %7975 = vst [vmem:[#allocation17_spill] sm:$0xff] %v4766_v21  ;;  %v4798_v36 = vmax.f32 %v4515_v17, %v859_v57  ;;  %v4801_v18 = vmax.f32 %v4587_v30, %v866_v52  ;;  %v7982_v57 = vrot.slane %v4642_v34, 2  ;;  %v7769_v52 = vrot.slane %v4795_v37, 2 }
  0xcc   : > { %3896 = vst.msk [vmem:[%s4340_s17 + $0x1fc] sm:$0xf0] %vm3674_vm5, %v4750_v33  ;;  %v4805_v50 = vmax.f32 %v1980_v58, %v4750_v33  ;;  %v7984_v42 = vrot.slane %v4792_v63, 2  ;;  %v7985_v49 = vrot.slane %v4653_v25, 2  ;;  %v7987_v51 = vrot.slane %v4666_v22, 2 }
  0xcd   : > { %7978 = vst [vmem:[#allocation18_spill] sm:$0xff] %v4782_v16  ;;  %v1293_v47 = vsel %vm1288_vm3, %v7982_v57, %v7763_v28  ;;  %v1313_v35 = vrot.slane %v4798_v36, 2  ;;  %v1320_v58 = vrot.slane %v4801_v18, 2  ;;  %v7986_v28 = vrot.slane %v4662_v1, 2 }
  0xce   : > { %7981 = vst [vmem:[#allocation19_spill] sm:$0xff] %v4805_v50  ;;  %v413_v27 = vld [vmem:[#allocation2 + $0x2b0] sm:$0xff]  ;;  %v1300_v57 = vsel %vm1288_vm3, %v7985_v49, %v7984_v42  ;;  %v7988_v48 = vrot.slane %v4671_v9, 2  ;;  %v7990_v33 = vrot.slane %v4550_v55, 4  ;;  %v8002_v29 = vrot.slane %v4792_v63, 2 }
  0xcf   : > { %7983 = vst [vmem:[#allocation20_spill] sm:$0xff] %v4819_v41  ;;  %v4821_v56 = vmax.f32 %v409_v39, %v413_v27  ;;  %v4824_v46 = vmax.f32 %v413_v27, %v4414_v59  ;;  %v1307_v16 = vsel %vm1288_vm3, %v7986_v28, %v7769_v52  ;;  %v1314_v39 = vsel %vm1288_vm3, %v7987_v51, %v1313_v35 }
  0xd0   : > { %v1321_v59 = vsel %vm1288_vm3, %v7988_v48, %v1320_v58  ;;  %v1530_v27 = vmax.f32 %v4642_v34, %v1293_v47  ;;  %v1533_v42 = vmax.f32 %v4653_v25, %v1300_v57  ;;  %v1536_v41 = vmax.f32 %v4662_v1, %v1307_v16 }
  0xd1   : > { %v625_v28 = vmax.f32 %v4821_v56, %v4428_v4  ;;  %v1539_v52 = vmax.f32 %v4666_v22, %v1314_v39  ;;  %v7989_v51 = vrot.slane %v4202_v13, 4  ;;  %v7991_v34 = vrot.slane %v4205_v14, 4 }
  0xd2   : > { %v7992_v47 = vrot.slane %v4568_v2, 4  ;;  %v629_v25 = vmax.f32 %v4824_v46, %v4432_v5  ;;  %v1542_v1 = vmax.f32 %v4671_v9, %v1321_v59  ;;  %v1619_v4 = vrot.slane %v4395_v54, 4  ;;  %v8009_v54 = vld [vmem:[#allocation12_spill] sm:$0xff] }
  0xd3   : > { %v1606_v48 = vsel %vm1601_vm4, %v7990_v33, %v7989_v51  ;;  %v1626_v22 = vrot.slane %v4515_v17, 4  ;;  %v1633_v16 = vrot.slane %v4587_v30, 4  ;;  %v1111_v33 = vmax.f32 %v4482_v12, %v858_v11 }
  0xd4   : > { %v1613_v49 = vsel %vm1601_vm4, %v7992_v47, %v7991_v34  ;;  %v1843_v55 = vmax.f32 %v1530_v27, %v1606_v48  ;;  %v7993_v2 = vrot.slane %v4572_v7, 4  ;;  %v7994_v51 = vrot.slane %v4581_v15, 4 }
  0xd5   : > { %v1846_v57 = vmax.f32 %v1533_v42, %v1613_v49  ;;  %v1115_v59 = vmax.f32 %v4526_v38, %v865_v19  ;;  %v1628_v17 = vrot.slane %v4482_v12, 4  ;;  %v7995_v30 = vrot.slane %v4593_v20, 4 }
  0xd6   : > { %v1620_v39 = vsel %vm1601_vm4, %v7993_v2, %v1619_v4  ;;  %v1627_v9 = vsel %vm1601_vm4, %v7994_v51, %v1626_v22  ;;  %v1315_v7 = vrot.slane %v1111_v33, 2  ;;  %v1635_v2 = vrot.slane %v4526_v38, 4 }
  0xd7   : > { %v1634_v27 = vsel %vm1601_vm4, %v7995_v30, %v1633_v16  ;;  %v1849_v11 = vmax.f32 %v1536_v41, %v1620_v39  ;;  %v1852_v49 = vmax.f32 %v1539_v52, %v1627_v9  ;;  %v1915_v42 = vmax.f32 %v1843_v55, %v1846_v57  ;;  %v4929_v39 = vld [vmem:[#allocation2 + $0x130] sm:$0xff] }
  0xd8   : > { %v4880_v48 = vmax.f32 %v1542_v1, %v1634_v27  ;;  %v1322_v34 = vrot.slane %v1115_v59, 2  ;;  %v1629_v15 = vsel %vm1601_vm4, %v1626_v22, %v1628_v17  ;;  %v4888_v12 = vmax.f32 %v4523_v24, %v4563_v60 }
  0xd9   : > { %v4883_v47 = vmax.f32 %v1849_v11, %v1852_v49  ;;  %v4892_v20 = vmax.f32 %v4529_v40, %v4575_v10  ;;  %v1316_v19 = vsel %vm1288_vm3, %v1313_v35, %v1315_v7  ;;  %v4904_v38 = vmax.f32 %v4509_v6, %v4565_v61  ;;  %v4951_v7 = vld [vmem:[#allocation2 + $0x138] sm:$0xf] }
  0xda   : > { %v4895_v41 = vmax.f32 %v1852_v49, %v4880_v48  ;;  %3897 = vst.msk [vmem:[%s4340_s17 + $0x204] sm:$0xff] %vm180_vm0, %v4880_v48  ;;  %v1323_v52 = vsel %vm1288_vm3, %v1320_v58, %v1322_v34  ;;  %v1540_v1 = vmax.f32 %v4798_v36, %v1316_v19  ;;  %v1636_v22 = vsel %vm1601_vm4, %v1633_v16, %v1635_v2  ;;  %v4925_v16 = vld [vmem:[#allocation2 + $0x120] sm:$0xff] }
  0xdb   : > { %7996 = vst [vmem:[#allocation21_spill] sm:$0xff] %v4883_v47  ;;  %v1981_v24 = vmax.f32 %v1915_v42, %v4883_v47  ;;  %v1543_v40 = vmax.f32 %v4801_v18, %v1323_v52  ;;  %v563_v55 = vmax.f32 %v4531_v43, %v4888_v12  ;;  %v564_v35 = vmax.f32 %v4533_v45, %v4892_v20  ;;  %v4927_v43 = vld [vmem:[#allocation2 + $0x128] sm:$0xff] }
  0xdc   : > { %7997 = vst [vmem:[#allocation22_spill] sm:$0xff] %v4895_v41  ;;  %v565_v58 = vmax.f32 %v4465_v23, %v4904_v38  ;;  %v1917_v6 = vmax.f32 %v4739_v0, %v4745_v3  ;;  %v4921_v36 = vmax.f32 %v1540_v1, %v1629_v15  ;;  %v4933_v45 = vmax.f32 %v4468_v26, %v4519_v44 }
  0xdd   : > { %v4919_v33 = vmax.f32 %v1981_v24, %v4880_v48  ;;  %v4923_v18 = vmax.f32 %v1543_v40, %v1636_v22  ;;  %v659_v23 = vmax.f32 %v563_v55, %v4925_v16  ;;  %v660_v0 = vmax.f32 %v564_v35, %v4927_v43 }
  0xde   : > { %v661_v3 = vmax.f32 %v565_v58, %v4929_v39  ;;  %v1983_v51 = vmax.f32 %v1917_v6, %v4766_v21  ;;  %v4940_v9 = vmax.f32 %v625_v28, %v4419_v62  ;;  %v566_v26 = vmax.f32 %v4439_v8, %v4933_v45 }
  0xdf   : > { %7998 = vst [vmem:[#allocation23_spill] sm:$0xff] %v4919_v33  ;;  %v4944_v59 = vmax.f32 %v4921_v36, %v4923_v18  ;;  %v1918_v17 = vmax.f32 %v1846_v57, %v1849_v11  ;;  %v867_v30 = vrot.slane %v659_v23, 1  ;;  %v868_v27 = vrot.slane %v660_v0, 1 }
  0xe0   : > { %3898 = vst.msk [vmem:[%s4340_s17 + $0x20c] sm:$0xf] %vm184_vm1, %v4923_v18  ;;  %v870_v49 = vrot.slane %v661_v3, 1  ;;  %v1637_v42 = vrot.slane %v659_v23, 4  ;;  %v1638_v34 = vrot.slane %v660_v0, 4  ;;  %v662_v62 = vmax.f32 %v566_v26, %v4951_v7 }
  0xe1   : > { %7999 = vst [vmem:[#allocation24_spill] sm:$0xff] %v4944_v59  ;;  %v1640_v28 = vrot.slane %v661_v3, 4  ;;  %v1984_v15 = vmax.f32 %v1918_v17, %v4895_v41  ;;  %v869_v2 = vsel %vm831_vm2, %v867_v30, %v868_v27  ;;  %v8000_v52 = vrot.slane %v4303_v31, 1 }
  0xe2   : > { %v871_v19 = vsel %vm831_vm2, %v868_v27, %v870_v49  ;;  %v8001_v57 = vrot.slane %v4308_v32, 1  ;;  %v1116_v24 = vmax.f32 %v659_v23, %v869_v2  ;;  %v1639_v40 = vsel %vm1601_vm4, %v1637_v42, %v1638_v34 }
  0xe3   : > { %v1103_v8 = vmax.f32 %v4303_v31, %v8000_v52  ;;  %v1117_v1 = vmax.f32 %v660_v0, %v871_v19  ;;  %v872_v22 = vrot.slane %v662_v62, 1  ;;  %v1641_v55 = vsel %vm1601_vm4, %v1638_v34, %v1640_v28 }
  0xe4   : > { %v1107_v11 = vmax.f32 %v4308_v32, %v8001_v57  ;;  %v1614_v6 = vrot.slane %v4303_v31, 4  ;;  %v1324_v26 = vrot.slane %v1116_v24, 2  ;;  %v8003_v0 = vrot.slane %v4795_v37, 2 }
  0xe5   : > { %v1301_v35 = vrot.slane %v1103_v8, 2  ;;  %v1325_v17 = vrot.slane %v1117_v1, 2  ;;  %v873_v30 = vsel %vm831_vm2, %v870_v49, %v872_v22  ;;  %v1119_v27 = vmax.f32 %v662_v62, %v872_v22 }
  0xe6   : > { %v1308_v58 = vrot.slane %v1107_v11, 2  ;;  %v1118_v52 = vmax.f32 %v661_v3, %v873_v30  ;;  %v8004_v34 = vrot.slane %v4205_v14, 4  ;;  %v1621_v11 = vrot.slane %v4308_v32, 4 }
  0xe7   : > { %v1302_v23 = vsel %vm1288_vm3, %v8002_v29, %v1301_v35  ;;  %v1326_v31 = vsel %vm1288_vm3, %v1324_v26, %v1325_v17  ;;  %v1329_v19 = vrot.slane %v1119_v27, 2  ;;  %v1642_v29 = vrot.slane %v662_v62, 4  ;;  %v8006_v26 = vld [vmem:[#allocation15_spill] sm:$0xff] }
  0xe8   : > { %v1309_v42 = vsel %vm1288_vm3, %v8003_v0, %v1308_v58  ;;  %v1615_v2 = vsel %vm1601_vm4, %v8004_v34, %v1614_v6  ;;  %v1534_v8 = vmax.f32 %v4792_v63, %v1302_v23  ;;  %v1544_v3 = vmax.f32 %v1116_v24, %v1326_v31  ;;  %v8011_v23 = vld [vmem:[#allocation13_spill] sm:$0xff] }
  0xe9   : > { %v1537_v49 = vmax.f32 %v4795_v37, %v1309_v42  ;;  %v1327_v57 = vrot.slane %v1118_v52, 2  ;;  %v4984_v14 = vmax.f32 %v4563_v60, %v4925_v16  ;;  %v4988_v35 = vmax.f32 %v4575_v10, %v4927_v43  ;;  %v8012_v42 = vld [vmem:[#allocation4_spill] sm:$0xff] }
  0xea   : > { %v4980_v22 = vmax.f32 %v1534_v8, %v1615_v2  ;;  %v4992_v63 = vmax.f32 %v4565_v61, %v4929_v39  ;;  %v4994_v37 = vmax.f32 %v1544_v3, %v1639_v40  ;;  %v1622_v24 = vsel %vm1601_vm4, %v1619_v4, %v1621_v11 }
  0xeb   : > { %v1328_v32 = vsel %vm1288_vm3, %v1325_v17, %v1327_v57  ;;  %v1330_v62 = vsel %vm1288_vm3, %v1327_v57, %v1329_v19  ;;  %v1643_v6 = vsel %vm1601_vm4, %v1640_v28, %v1642_v29  ;;  %v5002_v10 = vmax.f32 %v1537_v49, %v1622_v24 }
  0xec   : > { %8005 = vst [vmem:[#allocation25_spill] sm:$0xff] %v4980_v22  ;;  %v1545_v60 = vmax.f32 %v1117_v1, %v1328_v32  ;;  %v1546_v58 = vmax.f32 %v1118_v52, %v1330_v62  ;;  %v5006_v61 = vmax.f32 %v8006_v26, %v4994_v37  ;;  %v5009_v40 = vmax.f32 %v1983_v51, %v4994_v37  ;;  %v8010_v1 = vld [vmem:[#allocation14_spill] sm:$0xff]  ;;  %v5024_v51 = vld [vmem:[#allocation2 + $0x140] sm:$0xff]  ;;  %v5026_v52 = vld [vmem:[#allocation2 + $0x148] sm:$0xff] }
  0xed   : > { %3899 = vst.msk [vmem:[%s4340_s17 + $0x20c] sm:$0xf0] %vm3674_vm5, %v4994_v37  ;;  %v567_v4 = vmax.f32 %v8009_v54, %v4984_v14  ;;  %v568_v17 = vmax.f32 %v8010_v1, %v4988_v35  ;;  %v1919_v27 = vmax.f32 %v4980_v22, %v5002_v10  ;;  %v569_v0 = vmax.f32 %v8011_v23, %v4992_v63  ;;  %v8015_v32 = vld [vmem:[#allocation10_spill] sm:$0xff] }
  0xee   : > { %8007 = vst [vmem:[#allocation15_spill] sm:$0xff] %v5006_v61  ;;  %v5018_v28 = vmax.f32 %v1545_v60, %v1641_v55  ;;  %v5020_v30 = vmax.f32 %v1546_v58, %v1643_v6  ;;  %v5034_v34 = vmax.f32 %v629_v25, %v8012_v42  ;;  %v5036_v55 = vld [vmem:[#allocation2 + $0x150] sm:$0xff]  ;;  %v5042_v19 = vmax.f32 %v4519_v44, %v4951_v7  ;;  %v5070_v58 = vld [vmem:[#allocation2 + $0x158] sm:$0xf] }
  0xef   : > { %8008 = vst [vmem:[#allocation26_spill] sm:$0xff] %v5009_v40  ;;  %v663_v2 = vmax.f32 %v567_v4, %v5024_v51  ;;  %v664_v31 = vmax.f32 %v568_v17, %v5026_v52  ;;  %v1985_v5 = vmax.f32 %v1919_v27, %v4944_v59  ;;  %v665_v25 = vmax.f32 %v569_v0, %v5036_v55 }
  0xf0   : > { %v5046_v8 = vmax.f32 %v4880_v48, %v5018_v28  ;;  %v5049_v49 = vmax.f32 %v1984_v15, %v5018_v28  ;;  %3900 = vst.msk [vmem:[%s4340_s17 + $0x214] sm:$0xff] %vm180_vm0, %v5018_v28  ;;  %v5062_v48 = vmax.f32 %v4925_v16, %v5024_v51  ;;  %v570_v62 = vmax.f32 %v8015_v32, %v5042_v19 }
  0xf1   : > { %3901 = vst.msk [vmem:[%s4340_s17 + $0x21c] sm:$0xf] %vm184_vm1, %v5020_v30  ;;  %v874_v44 = vrot.slane %v663_v2, 1  ;;  %v875_v57 = vrot.slane %v664_v31, 1  ;;  %v877_v15 = vrot.slane %v665_v25, 1  ;;  %v1644_v11 = vrot.slane %v663_v2, 4 }
  0xf2   : > { %8013 = vst [vmem:[#allocation12_spill] sm:$0xff] %v5046_v8  ;;  %v1645_v29 = vrot.slane %v664_v31, 4  ;;  %v5067_v24 = vmax.f32 %v1985_v5, %v5020_v30  ;;  %v5074_v6 = vmax.f32 %v4927_v43, %v5026_v52  ;;  %v5078_v16 = vmax.f32 %v4929_v39, %v5036_v55  ;;  %v5089_v5 = vld [vmem:[#allocation2 + $0x160] sm:$0xff] }
  0xf3   : > { %8014 = vst [vmem:[#allocation14_spill] sm:$0xff] %v5049_v49  ;;  %v876_v60 = vsel %vm831_vm2, %v874_v44, %v875_v57  ;;  %v878_v26 = vsel %vm831_vm2, %v875_v57, %v877_v15  ;;  %v666_v4 = vmax.f32 %v570_v62, %v5070_v58  ;;  %v1647_v1 = vrot.slane %v665_v25, 4  ;;  %v5093_v44 = vld [vmem:[#allocation2 + $0x170] sm:$0xff] }
  0xf4   : > { %8016 = vst [vmem:[#allocation13_spill] sm:$0xff] %v5067_v24  ;;  %v1120_v54 = vmax.f32 %v663_v2, %v876_v60  ;;  %v1121_v17 = vmax.f32 %v664_v31, %v878_v26  ;;  %v571_v27 = vmax.f32 %v4888_v12, %v5062_v48  ;;  %v572_v23 = vmax.f32 %v4892_v20, %v5074_v6  ;;  %v5091_v2 = vld [vmem:[#allocation2 + $0x168] sm:$0xff] }
  0xf5   : > { %v573_v43 = vmax.f32 %v4904_v38, %v5078_v16  ;;  %v1646_v39 = vsel %vm1601_vm4, %v1644_v11, %v1645_v29  ;;  %v879_v42 = vrot.slane %v666_v4, 1  ;;  %v5097_v31 = vmax.f32 %v4951_v7, %v5070_v58 }
  0xf6   : > { %v1331_v0 = vrot.slane %v1120_v54, 2  ;;  %v1332_v12 = vrot.slane %v1121_v17, 2  ;;  %v667_v20 = vmax.f32 %v571_v27, %v5089_v5  ;;  %v668_v57 = vmax.f32 %v572_v23, %v5091_v2  ;;  %v5106_v23 = vld [vmem:[#allocation2 + $0x178] sm:$0xf] }
  0xf7   : > { %v669_v38 = vmax.f32 %v573_v43, %v5093_v44  ;;  %v880_v11 = vsel %vm831_vm2, %v877_v15, %v879_v42  ;;  %v1123_v32 = vmax.f32 %v666_v4, %v879_v42  ;;  %v1649_v62 = vrot.slane %v666_v4, 4 }
  0xf8   : > { %v574_v60 = vmax.f32 %v4933_v45, %v5097_v31  ;;  %v1333_v26 = vsel %vm1288_vm3, %v1331_v0, %v1332_v12  ;;  %v1122_v3 = vmax.f32 %v665_v25, %v880_v11  ;;  %v881_v50 = vrot.slane %v667_v20, 1 }
  0xf9   : > { %v882_v7 = vrot.slane %v668_v57, 1  ;;  %v1547_v33 = vmax.f32 %v1120_v54, %v1333_v26  ;;  %v1336_v41 = vrot.slane %v1123_v32, 2  ;;  %v884_v27 = vrot.slane %v669_v38, 1 }
  0xfa   : > { %v1651_v21 = vrot.slane %v667_v20, 4  ;;  %v1334_v43 = vrot.slane %v1122_v3, 2  ;;  %v1652_v42 = vrot.slane %v668_v57, 4  ;;  %v670_v4 = vmax.f32 %v574_v60, %v5106_v23 }
  0xfb   : > { %v883_v15 = vsel %vm831_vm2, %v881_v50, %v882_v7  ;;  %v5110_v49 = vmax.f32 %v1547_v33, %v1646_v39  ;;  %v1648_v45 = vsel %vm1601_vm4, %v1645_v29, %v1647_v1  ;;  %v885_v25 = vsel %vm831_vm2, %v882_v7, %v884_v27 }
  0xfc   : > { %v1124_v0 = vmax.f32 %v667_v20, %v883_v15  ;;  %v1335_v54 = vsel %vm1288_vm3, %v1332_v12, %v1334_v43  ;;  %v1337_v11 = vsel %vm1288_vm3, %v1334_v43, %v1336_v41  ;;  %v1650_v32 = vsel %vm1601_vm4, %v1647_v1, %v1649_v62 }
  0xfd   : > { %8017 = vst [vmem:[#allocation4_spill] sm:$0xff] %v5110_v49  ;;  %v1125_v26 = vmax.f32 %v668_v57, %v885_v25  ;;  %v1548_v50 = vmax.f32 %v1121_v17, %v1335_v54  ;;  %v1549_v60 = vmax.f32 %v1122_v3, %v1337_v11  ;;  %v1654_v39 = vrot.slane %v669_v38, 4  ;;  %v5161_v54 = vld [vmem:[#allocation2 + $0x188] sm:$0xff] }
  0xfe   : > { %3902 = vst.msk [vmem:[%s4340_s17 + $0x21c] sm:$0xf0] %vm3674_vm5, %v5110_v49  ;;  %v1338_v33 = vrot.slane %v1124_v0, 2  ;;  %v5122_v29 = vmax.f32 %v4994_v37, %v5110_v49  ;;  %v1653_v12 = vsel %vm1601_vm4, %v1651_v21, %v1652_v42  ;;  %v886_v41 = vrot.slane %v670_v4, 1 }
  0xff   : > { %v1339_v20 = vrot.slane %v1125_v26, 2  ;;  %v5125_v7 = vmax.f32 %v1548_v50, %v1648_v45  ;;  %v5127_v1 = vmax.f32 %v1549_v60, %v1650_v32  ;;  %v5131_v17 = vmax.f32 %v5024_v51, %v5089_v5  ;;  %v5169_v32 = vld [vmem:[#allocation2 + $0x190] sm:$0xff] }
 0x100   : > { %8018 = vst [vmem:[#allocation10_spill] sm:$0xff] %v5122_v29  ;;  %v5135_v3 = vmax.f32 %v5026_v52, %v5091_v2  ;;  %v887_v57 = vsel %vm831_vm2, %v884_v27, %v886_v41  ;;  %v1127_v62 = vmax.f32 %v670_v4, %v886_v41  ;;  %v1656_v43 = vrot.slane %v670_v4, 4 }
 0x101   : > { %8019 = vst [vmem:[#allocation27_spill] sm:$0xff] %v5125_v7  ;;  %v1340_v37 = vsel %vm1288_vm3, %v1338_v33, %v1339_v20  ;;  %v1126_v15 = vmax.f32 %v669_v38, %v887_v57  ;;  %v1655_v45 = vsel %vm1601_vm4, %v1652_v42, %v1654_v39  ;;  %v5145_v51 = vmax.f32 %v5036_v55, %v5093_v44 }
 0x102   : > { %8020 = vst [vmem:[#allocation28_spill] sm:$0xff] %v5127_v1  ;;  %v1550_v21 = vmax.f32 %v1124_v0, %v1340_v37  ;;  %v1657_v52 = vsel %vm1601_vm4, %v1654_v39, %v1656_v43  ;;  %v575_v27 = vmax.f32 %v4984_v14, %v5131_v17  ;;  %v576_v4 = vmax.f32 %v4988_v35, %v5135_v3  ;;  %v375_v0 = vld [vmem:[#allocation2 + $0x180] sm:$0xff]  ;;  %v5184_v43 = vld [vmem:[#allocation2 + $0x198] sm:$0xf] }
 0x103   : > { %3903 = vst.msk [vmem:[%s4340_s17 + $0x224] sm:$0xff] %vm180_vm0, %v5125_v7  ;;  %v5157_v38 = vmax.f32 %v5070_v58, %v5106_v23  ;;  %v1341_v55 = vrot.slane %v1126_v15, 2  ;;  %v1343_v25 = vrot.slane %v1127_v62, 2  ;;  %v577_v11 = vmax.f32 %v4992_v63, %v5145_v51 }
 0x104   : > { %3904 = vst.msk [vmem:[%s4340_s17 + $0x22c] sm:$0xf] %vm184_vm1, %v5127_v1  ;;  %v5159_v42 = vmax.f32 %v1550_v21, %v1653_v12  ;;  %v5167_v14 = vmax.f32 %v5018_v28, %v5125_v7  ;;  %v671_v35 = vmax.f32 %v575_v27, %v375_v0  ;;  %v672_v58 = vmax.f32 %v576_v4, %v5161_v54 }
 0x105   : > { %v578_v50 = vmax.f32 %v5042_v19, %v5157_v38  ;;  %v1342_v63 = vsel %vm1288_vm3, %v1339_v20, %v1341_v55  ;;  %v1344_v28 = vsel %vm1288_vm3, %v1341_v55, %v1343_v25  ;;  %v673_v33 = vmax.f32 %v577_v11, %v5169_v32 }
 0x106   : > { %8021 = vst [vmem:[#allocation29_spill] sm:$0xff] %v5159_v42  ;;  %v5176_v60 = vmax.f32 %v5110_v49, %v5159_v42  ;;  %v1551_v39 = vmax.f32 %v1125_v26, %v1342_v63  ;;  %v1552_v12 = vmax.f32 %v1126_v15, %v1344_v28  ;;  %v888_v41 = vrot.slane %v671_v35, 1 }
 0x107   : > { %8022 = vst [vmem:[#allocation30_spill] sm:$0xff] %v5167_v14  ;;  %v889_v37 = vrot.slane %v672_v58, 1  ;;  %v891_v57 = vrot.slane %v673_v33, 1  ;;  %v1658_v19 = vrot.slane %v671_v35, 4  ;;  %v1659_v62 = vrot.slane %v672_v58, 4 }
 0x108   : > { %3905 = vst.msk [vmem:[%s4340_s17 + $0x22c] sm:$0xf0] %vm3674_vm5, %v5159_v42  ;;  %v5187_v21 = vmax.f32 %v5089_v5, %v375_v0  ;;  %v5189_v27 = vmax.f32 %v1551_v39, %v1655_v45  ;;  %v5191_v20 = vmax.f32 %v1552_v12, %v1657_v52  ;;  %v674_v26 = vmax.f32 %v578_v50, %v5184_v43 }
 0x109   : > { %v890_v4 = vsel %vm831_vm2, %v888_v41, %v889_v37  ;;  %v892_v15 = vsel %vm831_vm2, %v889_v37, %v891_v57  ;;  %v1661_v25 = vrot.slane %v673_v33, 4  ;;  %v5198_v11 = vmax.f32 %v5091_v2, %v5161_v54 }
 0x10a   : > { %8023 = vst [vmem:[#allocation31_spill] sm:$0xff] %v5189_v27  ;;  %v1128_v55 = vmax.f32 %v671_v35, %v890_v4  ;;  %v5202_v5 = vmax.f32 %v5125_v7, %v5189_v27  ;;  %v1129_v45 = vmax.f32 %v672_v58, %v892_v15  ;;  %v1992_v52 = vmax.f32 %v5006_v61, %v5176_v60  ;;  %v5221_v15 = vld [vmem:[#allocation2 + $0x1a0] sm:$0xff]  ;;  %v5228_v7 = vld [vmem:[#allocation2 + $0x1a8] sm:$0xff] }
 0x10b   : > { %8024 = vst [vmem:[#allocation32_spill] sm:$0xff] %v5191_v20  ;;  %v893_v50 = vrot.slane %v674_v26, 1  ;;  %v1660_v63 = vsel %vm1601_vm4, %v1658_v19, %v1659_v62  ;;  %v1662_v2 = vsel %vm1601_vm4, %v1659_v62, %v1661_v25  ;;  %v5216_v28 = vmax.f32 %v5093_v44, %v5169_v32 }
 0x10c   : > { %3906 = vst.msk [vmem:[%s4340_s17 + $0x234] sm:$0xff] %vm180_vm0, %v5189_v27  ;;  %v1345_v35 = vrot.slane %v1128_v55, 2  ;;  %v1346_v39 = vrot.slane %v1129_v45, 2  ;;  %v1663_v41 = vrot.slane %v674_v26, 4  ;;  %v1993_v4 = vmax.f32 %v5046_v8, %v5202_v5 }
 0x10d   : > { %3907 = vst.msk [vmem:[%s4340_s17 + $0x23c] sm:$0xf] %vm184_vm1, %v5191_v20  ;;  %v894_v12 = vsel %vm831_vm2, %v891_v57, %v893_v50  ;;  %v1131_v58 = vmax.f32 %v674_v26, %v893_v50  ;;  %v579_v19 = vmax.f32 %v5062_v48, %v5187_v21  ;;  %v580_v62 = vmax.f32 %v5074_v6, %v5198_v11 }
 0x10e   : > { %v1130_v37 = vmax.f32 %v673_v33, %v894_v12  ;;  %v1347_v44 = vsel %vm1288_vm3, %v1345_v35, %v1346_v39  ;;  %v581_v57 = vmax.f32 %v5078_v16, %v5216_v28  ;;  %v5234_v33 = vmax.f32 %v5106_v23, %v5184_v43  ;;  %v5236_v12 = vld [vmem:[#allocation2 + $0x1b0] sm:$0xff] }
 0x10f   : > { %v1350_v40 = vrot.slane %v1131_v58, 2  ;;  %v1553_v26 = vmax.f32 %v1128_v55, %v1347_v44  ;;  %v675_v48 = vmax.f32 %v579_v19, %v5221_v15  ;;  %v676_v6 = vmax.f32 %v580_v62, %v5228_v7 }
 0x110   : > { %v1348_v50 = vrot.slane %v1130_v37, 2  ;;  %v1664_v35 = vsel %vm1601_vm4, %v1661_v25, %v1663_v41  ;;  %v5242_v58 = vmax.f32 %v581_v57, %v5236_v12  ;;  %v582_v16 = vmax.f32 %v5097_v31, %v5234_v33 }
 0x111   : > { %v5247_v23 = vmax.f32 %v375_v0, %v5221_v15  ;;  %v1866_v55 = vmax.f32 %v1553_v26, %v1660_v63  ;;  %v895_v19 = vrot.slane %v675_v48, 1  ;;  %v896_v62 = vrot.slane %v676_v6, 1  ;;  %v5267_v26 = vld [vmem:[#allocation2 + $0x1b8] sm:$0xf] }
 0x112   : > { %v1349_v44 = vsel %vm1288_vm3, %v1346_v39, %v1348_v50  ;;  %v1351_v49 = vsel %vm1288_vm3, %v1348_v50, %v1350_v40  ;;  %v898_v25 = vrot.slane %v5242_v58, 1  ;;  %v1665_v31 = vrot.slane %v675_v48, 4 }
 0x113   : > { %v1554_v47 = vmax.f32 %v1129_v45, %v1349_v44  ;;  %v1555_v8 = vmax.f32 %v1130_v37, %v1351_v49  ;;  %v5253_v41 = vmax.f32 %v5159_v42, %v1866_v55  ;;  %v5255_v57 = vmax.f32 %v1992_v52, %v1866_v55  ;;  %3908 = vst.msk [vmem:[%s4340_s17 + $0x23c] sm:$0xf0] %vm3674_vm5, %v1866_v55 }
 0x114   : > { %v1666_v0 = vrot.slane %v676_v6, 4  ;;  %v897_v49 = vsel %vm831_vm2, %v895_v19, %v896_v62  ;;  %v899_v45 = vsel %vm831_vm2, %v896_v62, %v898_v25  ;;  %v5271_v50 = vmax.f32 %v5161_v54, %v5228_v7 }
 0x115   : > { %8025 = vst [vmem:[#allocation33_spill] sm:$0xff] %v5255_v57  ;;  %v5259_v63 = vmax.f32 %v1554_v47, %v1662_v2  ;;  %v5261_v40 = vmax.f32 %v1555_v8, %v1664_v35  ;;  %v1132_v39 = vmax.f32 %v675_v48, %v897_v49  ;;  %v1133_v37 = vmax.f32 %v676_v6, %v899_v45 }
 0x116   : > { %v1995_v52 = vmax.f32 %v5122_v29, %v5253_v41  ;;  %v5275_v47 = vmax.f32 %v5127_v1, %v5191_v20  ;;  %v678_v48 = vmax.f32 %v582_v16, %v5267_v26  ;;  %v1667_v35 = vsel %vm1601_vm4, %v1665_v31, %v1666_v0  ;;  %v5315_v29 = vld [vmem:[#allocation2 + $0x1d0] sm:$0xff] }
 0x117   : > { %8026 = vst [vmem:[#allocation34_spill] sm:$0xff] %v5261_v40  ;;  %v5279_v8 = vmax.f32 %v5189_v27, %v5259_v63  ;;  %v5282_v2 = vmax.f32 %v1993_v4, %v5259_v63  ;;  %v1352_v54 = vrot.slane %v1132_v39, 2  ;;  %v1353_v6 = vrot.slane %v1133_v37, 2 }
 0x118   : > { %8027 = vst [vmem:[#allocation35_spill] sm:$0xff] %v5275_v47  ;;  %v5294_v44 = vmax.f32 %v5169_v32, %v5236_v12  ;;  %v900_v19 = vrot.slane %v678_v48, 1  ;;  %v1668_v4 = vrot.slane %v5242_v58, 4  ;;  %v583_v16 = vmax.f32 %v5131_v17, %v5247_v23  ;;  %v5313_v17 = vld [vmem:[#allocation2 + $0x1c8] sm:$0xff] }
 0x119   : > { %8028 = vst [vmem:[#allocation36_spill] sm:$0xff] %v5282_v2  ;;  %v1996_v62 = vmax.f32 %v5167_v14, %v5279_v8  ;;  %v5303_v49 = vmax.f32 %v5191_v20, %v5261_v40  ;;  %v1354_v45 = vsel %vm1288_vm3, %v1352_v54, %v1353_v6  ;;  %v584_v31 = vmax.f32 %v5135_v3, %v5271_v50  ;;  %v5311_v14 = vld [vmem:[#allocation2 + $0x1c0] sm:$0xff] }
 0x11a   : > { %3909 = vst.msk [vmem:[%s4340_s17 + $0x244] sm:$0xff] %vm180_vm0, %v5259_v63  ;;  %v585_v32 = vmax.f32 %v5145_v51, %v5294_v44  ;;  %v1556_v2 = vmax.f32 %v1132_v39, %v1354_v45  ;;  %v901_v57 = vsel %vm831_vm2, %v898_v25, %v900_v19  ;;  %v1135_v27 = vmax.f32 %v678_v48, %v900_v19 }
 0x11b   : > { %3910 = vst.msk [vmem:[%s4340_s17 + $0x24c] sm:$0xf] %vm184_vm1, %v5261_v40  ;;  %v1670_v42 = vrot.slane %v678_v48, 4  ;;  %v1134_v54 = vmax.f32 %v5242_v58, %v901_v57  ;;  %v679_v61 = vmax.f32 %v583_v16, %v5311_v14  ;;  %v680_v3 = vmax.f32 %v584_v31, %v5313_v17 }
 0x11c   : > { %8029 = vst [vmem:[#allocation37_spill] sm:$0xff] %v5303_v49  ;;  %v5321_v51 = vmax.f32 %v585_v32, %v5315_v29  ;;  %v1869_v39 = vmax.f32 %v1556_v2, %v1667_v35  ;;  %v1669_v25 = vsel %vm1601_vm4, %v1666_v0, %v1668_v4  ;;  %v1357_v48 = vrot.slane %v1135_v27, 2 }
 0x11d   : > { %v5326_v19 = vmax.f32 %v5184_v43, %v5267_v26  ;;  %v1355_v45 = vrot.slane %v1134_v54, 2  ;;  %v902_v20 = vrot.slane %v679_v61, 1  ;;  %v903_v22 = vrot.slane %v680_v3, 1 }
 0x11e   : > { %v905_v58 = vrot.slane %v5321_v51, 1  ;;  %v5329_v57 = vmax.f32 %v1866_v55, %v1869_v39  ;;  %v5331_v16 = vmax.f32 %v1995_v52, %v1869_v39  ;;  %3911 = vst.msk [vmem:[%s4340_s17 + $0x24c] sm:$0xf0] %vm3674_vm5, %v1869_v39  ;;  %v1672_v31 = vrot.slane %v679_v61, 4 }
 0x11f   : > { %v1673_v2 = vrot.slane %v680_v3, 4  ;;  %v1356_v0 = vsel %vm1288_vm3, %v1353_v6, %v1355_v45  ;;  %v1358_v27 = vsel %vm1288_vm3, %v1355_v45, %v1357_v48  ;;  %v904_v43 = vsel %vm831_vm2, %v902_v20, %v903_v22 }
 0x120   : > { %8030 = vst [vmem:[#allocation38_spill] sm:$0xff] %v5331_v16  ;;  %v906_v35 = vsel %vm831_vm2, %v903_v22, %v905_v58  ;;  %v1557_v32 = vmax.f32 %v1133_v37, %v1356_v0  ;;  %v1558_v49 = vmax.f32 %v1134_v54, %v1358_v27  ;;  %v1136_v59 = vmax.f32 %v679_v61, %v904_v43  ;;  %v5354_v54 = vld [vmem:[#allocation2 + $0x1d8] sm:$0xf]  ;;  %v5398_v43 = vld [vmem:[#allocation2 + $0x1e0] sm:$0xff] }
 0x121   : > { %v5339_v47 = vmax.f32 %v680_v3, %v906_v35  ;;  %v1671_v55 = vsel %vm1601_vm4, %v1668_v4, %v1670_v42  ;;  %v586_v52 = vmax.f32 %v5157_v38, %v5326_v19  ;;  %v1675_v16 = vrot.slane %v5321_v51, 4  ;;  %v5400_v35 = vld [vmem:[#allocation2 + $0x1e8] sm:$0xff] }
 0x122   : > { %v5347_v6 = vmax.f32 %v5221_v15, %v5311_v14  ;;  %v5349_v20 = vmax.f32 %v1557_v32, %v1669_v25  ;;  %v5351_v22 = vmax.f32 %v1558_v49, %v1671_v55  ;;  %v1359_v61 = vrot.slane %v1136_v59, 2 }
 0x123   : > { %v1360_v37 = vrot.slane %v5339_v47, 2  ;;  %v1674_v42 = vsel %vm1601_vm4, %v1672_v31, %v1673_v2  ;;  %v682_v38 = vmax.f32 %v586_v52, %v5354_v54  ;;  %v5360_v4 = vmax.f32 %v5228_v7, %v5313_v17 }
 0x124   : > { %8031 = vst [vmem:[#allocation39_spill] sm:$0xff] %v5351_v22  ;;  %v5364_v15 = vmax.f32 %v5236_v12, %v5315_v29  ;;  %v5368_v49 = vmax.f32 %v5259_v63, %v5349_v20  ;;  %v5371_v3 = vmax.f32 %v1996_v62, %v5349_v20  ;;  %v1998_v7 = vmax.f32 %v5176_v60, %v5329_v57 }
 0x125   : > { %3912 = vst.msk [vmem:[%s4340_s17 + $0x254] sm:$0xff] %vm180_vm0, %v5349_v20  ;;  %v1361_v25 = vsel %vm1288_vm3, %v1359_v61, %v1360_v37  ;;  %v907_v48 = vrot.slane %v682_v38, 1  ;;  %v1676_v45 = vsel %vm1601_vm4, %v1673_v2, %v1675_v16  ;;  %v587_v63 = vmax.f32 %v5187_v21, %v5347_v6 }
 0x126   : > { %8032 = vst [vmem:[#allocation40_spill] sm:$0xff] %v5371_v3  ;;  %v1559_v12 = vmax.f32 %v1136_v59, %v1361_v25  ;;  %v1677_v62 = vrot.slane %v682_v38, 4  ;;  %v588_v31 = vmax.f32 %v5198_v11, %v5360_v4  ;;  %v589_v0 = vmax.f32 %v5216_v28, %v5364_v15  ;;  %v5402_v11 = vld [vmem:[#allocation2 + $0x1f0] sm:$0xff] }
 0x127   : > { %3913 = vst.msk [vmem:[%s4340_s17 + $0x25c] sm:$0xf] %vm184_vm1, %v5351_v22  ;;  %v5391_v60 = vmax.f32 %v5267_v26, %v5354_v54  ;;  %v908_v59 = vsel %vm831_vm2, %v905_v58, %v907_v48  ;;  %v1999_v2 = vmax.f32 %v5202_v5, %v5368_v49  ;;  %v1139_v21 = vmax.f32 %v682_v38, %v907_v48 }
 0x128   : > { %v5393_v27 = vmax.f32 %v1559_v12, %v1674_v42  ;;  %v1138_v28 = vmax.f32 %v5321_v51, %v908_v59  ;;  %v683_v32 = vmax.f32 %v587_v63, %v5398_v43  ;;  %v684_v26 = vmax.f32 %v588_v31, %v5400_v35  ;;  %v5419_v12 = vld [vmem:[#allocation2 + $0x1f8] sm:$0xf] }
 0x129   : > { %v685_v55 = vmax.f32 %v589_v0, %v5402_v11  ;;  %v1364_v52 = vrot.slane %v1139_v21, 2  ;;  %v590_v61 = vmax.f32 %v5234_v33, %v5391_v60  ;;  %v5431_v24 = vmax.f32 %v5261_v40, %v5351_v22 }
 0x12a   : > { %v5409_v58 = vmax.f32 %v1869_v39, %v5393_v27  ;;  %v5412_v5 = vmax.f32 %v1998_v7, %v5393_v27  ;;  %3914 = vst.msk [vmem:[%s4340_s17 + $0x25c] sm:$0xf0] %vm3674_vm5, %v5393_v27  ;;  %v1362_v51 = vrot.slane %v1138_v28, 2  ;;  %v909_v42 = vrot.slane %v683_v32, 1 }
 0x12b   : > { %v910_v38 = vrot.slane %v684_v26, 1  ;;  %v912_v25 = vrot.slane %v685_v55, 1  ;;  %v1679_v48 = vrot.slane %v683_v32, 4  ;;  %v1680_v63 = vrot.slane %v684_v26, 4 }
 0x12c   : > { %8033 = vst [vmem:[#allocation41_spill] sm:$0xff] %v5412_v5  ;;  %v2001_v39 = vmax.f32 %v5253_v41, %v5409_v58  ;;  %v686_v7 = vmax.f32 %v590_v61, %v5419_v12  ;;  %v1363_v31 = vsel %vm1288_vm3, %v1360_v37, %v1362_v51  ;;  %v1365_v0 = vsel %vm1288_vm3, %v1362_v51, %v1364_v52 }
 0x12d   : > { %v911_v59 = vsel %vm831_vm2, %v909_v42, %v910_v38  ;;  %v913_v33 = vsel %vm831_vm2, %v910_v38, %v912_v25  ;;  %v1560_v21 = vmax.f32 %v5339_v47, %v1363_v31  ;;  %v1561_v5 = vmax.f32 %v1138_v28, %v1365_v0 }
 0x12e   : > { %v1140_v3 = vmax.f32 %v683_v32, %v911_v59  ;;  %v1141_v1 = vmax.f32 %v684_v26, %v913_v33  ;;  %v1678_v41 = vsel %vm1601_vm4, %v1675_v16, %v1677_v62  ;;  %v914_v37 = vrot.slane %v686_v7, 1 }
 0x12f   : > { %v1682_v61 = vrot.slane %v685_v55, 4  ;;  %v1873_v52 = vmax.f32 %v1560_v21, %v1676_v45  ;;  %v5434_v51 = vmax.f32 %v1561_v5, %v1678_v41  ;;  %v1681_v47 = vsel %vm1601_vm4, %v1679_v48, %v1680_v63  ;;  %v5451_v48 = vld [vmem:[#allocation2 + $0x200] sm:$0xff] }
 0x130   : > { %v1366_v42 = vrot.slane %v1140_v3, 2  ;;  %v1367_v38 = vrot.slane %v1141_v1, 2  ;;  %v915_v28 = vsel %vm831_vm2, %v912_v25, %v914_v37  ;;  %v1143_v32 = vmax.f32 %v686_v7, %v914_v37 }
 0x131   : > { %8034 = vst [vmem:[#allocation42_spill] sm:$0xff] %v5434_v51  ;;  %v1684_v26 = vrot.slane %v686_v7, 4  ;;  %v5439_v31 = vmax.f32 %v5349_v20, %v1873_v52  ;;  %v5441_v0 = vmax.f32 %v1999_v2, %v1873_v52  ;;  %v1683_v45 = vsel %vm1601_vm4, %v1680_v63, %v1682_v61 }
 0x132   : > { %3915 = vst.msk [vmem:[%s4340_s17 + $0x264] sm:$0xff] %vm180_vm0, %v1873_v52  ;;  %v1368_v16 = vsel %vm1288_vm3, %v1366_v42, %v1367_v38  ;;  %v1142_v5 = vmax.f32 %v685_v55, %v915_v28  ;;  %v5455_v20 = vmax.f32 %v5311_v14, %v5398_v43  ;;  %v5461_v63 = vmax.f32 %v5313_v17, %v5400_v35 }
 0x133   : > { %8035 = vst [vmem:[#allocation43_spill] sm:$0xff] %v5441_v0  ;;  %v1562_v62 = vmax.f32 %v1140_v3, %v1368_v16  ;;  %v1685_v25 = vsel %vm1601_vm4, %v1682_v61, %v1684_v26  ;;  %v2002_v2 = vmax.f32 %v5279_v8, %v5439_v31  ;;  %v5465_v3 = vmax.f32 %v5315_v29, %v5402_v11  ;;  %v5475_v8 = vld [vmem:[#allocation2 + $0x208] sm:$0xff]  ;;  %v5499_v61 = vld [vmem:[#allocation2 + $0x210] sm:$0xff] }
 0x134   : > { %3916 = vst.msk [vmem:[%s4340_s17 + $0x26c] sm:$0xf] %vm184_vm1, %v5434_v51  ;;  %v5469_v55 = vmax.f32 %v5354_v54, %v5419_v12  ;;  %v1369_v14 = vrot.slane %v1142_v5, 2  ;;  %v1371_v59 = vrot.slane %v1143_v32, 2  ;;  %v591_v33 = vmax.f32 %v5247_v23, %v5455_v20 }
 0x135   : > { %v5471_v7 = vmax.f32 %v1562_v62, %v1681_v47  ;;  %v592_v17 = vmax.f32 %v5271_v50, %v5461_v63  ;;  %v593_v29 = vmax.f32 %v5294_v44, %v5465_v3  ;;  %v5485_v54 = vmax.f32 %v5398_v43, %v5451_v48 }
 0x136   : > { %v594_v21 = vmax.f32 %v5326_v19, %v5469_v55  ;;  %v1370_v50 = vsel %vm1288_vm3, %v1367_v38, %v1369_v14  ;;  %v1372_v44 = vsel %vm1288_vm3, %v1369_v14, %v1371_v59  ;;  %v687_v43 = vmax.f32 %v591_v33, %v5451_v48 }
 0x137   : > { %v5489_v41 = vmax.f32 %v5393_v27, %v5471_v7  ;;  %v5492_v23 = vmax.f32 %v2001_v39, %v5471_v7  ;;  %3917 = vst.msk [vmem:[%s4340_s17 + $0x26c] sm:$0xf0] %vm3674_vm5, %v5471_v7  ;;  %v1563_v37 = vmax.f32 %v1141_v1, %v1370_v50  ;;  %v1564_v19 = vmax.f32 %v1142_v5, %v1372_v44  ;;  %v5503_v27 = vld [vmem:[#allocation2 + $0x218] sm:$0xf] }
 0x138   : > { %v688_v42 = vmax.f32 %v592_v17, %v5475_v8  ;;  %v689_v39 = vmax.f32 %v593_v29, %v5499_v61  ;;  %v690_v38 = vmax.f32 %v594_v21, %v5503_v27  ;;  %v5511_v1 = vmax.f32 %v5400_v35, %v5475_v8 }
 0x139   : > { %8036 = vst [vmem:[#allocation44_spill] sm:$0xff] %v5492_v23  ;;  %v2004_v47 = vmax.f32 %v5329_v57, %v5489_v41  ;;  %v1876_v28 = vmax.f32 %v1563_v37, %v1683_v45  ;;  %v5513_v32 = vmax.f32 %v1564_v19, %v1685_v25  ;;  %v916_v26 = vrot.slane %v687_v43, 1 }
 0x13a   : > { %v917_v16 = vrot.slane %v688_v42, 1  ;;  %v919_v62 = vrot.slane %v689_v39, 1  ;;  %v1686_v5 = vrot.slane %v687_v43, 4  ;;  %v1687_v14 = vrot.slane %v688_v42, 4 }
 0x13b   : > { %8037 = vst [vmem:[#allocation45_spill] sm:$0xff] %v5513_v32  ;;  %v921_v59 = vrot.slane %v690_v38, 1  ;;  %v5515_v33 = vmax.f32 %v1873_v52, %v1876_v28  ;;  %v5517_v17 = vmax.f32 %v2002_v2, %v1876_v28  ;;  %v5524_v35 = vmax.f32 %v5402_v11, %v5499_v61 }
 0x13c   : > { %3918 = vst.msk [vmem:[%s4340_s17 + $0x274] sm:$0xff] %vm180_vm0, %v1876_v28  ;;  %v918_v57 = vsel %vm831_vm2, %v916_v26, %v917_v16  ;;  %v920_v45 = vsel %vm831_vm2, %v917_v16, %v919_v62  ;;  %v1688_v29 = vsel %vm1601_vm4, %v1686_v5, %v1687_v14  ;;  %v1689_v50 = vrot.slane %v689_v39, 4  ;;  %v395_v16 = vld [vmem:[#allocation2 + $0x220] sm:$0xff]  ;;  %v5540_v5 = vld [vmem:[#allocation2 + $0x228] sm:$0xff] }
 0x13d   : > { %8038 = vst [vmem:[#allocation46_spill] sm:$0xff] %v5517_v17  ;;  %v1144_v25 = vmax.f32 %v687_v43, %v918_v57  ;;  %v922_v52 = vsel %vm831_vm2, %v919_v62, %v921_v59  ;;  %v1145_v2 = vmax.f32 %v688_v42, %v920_v45  ;;  %v2005_v44 = vmax.f32 %v5368_v49, %v5515_v33  ;;  %v5546_v57 = vld [vmem:[#allocation2 + $0x230] sm:$0xff] }
 0x13e   : > { %3919 = vst.msk [vmem:[%s4340_s17 + $0x27c] sm:$0xf] %vm184_vm1, %v5513_v32  ;;  %v1146_v21 = vmax.f32 %v689_v39, %v922_v52  ;;  %v1147_v19 = vmax.f32 %v690_v38, %v921_v59  ;;  %v1691_v11 = vrot.slane %v690_v38, 4  ;;  %v595_v26 = vmax.f32 %v5347_v6, %v5485_v54 }
 0x13f   : > { %v1373_v37 = vrot.slane %v1144_v25, 2  ;;  %v1374_v17 = vrot.slane %v1145_v2, 2  ;;  %v1690_v43 = vsel %vm1601_vm4, %v1687_v14, %v1689_v50  ;;  %v596_v62 = vmax.f32 %v5360_v4, %v5511_v1 }
 0x140   : > { %v1376_v23 = vrot.slane %v1146_v21, 2  ;;  %v1378_v42 = vrot.slane %v1147_v19, 2  ;;  %v1692_v39 = vsel %vm1601_vm4, %v1689_v50, %v1691_v11  ;;  %v597_v49 = vmax.f32 %v5364_v15, %v5524_v35 }
 0x141   : > { %v691_v38 = vmax.f32 %v595_v26, %v395_v16  ;;  %v1375_v59 = vsel %vm1288_vm3, %v1373_v37, %v1374_v17  ;;  %v692_v14 = vmax.f32 %v596_v62, %v5540_v5  ;;  %v5551_v4 = vmax.f32 %v5419_v12, %v5503_v27 }
 0x142   : > { %v1377_v6 = vsel %vm1288_vm3, %v1374_v17, %v1376_v23  ;;  %v1565_v45 = vmax.f32 %v1144_v25, %v1375_v59  ;;  %v1379_v50 = vsel %vm1288_vm3, %v1376_v23, %v1378_v42  ;;  %v693_v15 = vmax.f32 %v597_v49, %v5546_v57  ;;  %v5587_v49 = vld [vmem:[#allocation2 + $0x238] sm:$0xf] }
 0x143   : > { %v1566_v52 = vmax.f32 %v1145_v2, %v1377_v6  ;;  %v1567_v19 = vmax.f32 %v1146_v21, %v1379_v50  ;;  %v923_v11 = vrot.slane %v691_v38, 1  ;;  %v924_v37 = vrot.slane %v692_v14, 1  ;;  %v5598_v50 = vld [vmem:[#allocation2 + $0x240] sm:$0xff] }
 0x144   : > { %v1693_v26 = vrot.slane %v691_v38, 4  ;;  %v1878_v17 = vmax.f32 %v1565_v45, %v1688_v29  ;;  %v926_v62 = vrot.slane %v693_v15, 1  ;;  %v1694_v40 = vrot.slane %v692_v14, 4 }
 0x145   : > { %v5555_v0 = vmax.f32 %v1566_v52, %v1690_v43  ;;  %v5557_v12 = vmax.f32 %v1567_v19, %v1692_v39  ;;  %v925_v25 = vsel %vm831_vm2, %v923_v11, %v924_v37  ;;  %v598_v23 = vmax.f32 %v5391_v60, %v5551_v4 }
 0x146   : > { %v1696_v2 = vrot.slane %v693_v15, 4  ;;  %v5563_v21 = vmax.f32 %v5471_v7, %v1878_v17  ;;  %v5565_v42 = vmax.f32 %v2004_v47, %v1878_v17  ;;  %3920 = vst.msk [vmem:[%s4340_s17 + $0x27c] sm:$0xf0] %vm3674_vm5, %v1878_v17  ;;  %v5577_v39 = vmax.f32 %v5351_v22, %v5434_v51 }
 0x147   : > { %8039 = vst [vmem:[#allocation47_spill] sm:$0xff] %v5557_v12  ;;  %v5570_v29 = vmax.f32 %v1876_v28, %v5555_v0  ;;  %v5573_v43 = vmax.f32 %v2005_v44, %v5555_v0  ;;  %v5581_v60 = vmax.f32 %v5434_v51, %v5513_v32  ;;  %v927_v7 = vsel %vm831_vm2, %v924_v37, %v926_v62 }
 0x148   : > { %8040 = vst [vmem:[#allocation48_spill] sm:$0xff] %v5565_v42  ;;  %v1148_v47 = vmax.f32 %v691_v38, %v925_v25  ;;  %v1149_v28 = vmax.f32 %v692_v14, %v927_v7  ;;  %v1695_v44 = vsel %vm1601_vm4, %v1693_v26, %v1694_v40  ;;  %v2007_v59 = vmax.f32 %v5409_v58, %v5563_v21  ;;  %v5625_v42 = vld [vmem:[#allocation2 + $0x248] sm:$0xff] }
 0x149   : > { %8041 = vst [vmem:[#allocation49_spill] sm:$0xff] %v5573_v43  ;;  %v694_v6 = vmax.f32 %v598_v23, %v5587_v49  ;;  %v2008_v52 = vmax.f32 %v5439_v31, %v5570_v29  ;;  %v5601_v38 = vmax.f32 %v5451_v48, %v395_v16  ;;  %v5605_v19 = vmax.f32 %v5475_v8, %v5540_v5 }
 0x14a   : > { %8042 = vst [vmem:[#allocation50_spill] sm:$0xff] %v5577_v39  ;;  %v1380_v45 = vrot.slane %v1148_v47, 2  ;;  %v1381_v14 = vrot.slane %v1149_v28, 2  ;;  %v1697_v37 = vsel %vm1601_vm4, %v1694_v40, %v1696_v2  ;;  %v5610_v58 = vmax.f32 %v5499_v61, %v5546_v57 }
 0x14b   : > { %8043 = vst [vmem:[#allocation51_spill] sm:$0xff] %v5581_v60  ;;  %v928_v11 = vrot.slane %v694_v6, 1  ;;  %v1698_v26 = vrot.slane %v694_v6, 4  ;;  %v599_v31 = vmax.f32 %v5455_v20, %v5601_v38  ;;  %v600_v48 = vmax.f32 %v5461_v63, %v5605_v19 }
 0x14c   : > { %3921 = vst.msk [vmem:[%s4340_s17 + $0x284] sm:$0xff] %vm180_vm0, %v5555_v0  ;;  %v5618_v25 = vmax.f32 %v5503_v27, %v5587_v49  ;;  %v1382_v8 = vsel %vm1288_vm3, %v1380_v45, %v1381_v14  ;;  %v5623_v7 = vmax.f32 %v395_v16, %v5598_v50  ;;  %v601_v20 = vmax.f32 %v5465_v3, %v5610_v58  ;;  %v5631_v45 = vld [vmem:[#allocation2 + $0x250] sm:$0xff]  ;;  %v5639_v3 = vld [vmem:[#allocation2 + $0x258] sm:$0xf] }
 0x14d   : > { %3922 = vst.msk [vmem:[%s4340_s17 + $0x28c] sm:$0xf] %vm184_vm1, %v5557_v12  ;;  %v929_v23 = vsel %vm831_vm2, %v926_v62, %v928_v11  ;;  %v1151_v40 = vmax.f32 %v694_v6, %v928_v11  ;;  %v1568_v61 = vmax.f32 %v1148_v47, %v1382_v8  ;;  %v695_v63 = vmax.f32 %v599_v31, %v5598_v50 }
 0x14e   : > { %v1150_v43 = vmax.f32 %v693_v15, %v929_v23  ;;  %v1699_v27 = vsel %vm1601_vm4, %v1696_v2, %v1698_v26  ;;  %v696_v62 = vmax.f32 %v600_v48, %v5625_v42  ;;  %v602_v16 = vmax.f32 %v5469_v55, %v5618_v25 }
 0x14f   : > { %v1385_v60 = vrot.slane %v1151_v40, 2  ;;  %v5636_v47 = vmax.f32 %v1568_v61, %v1695_v44  ;;  %v697_v6 = vmax.f32 %v601_v20, %v5631_v45  ;;  %v930_v11 = vrot.slane %v695_v63, 1 }
 0x150   : > { %v1383_v15 = vrot.slane %v1150_v43, 2  ;;  %v931_v31 = vrot.slane %v696_v62, 1  ;;  %v1700_v8 = vrot.slane %v695_v63, 4  ;;  %v698_v23 = vmax.f32 %v602_v16, %v5639_v3 }
 0x151   : > { %v5644_v2 = vmax.f32 %v5540_v5, %v5625_v42  ;;  %v5647_v26 = vmax.f32 %v1878_v17, %v5636_v47  ;;  %v5650_v55 = vmax.f32 %v2007_v59, %v5636_v47  ;;  %3923 = vst.msk [vmem:[%s4340_s17 + $0x28c] sm:$0xf0] %vm3674_vm5, %v5636_v47  ;;  %v933_v16 = vrot.slane %v697_v6, 1 }
 0x152   : > { %v1384_v44 = vsel %vm1288_vm3, %v1381_v14, %v1383_v15  ;;  %v1386_v48 = vsel %vm1288_vm3, %v1383_v15, %v1385_v60  ;;  %v932_v20 = vsel %vm831_vm2, %v930_v11, %v931_v31  ;;  %v1701_v39 = vrot.slane %v696_v62, 4 }
 0x153   : > { %8044 = vst [vmem:[#allocation52_spill] sm:$0xff] %v5650_v55  ;;  %v1569_v40 = vmax.f32 %v1149_v28, %v1384_v44  ;;  %v1570_v61 = vmax.f32 %v1150_v43, %v1386_v48  ;;  %v1152_v5 = vmax.f32 %v695_v63, %v932_v20  ;;  %v2010_v17 = vmax.f32 %v5489_v41, %v5647_v26 }
 0x154   : > { %v935_v59 = vrot.slane %v698_v23, 1  ;;  %v934_v14 = vsel %vm831_vm2, %v931_v31, %v933_v16  ;;  %v1703_v22 = vrot.slane %v697_v6, 4  ;;  %v5666_v63 = vmax.f32 %v5513_v32, %v5557_v12 }
 0x155   : > { %v1882_v55 = vmax.f32 %v1569_v40, %v1697_v37  ;;  %v5660_v51 = vmax.f32 %v1570_v61, %v1699_v27  ;;  %v1153_v60 = vmax.f32 %v696_v62, %v934_v14  ;;  %v1387_v28 = vrot.slane %v1152_v5, 2 }
 0x156   : > { %v936_v43 = vsel %vm831_vm2, %v933_v16, %v935_v59  ;;  %v1155_v15 = vmax.f32 %v698_v23, %v935_v59  ;;  %8045 = vst [vmem:[#allocation53_spill] sm:$0xff] %v5666_v63  ;;  %v1702_v62 = vsel %vm1601_vm4, %v1700_v8, %v1701_v39  ;;  %v1704_v31 = vsel %vm1601_vm4, %v1701_v39, %v1703_v22  ;;  %v5699_v59 = vld [vmem:[#allocation2 + $0x268] sm:$0xff] }
 0x157   : > { %v5669_v11 = vmax.f32 %v5555_v0, %v1882_v55  ;;  %v5671_v41 = vmax.f32 %v2008_v52, %v1882_v55  ;;  %3924 = vst.msk [vmem:[%s4340_s17 + $0x294] sm:$0xff] %vm180_vm0, %v1882_v55  ;;  %v1154_v37 = vmax.f32 %v697_v6, %v936_v43  ;;  %v1388_v27 = vrot.slane %v1153_v60, 2 }
 0x158   : > { %3925 = vst.msk [vmem:[%s4340_s17 + $0x29c] sm:$0xf] %vm184_vm1, %v5660_v51  ;;  %v1392_v44 = vrot.slane %v1155_v15, 2  ;;  %v5684_v0 = vmax.f32 %v5546_v57, %v5631_v45  ;;  %v603_v52 = vmax.f32 %v5485_v54, %v5623_v7  ;;  %v1705_v61 = vrot.slane %v698_v23, 4  ;;  %v5697_v57 = vld [vmem:[#allocation2 + $0x260] sm:$0xff] }
 0x159   : > { %8046 = vst [vmem:[#allocation54_spill] sm:$0xff] %v5671_v41  ;;  %v1390_v48 = vrot.slane %v1154_v37, 2  ;;  %v2011_v40 = vmax.f32 %v5515_v33, %v5669_v11  ;;  %v1389_v6 = vsel %vm1288_vm3, %v1387_v28, %v1388_v27  ;;  %v604_v8 = vmax.f32 %v5511_v1, %v5644_v2  ;;  %v5703_v1 = vld [vmem:[#allocation2 + $0x270] sm:$0xff] }
 0x15a   : > { %v5693_v39 = vmax.f32 %v5587_v49, %v5639_v3  ;;  %v1571_v20 = vmax.f32 %v1152_v5, %v1389_v6  ;;  %v605_v54 = vmax.f32 %v5524_v35, %v5684_v0  ;;  %v699_v49 = vmax.f32 %v603_v52, %v5697_v57 }
 0x15b   : > { %v1391_v33 = vsel %vm1288_vm3, %v1388_v27, %v1390_v48  ;;  %v1393_v16 = vsel %vm1288_vm3, %v1390_v48, %v1392_v44  ;;  %v700_v5 = vmax.f32 %v604_v8, %v5699_v59  ;;  %v1706_v43 = vsel %vm1601_vm4, %v1703_v22, %v1705_v61  ;;  %v5747_v8 = vld [vmem:[#allocation2 + $0x278] sm:$0xf] }
 0x15c   : > { %v1572_v23 = vmax.f32 %v1153_v60, %v1391_v33  ;;  %v1573_v14 = vmax.f32 %v1154_v37, %v1393_v16  ;;  %v5707_v28 = vmax.f32 %v1571_v20, %v1702_v62  ;;  %v701_v15 = vmax.f32 %v605_v54, %v5703_v1 }
 0x15d   : > { %v606_v35 = vmax.f32 %v5551_v4, %v5693_v39  ;;  %v937_v37 = vrot.slane %v699_v49, 1  ;;  %v938_v44 = vrot.slane %v700_v5, 1  ;;  %v5729_v4 = vmax.f32 %v5598_v50, %v5697_v57 }
 0x15e   : > { %v5713_v27 = vmax.f32 %v1572_v23, %v1704_v31  ;;  %v5715_v60 = vmax.f32 %v1573_v14, %v1706_v43  ;;  %v5719_v48 = vmax.f32 %v5636_v47, %v5707_v28  ;;  %v5722_v62 = vmax.f32 %v2010_v17, %v5707_v28  ;;  %3926 = vst.msk [vmem:[%s4340_s17 + $0x29c] sm:$0xf0] %vm3674_vm5, %v5707_v28 }
 0x15f   : > { %v940_v22 = vrot.slane %v701_v15, 1  ;;  %v939_v47 = vsel %vm831_vm2, %v937_v37, %v938_v44  ;;  %v1707_v17 = vrot.slane %v699_v49, 4  ;;  %v1708_v50 = vrot.slane %v700_v5, 4 }
 0x160   : > { %8047 = vst [vmem:[#allocation55_spill] sm:$0xff] %v5715_v60  ;;  %v5732_v31 = vmax.f32 %v1882_v55, %v5713_v27  ;;  %v5735_v52 = vmax.f32 %v2011_v40, %v5713_v27  ;;  %v1156_v61 = vmax.f32 %v699_v49, %v939_v47  ;;  %v2013_v55 = vmax.f32 %v5563_v21, %v5719_v48 }
 0x161   : > { %8048 = vst [vmem:[#allocation56_spill] sm:$0xff] %v5722_v62  ;;  %v941_v6 = vsel %vm831_vm2, %v938_v44, %v940_v22  ;;  %v702_v20 = vmax.f32 %v606_v35, %v5747_v8  ;;  %v1710_v33 = vrot.slane %v701_v15, 4  ;;  %v5754_v54 = vmax.f32 %v5557_v12, %v5660_v51 }
 0x162   : > { %8049 = vst [vmem:[#allocation57_spill] sm:$0xff] %v5735_v52  ;;  %v1157_v40 = vmax.f32 %v700_v5, %v941_v6  ;;  %v2014_v16 = vmax.f32 %v5570_v29, %v5732_v31  ;;  %v1394_v23 = vrot.slane %v1156_v61, 2  ;;  %v5758_v14 = vmax.f32 %v5625_v42, %v5699_v59  ;;  %v5780_v52 = vld [vmem:[#allocation2 + $0x288] sm:$0xff] }
 0x163   : > { %3927 = vst.msk [vmem:[%s4340_s17 + $0x2a4] sm:$0xff] %vm180_vm0, %v5713_v27  ;;  %v5762_v21 = vmax.f32 %v5631_v45, %v5703_v1  ;;  %v1709_v5 = vsel %vm1601_vm4, %v1707_v17, %v1708_v50  ;;  %v942_v43 = vrot.slane %v702_v20, 1  ;;  %v1711_v35 = vsel %vm1601_vm4, %v1708_v50, %v1710_v33  ;;  %v5778_v50 = vld [vmem:[#allocation2 + $0x280] sm:$0xff] }
 0x164   : > { %3928 = vst.msk [vmem:[%s4340_s17 + $0x2ac] sm:$0xf] %vm184_vm1, %v5715_v60  ;;  %v1395_v49 = vrot.slane %v1157_v40, 2  ;;  %v607_v29 = vmax.f32 %v5601_v38, %v5729_v4  ;;  %v608_v37 = vmax.f32 %v5605_v19, %v5758_v14  ;;  %v5774_v44 = vmax.f32 %v5639_v3, %v5747_v8 }
 0x165   : > { %8050 = vst [vmem:[#allocation58_spill] sm:$0xff] %v5754_v54  ;;  %v609_v42 = vmax.f32 %v5610_v58, %v5762_v21  ;;  %v943_v47 = vsel %vm831_vm2, %v940_v22, %v942_v43  ;;  %v1159_v17 = vmax.f32 %v702_v20, %v942_v43  ;;  %v1712_v6 = vrot.slane %v702_v20, 4  ;;  %v4005_v54 = vld [vmem:[#allocation2 + $0x290] sm:$0xff] }
 0x166   : > { %v1396_v45 = vsel %vm1288_vm3, %v1394_v23, %v1395_v49  ;;  %v1158_v62 = vmax.f32 %v701_v15, %v943_v47  ;;  %v703_v19 = vmax.f32 %v607_v29, %v5778_v50  ;;  %v704_v58 = vmax.f32 %v608_v37, %v5780_v52 }
 0x167   : > { %v1574_v38 = vmax.f32 %v1156_v61, %v1396_v45  ;;  %v1399_v41 = vrot.slane %v1159_v17, 2  ;;  %v1713_v3 = vsel %vm1601_vm4, %v1710_v33, %v1712_v6  ;;  %v705_v23 = vmax.f32 %v609_v42, %v4005_v54  ;;  %v4006_v45 = vld [vmem:[#allocation2 + $0x298] sm:$0xf] }
 0x168   : > { %v610_v22 = vmax.f32 %v5618_v25, %v5774_v44  ;;  %v1397_v43 = vrot.slane %v1158_v62, 2  ;;  %v944_v63 = vrot.slane %v703_v19, 1  ;;  %v945_v12 = vrot.slane %v704_v58, 1 }
 0x169   : > { %v1887_v20 = vmax.f32 %v1574_v38, %v1709_v5  ;;  %v947_v32 = vrot.slane %v705_v23, 1  ;;  %v1714_v61 = vrot.slane %v703_v19, 4  ;;  %v1715_v15 = vrot.slane %v704_v58, 4 }
 0x16a   : > { %v706_v29 = vmax.f32 %v610_v22, %v4006_v45  ;;  %v1398_v33 = vsel %vm1288_vm3, %v1395_v49, %v1397_v43  ;;  %v1400_v25 = vsel %vm1288_vm3, %v1397_v43, %v1399_v41  ;;  %v946_v17 = vsel %vm831_vm2, %v944_v63, %v945_v12 }
 0x16b   : > { %v5788_v37 = vmax.f32 %v5707_v28, %v1887_v20  ;;  %v5790_v47 = vmax.f32 %v2013_v55, %v1887_v20  ;;  %3929 = vst.msk [vmem:[%s4340_s17 + $0x2ac] sm:$0xf0] %vm3674_vm5, %v1887_v20  ;;  %v1575_v5 = vmax.f32 %v1157_v40, %v1398_v33  ;;  %v1576_v42 = vmax.f32 %v1158_v62, %v1400_v25  ;;  %v5824_v33 = vld [vmem:[#allocation2 + $0x2a0] sm:$0xff] }
 0x16c   : > { %v948_v6 = vsel %vm831_vm2, %v945_v12, %v947_v32  ;;  %v1160_v38 = vmax.f32 %v703_v19, %v946_v17  ;;  %v5802_v55 = vmax.f32 %v5697_v57, %v5778_v50  ;;  %v949_v41 = vrot.slane %v706_v29, 1  ;;  %v5838_v17 = vld [vmem:[#allocation2 + $0x2a8] sm:$0xff] }
 0x16d   : > { %8051 = vst [vmem:[#allocation59_spill] sm:$0xff] %v5790_v47  ;;  %v1161_v22 = vmax.f32 %v704_v58, %v948_v6  ;;  %v2016_v28 = vmax.f32 %v5647_v26, %v5788_v37  ;;  %v1888_v49 = vmax.f32 %v1575_v5, %v1711_v35  ;;  %v5804_v47 = vmax.f32 %v1576_v42, %v1713_v3 }
 0x16e   : > { %v1717_v62 = vrot.slane %v705_v23, 4  ;;  %v1401_v40 = vrot.slane %v1160_v38, 2  ;;  %v1716_v43 = vsel %vm1601_vm4, %v1714_v61, %v1715_v15  ;;  %v5809_v12 = vmax.f32 %v5699_v59, %v5780_v52 }
 0x16f   : > { %8052 = vst [vmem:[#allocation60_spill] sm:$0xff] %v5804_v47  ;;  %v1402_v63 = vrot.slane %v1161_v22, 2  ;;  %v5812_v19 = vmax.f32 %v5713_v27, %v1888_v49  ;;  %v5814_v26 = vmax.f32 %v2014_v16, %v1888_v49  ;;  %v950_v57 = vsel %vm831_vm2, %v947_v32, %v949_v41 }
 0x170   : > { %3930 = vst.msk [vmem:[%s4340_s17 + $0x2b4] sm:$0xff] %vm180_vm0, %v1888_v49  ;;  %v1719_v35 = vrot.slane %v706_v29, 4  ;;  %v1162_v3 = vmax.f32 %v705_v23, %v950_v57  ;;  %v1718_v61 = vsel %vm1601_vm4, %v1715_v15, %v1717_v62  ;;  %v1163_v59 = vmax.f32 %v706_v29, %v949_v41 }
 0x171   : > { %8053 = vst [vmem:[#allocation61_spill] sm:$0xff] %v5814_v26  ;;  %v1403_v58 = vsel %vm1288_vm3, %v1401_v40, %v1402_v63  ;;  %v2017_v16 = vmax.f32 %v5669_v11, %v5812_v19  ;;  %v5830_v32 = vmax.f32 %v5703_v1, %v4005_v54  ;;  %v611_v23 = vmax.f32 %v5623_v7, %v5802_v55 }
 0x172   : > { %3931 = vst.msk [vmem:[%s4340_s17 + $0x2bc] sm:$0xf] %vm184_vm1, %v5804_v47  ;;  %v1577_v27 = vmax.f32 %v1160_v38, %v1403_v58  ;;  %v1720_v25 = vsel %vm1601_vm4, %v1717_v62, %v1719_v35  ;;  %v1404_v5 = vrot.slane %v1162_v3, 2  ;;  %v1406_v42 = vrot.slane %v1163_v59, 2 }
 0x173   : > { %v612_v15 = vmax.f32 %v5644_v2, %v5809_v12  ;;  %v613_v11 = vmax.f32 %v5684_v0, %v5830_v32  ;;  %v5843_v6 = vmax.f32 %v5747_v8, %v4006_v45  ;;  %v5847_v1 = vmax.f32 %v5778_v50, %v5824_v33  ;;  %v4007_v45 = vld [vmem:[#allocation2 + $0x2b0] sm:$0xff] }
 0x174   : > { %v5836_v29 = vmax.f32 %v1577_v27, %v1716_v43  ;;  %v1405_v54 = vsel %vm1288_vm3, %v1402_v63, %v1404_v5  ;;  %v1407_v7 = vsel %vm1288_vm3, %v1404_v5, %v1406_v42  ;;  %v707_v2 = vmax.f32 %v611_v23, %v5824_v33 }
 0x175   : > { %v708_v38 = vmax.f32 %v612_v15, %v5838_v17  ;;  %v1578_v8 = vmax.f32 %v1161_v22, %v1405_v54  ;;  %v1579_v50 = vmax.f32 %v1162_v3, %v1407_v7  ;;  %v709_v62 = vmax.f32 %v613_v11, %v4007_v45 }
 0x176   : > { %v5854_v41 = vmax.f32 %v1887_v20, %v5836_v29  ;;  %v5857_v0 = vmax.f32 %v2016_v28, %v5836_v29  ;;  %3932 = vst.msk [vmem:[%s4340_s17 + $0x2bc] sm:$0xf0] %vm3674_vm5, %v5836_v29  ;;  %v951_v40 = vrot.slane %v707_v2, 1  ;;  %v1721_v43 = vrot.slane %v707_v2, 4 }
 0x177   : > { %v952_v63 = vrot.slane %v708_v38, 1  ;;  %v5862_v57 = vmax.f32 %v1578_v8, %v1718_v61  ;;  %v5864_v35 = vmax.f32 %v1579_v50, %v1720_v25  ;;  %v1722_v20 = vrot.slane %v708_v38, 4 }
 0x178   : > { %8054 = vst [vmem:[#allocation62_spill] sm:$0xff] %v5857_v0  ;;  %v2019_v28 = vmax.f32 %v5719_v48, %v5854_v41  ;;  %v954_v59 = vrot.slane %v709_v62, 1  ;;  %v614_v22 = vmax.f32 %v5693_v39, %v5843_v6  ;;  %v1724_v3 = vrot.slane %v709_v62, 4 }
 0x179   : > { %v953_v58 = vsel %vm831_vm2, %v951_v40, %v952_v63  ;;  %v5873_v27 = vmax.f32 %v5660_v51, %v5715_v60  ;;  %v5876_v61 = vmax.f32 %v1888_v49, %v5862_v57  ;;  %v5879_v25 = vmax.f32 %v2017_v16, %v5862_v57  ;;  %3933 = vst.msk [vmem:[%s4340_s17 + $0x2c4] sm:$0xff] %vm180_vm0, %v5862_v57  ;;  %v4008_v49 = vld [vmem:[#allocation2 + $0x2b8] sm:$0xf] }
 0x17a   : > { %v1164_v48 = vmax.f32 %v707_v2, %v953_v58  ;;  %v5886_v5 = vmax.f32 %v5715_v60, %v5804_v47  ;;  %3934 = vst.msk [vmem:[%s4340_s17 + $0x2cc] sm:$0xf] %vm184_vm1, %v5864_v35  ;;  %v955_v39 = vsel %vm831_vm2, %v952_v63, %v954_v59  ;;  %v1723_v42 = vsel %vm1601_vm4, %v1721_v43, %v1722_v20 }
 0x17b   : > { %8055 = vst [vmem:[#allocation63_spill] sm:$0xff] %v5873_v27  ;;  %v710_v23 = vmax.f32 %v614_v22, %v4008_v49  ;;  %v1165_v15 = vmax.f32 %v708_v38, %v955_v39  ;;  %v2020_v11 = vmax.f32 %v5732_v31, %v5876_v61  ;;  %v5897_v54 = vmax.f32 %v5780_v52, %v5838_v17  ;;  %v415_v38 = vld [vmem:[#allocation2 + $0x2c0] sm:$0xff]  ;;  %v8058_v31 = vld [vmem:[#allocation5_spill] sm:$0xff]  ;;  %v5909_v22 = vld [vmem:[#allocation2 + $0x2c8] sm:$0xff] }
 0x17c   : > { %8056 = vst [vmem:[#allocation64_spill] sm:$0xff] %v5879_v25  ;;  %v1408_v16 = vrot.slane %v1164_v48, 2  ;;  %v1725_v2 = vsel %vm1601_vm4, %v1722_v20, %v1724_v3  ;;  %v615_v8 = vmax.f32 %v5729_v4, %v5847_v1  ;;  %v617_v50 = vmax.f32 %v5762_v21, %v4821_v56  ;;  %v4009_v49 = vld [vmem:[#allocation2 + $0x2d0] sm:$0xff] }
 0x17d   : > { %8057 = vst [vmem:[#allocation65_spill] sm:$0xff] %v5886_v5  ;;  %v956_v7 = vrot.slane %v710_v23, 1  ;;  %v1409_v45 = vrot.slane %v1165_v15, 2  ;;  %v1726_v40 = vrot.slane %v710_v23, 4  ;;  %v616_v63 = vmax.f32 %v5758_v14, %v5897_v54  ;;  %v4010_v5 = vld [vmem:[#allocation2 + $0x2d8] sm:$0xf] }
 0x17e   : > { %v618_v43 = vmax.f32 %v5774_v44, %v8058_v31  ;;  %v711_v20 = vmax.f32 %v615_v8, %v415_v38  ;;  %v5912_v4 = vmax.f32 %v5824_v33, %v415_v38  ;;  %v713_v25 = vmax.f32 %v617_v50, %v4009_v49  ;;  %v419_v49 = vld [vmem:[#allocation2 + $0x2e0] sm:$0xff] }
 0x17f   : > { %v957_v52 = vsel %vm831_vm2, %v954_v59, %v956_v7  ;;  %v1167_v58 = vmax.f32 %v710_v23, %v956_v7  ;;  %v1410_v56 = vsel %vm1288_vm3, %v1408_v16, %v1409_v45  ;;  %v712_v39 = vmax.f32 %v616_v63, %v5909_v22 }
 0x180   : > { %v1166_v21 = vmax.f32 %v709_v62, %v957_v52  ;;  %v1580_v14 = vmax.f32 %v1164_v48, %v1410_v56  ;;  %v1727_v44 = vsel %vm1601_vm4, %v1724_v3, %v1726_v40  ;;  %v958_v31 = vrot.slane %v711_v20, 1 }
 0x181   : > { %v1413_v0 = vrot.slane %v1167_v58, 2  ;;  %v959_v23 = vrot.slane %v712_v39, 1  ;;  %v961_v7 = vrot.slane %v713_v25, 1  ;;  %v1728_v8 = vrot.slane %v711_v20, 4 }
 0x182   : > { %v1411_v59 = vrot.slane %v1166_v21, 2  ;;  %v1893_v26 = vmax.f32 %v1580_v14, %v1723_v42  ;;  %v1729_v33 = vrot.slane %v712_v39, 4  ;;  %v714_v27 = vmax.f32 %v618_v43, %v4010_v5  ;;  %v420_v14 = vld [vmem:[#allocation2 + $0x2e8] sm:$0xff] }
 0x183   : > { %v1731_v16 = vrot.slane %v713_v25, 4  ;;  %v960_v48 = vsel %vm831_vm2, %v958_v31, %v959_v23  ;;  %v962_v50 = vsel %vm831_vm2, %v959_v23, %v961_v7  ;;  %v424_v23 = vld [vmem:[#allocation2 + $0x308] sm:$0xff] }
 0x184   : > { %v1412_v62 = vsel %vm1288_vm3, %v1409_v45, %v1411_v59  ;;  %v1414_v63 = vsel %vm1288_vm3, %v1411_v59, %v1413_v0  ;;  %v5922_v3 = vmax.f32 %v5836_v29, %v1893_v26  ;;  %v5924_v40 = vmax.f32 %v2019_v28, %v1893_v26  ;;  %3935 = vst.msk [vmem:[%s4340_s17 + $0x2cc] sm:$0xf0] %vm3674_vm5, %v1893_v26  ;;  %v423_v59 = vld [vmem:[#allocation2 + $0x300] sm:$0xff] }
 0x185   : > { %v1581_v42 = vmax.f32 %v1165_v15, %v1412_v62  ;;  %v1582_v52 = vmax.f32 %v1166_v21, %v1414_v63  ;;  %v1168_v58 = vmax.f32 %v711_v20, %v960_v48  ;;  %v1169_v5 = vmax.f32 %v712_v39, %v962_v50  ;;  %v428_v63 = vld [vmem:[#allocation2 + $0x328] sm:$0xff] }
 0x186   : > { %8059 = vst [vmem:[#allocation5_spill] sm:$0xff] %v5922_v3  ;;  %v963_v43 = vrot.slane %v714_v27, 1  ;;  %v5930_v0 = vmax.f32 %v5838_v17, %v5909_v22  ;;  %v1730_v29 = vsel %vm1601_vm4, %v1728_v8, %v1729_v33  ;;  %v2022_v28 = vmax.f32 %v5788_v37, %v5922_v3  ;;  %v427_v37 = vld [vmem:[#allocation2 + $0x320] sm:$0xff] }
 0x187   : > { %8060 = vst [vmem:[#allocation66_spill] sm:$0xff] %v5924_v40  ;;  %v1894_v45 = vmax.f32 %v1581_v42, %v1725_v2  ;;  %v5932_v56 = vmax.f32 %v1582_v52, %v1727_v44  ;;  %v1415_v15 = vrot.slane %v1168_v58, 2  ;;  %v1416_v21 = vrot.slane %v1169_v5, 2  ;;  %v432_v42 = vld [vmem:[#allocation2 + $0x348] sm:$0xff] }
 0x188   : > { %v964_v20 = vsel %vm831_vm2, %v961_v7, %v963_v43  ;;  %v1171_v39 = vmax.f32 %v714_v27, %v963_v43  ;;  %v1732_v44 = vsel %vm1601_vm4, %v1729_v33, %v1731_v16  ;;  %v1733_v62 = vrot.slane %v714_v27, 4 }
 0x189   : > { %v5939_v31 = vmax.f32 %v5862_v57, %v1894_v45  ;;  %v5941_v17 = vmax.f32 %v2020_v11, %v1894_v45  ;;  %3936 = vst.msk [vmem:[%s4340_s17 + $0x2d4] sm:$0xff] %vm180_vm0, %v1894_v45  ;;  %v1170_v2 = vmax.f32 %v713_v25, %v964_v20  ;;  %v1417_v7 = vsel %vm1288_vm3, %v1415_v15, %v1416_v21  ;;  %v431_v25 = vld [vmem:[#allocation2 + $0x340] sm:$0xff] }
 0x18a   : > { %3937 = vst.msk [vmem:[%s4340_s17 + $0x2dc] sm:$0xf] %vm184_vm1, %v5932_v56  ;;  %v1420_v8 = vrot.slane %v1171_v39, 2  ;;  %v527_v57 = vmax.f32 %v415_v38, %v419_v49  ;;  %v1583_v48 = vmax.f32 %v1168_v58, %v1417_v7  ;;  %v528_v33 = vmax.f32 %v5909_v22, %v420_v14 }
 0x18b   : > { %8061 = vst [vmem:[#allocation67_spill] sm:$0xff] %v5939_v31  ;;  %v1418_v11 = vrot.slane %v1170_v2, 2  ;;  %v2023_v50 = vmax.f32 %v5812_v19, %v5939_v31  ;;  %v1734_v52 = vsel %vm1601_vm4, %v1731_v16, %v1733_v62  ;;  %v531_v43 = vmax.f32 %v419_v49, %v423_v59 }
 0x18c   : > { %8062 = vst [vmem:[#allocation68_spill] sm:$0xff] %v5941_v17  ;;  %v532_v20 = vmax.f32 %v420_v14, %v424_v23  ;;  %v535_v17 = vmax.f32 %v423_v59, %v427_v37  ;;  %v5954_v15 = vmax.f32 %v1583_v48, %v1730_v29  ;;  %v536_v58 = vmax.f32 %v424_v23, %v428_v63 }
 0x18d   : > { %v1419_v27 = vsel %vm1288_vm3, %v1416_v21, %v1418_v11  ;;  %v1421_v38 = vsel %vm1288_vm3, %v1418_v11, %v1420_v8  ;;  %v539_v19 = vmax.f32 %v427_v37, %v431_v25  ;;  %v540_v40 = vmax.f32 %v428_v63, %v432_v42 }
 0x18e   : > { %v1584_v39 = vmax.f32 %v1169_v5, %v1419_v27  ;;  %v1585_v7 = vmax.f32 %v1170_v2, %v1421_v38  ;;  %v5959_v60 = vmax.f32 %v1893_v26, %v5954_v15  ;;  %v5962_v22 = vmax.f32 %v2022_v28, %v5954_v15  ;;  %3938 = vst.msk [vmem:[%s4340_s17 + $0x2dc] sm:$0xf0] %vm3674_vm5, %v5954_v15 }
 0x18f   : > { %v619_v16 = vmax.f32 %v5802_v55, %v5912_v4  ;;  %v620_v5 = vmax.f32 %v5809_v12, %v5930_v0  ;;  %v621_v26 = vmax.f32 %v5830_v32, %v4824_v46  ;;  %v623_v28 = vmax.f32 %v5847_v1, %v527_v57  ;;  %v435_v46 = vld [vmem:[#allocation2 + $0x360] sm:$0xff]  ;;  %v436_v1 = vld [vmem:[#allocation2 + $0x368] sm:$0xff] }
 0x190   : > { %8063 = vst [vmem:[#allocation69_spill] sm:$0xff] %v5959_v60  ;;  %v5971_v29 = vmax.f32 %v1584_v39, %v1732_v44  ;;  %v5973_v21 = vmax.f32 %v1585_v7, %v1734_v52  ;;  %v624_v2 = vmax.f32 %v5897_v54, %v528_v33  ;;  %v627_v8 = vmax.f32 %v5912_v4, %v531_v43 }
 0x191   : > { %8064 = vst [vmem:[#allocation70_spill] sm:$0xff] %v5962_v22  ;;  %v628_v62 = vmax.f32 %v5930_v0, %v532_v20  ;;  %v631_v55 = vmax.f32 %v527_v57, %v535_v17  ;;  %v5983_v48 = vmax.f32 %v5804_v47, %v5864_v35  ;;  %v632_v32 = vmax.f32 %v528_v33, %v536_v58 }
 0x192   : > { %v5986_v12 = vmax.f32 %v1894_v45, %v5971_v29  ;;  %v5989_v44 = vmax.f32 %v2023_v50, %v5971_v29  ;;  %3939 = vst.msk [vmem:[%s4340_s17 + $0x2e4] sm:$0xff] %vm180_vm0, %v5971_v29  ;;  %v635_v54 = vmax.f32 %v531_v43, %v539_v19  ;;  %v636_v4 = vmax.f32 %v532_v20, %v540_v40  ;;  %v4011_v45 = vld [vmem:[#allocation2 + $0x2f0] sm:$0xff] }
 0x193   : > { %8065 = vst [vmem:[#allocation71_spill] sm:$0xff] %v5983_v48  ;;  %v5997_v0 = vmax.f32 %v619_v16, %v419_v49  ;;  %v5999_v17 = vmax.f32 %v620_v5, %v420_v14  ;;  %v6001_v57 = vmax.f32 %v621_v26, %v4011_v45  ;;  %v6003_v11 = vmax.f32 %v623_v28, %v423_v59 }
 0x194   : > { %8066 = vst [vmem:[#allocation72_spill] sm:$0xff] %v5986_v12  ;;  %v6005_v50 = vmax.f32 %v624_v2, %v424_v23  ;;  %v6007_v52 = vmax.f32 %v627_v8, %v427_v37  ;;  %v6009_v33 = vmax.f32 %v628_v62, %v428_v63  ;;  %v6011_v27 = vmax.f32 %v631_v55, %v431_v25  ;;  %v8068_v2 = vld [vmem:[#allocation7_spill] sm:$0xff] }
 0x195   : > { %8067 = vst [vmem:[#allocation73_spill] sm:$0xff] %v5989_v44  ;;  %v6013_v38 = vmax.f32 %v632_v32, %v432_v42  ;;  %v6015_v40 = vmax.f32 %v635_v54, %v435_v46  ;;  %v6017_v49 = vmax.f32 %v636_v4, %v436_v1  ;;  %v965_v14 = vrot.slane %v5997_v0, 1  ;;  %v8069_v32 = vld [vmem:[#allocation8_spill] sm:$0xff] }
 0x196   : > { %3940 = vst.msk [vmem:[%s4340_s17 + $0x2ec] sm:$0xf] %vm184_vm1, %v5973_v21  ;;  %v966_v43 = vrot.slane %v5999_v17, 1  ;;  %v7829_v59 = vrot.slane %v6001_v57, 1  ;;  %v972_v23 = vrot.slane %v6003_v11, 1  ;;  %v973_v37 = vrot.slane %v6005_v50, 1 }
 0x197   : > { %v7831_v63 = vrot.slane %v4940_v9, 1  ;;  %v979_v25 = vrot.slane %v6007_v52, 1  ;;  %v980_v58 = vrot.slane %v6009_v33, 1  ;;  %v7832_v39 = vrot.slane %v5034_v34, 1 }
 0x198   : > { %v967_v42 = vsel %vm831_vm2, %v965_v14, %v966_v43  ;;  %v969_v20 = vsel %vm831_vm2, %v966_v43, %v7829_v59  ;;  %v974_v7 = vsel %vm831_vm2, %v972_v23, %v973_v37  ;;  %v986_v16 = vrot.slane %v6011_v27, 1 }
 0x199   : > { %v976_v19 = vsel %vm831_vm2, %v973_v37, %v7831_v63  ;;  %v987_v5 = vrot.slane %v6013_v38, 1  ;;  %v981_v26 = vsel %vm831_vm2, %v979_v25, %v980_v58  ;;  %v983_v28 = vsel %vm831_vm2, %v980_v58, %v7832_v39 }
 0x19a   : > { %v7830_v8 = vrot.slane %v8068_v2, 1  ;;  %v993_v62 = vrot.slane %v6015_v40, 1  ;;  %v994_v46 = vrot.slane %v6017_v49, 1  ;;  %v7828_v1 = vrot.slane %v8069_v32, 1 }
 0x19b   : > { %v988_v55 = vsel %vm831_vm2, %v986_v16, %v987_v5  ;;  %v1172_v54 = vmax.f32 %v5997_v0, %v967_v42  ;;  %v6052_v45 = vmax.f32 %v5999_v17, %v969_v20  ;;  %v1176_v14 = vmax.f32 %v6003_v11, %v974_v7 }
 0x19c   : > { %v990_v4 = vsel %vm831_vm2, %v987_v5, %v7830_v8  ;;  %v6056_v43 = vmax.f32 %v6005_v50, %v976_v19  ;;  %v995_v23 = vsel %vm831_vm2, %v993_v62, %v994_v46  ;;  %v997_v37 = vsel %vm831_vm2, %v994_v46, %v7828_v1 }
 0x19d   : > { %v1180_v25 = vmax.f32 %v6007_v52, %v981_v26  ;;  %v6064_v42 = vmax.f32 %v6009_v33, %v983_v28  ;;  %v1184_v58 = vmax.f32 %v6011_v27, %v988_v55  ;;  %v6068_v20 = vmax.f32 %v6013_v38, %v990_v4 }
 0x19e   : > { %v1188_v7 = vmax.f32 %v6015_v40, %v995_v23  ;;  %v6072_v19 = vmax.f32 %v6017_v49, %v997_v37  ;;  %v1422_v16 = vrot.slane %v1172_v54, 2  ;;  %v7834_v5 = vrot.slane %v6052_v45, 2 }
 0x19f   : > { %v1429_v62 = vrot.slane %v1176_v14, 2  ;;  %v7836_v46 = vrot.slane %v6056_v43, 2  ;;  %v1436_v26 = vrot.slane %v1180_v25, 2  ;;  %v7839_v28 = vrot.slane %v6064_v42, 2 }
 0x1a0   : > { %v1443_v1 = vrot.slane %v1184_v58, 2  ;;  %v7843_v55 = vrot.slane %v6068_v20, 2  ;;  %v1424_v4 = vsel %vm1288_vm3, %v1422_v16, %v7834_v5  ;;  %v1450_v37 = vrot.slane %v1188_v7, 2 }
 0x1a1   : > { %v1431_v23 = vsel %vm1288_vm3, %v1429_v62, %v7836_v46  ;;  %v7842_v59 = vrot.slane %v6072_v19, 2  ;;  %v1438_v8 = vsel %vm1288_vm3, %v1436_v26, %v7839_v28  ;;  %v1586_v39 = vmax.f32 %v1172_v54, %v1424_v4 }
 0x1a2   : > { %v1445_v63 = vsel %vm1288_vm3, %v1443_v1, %v7843_v55  ;;  %v1589_v44 = vmax.f32 %v1176_v14, %v1431_v23  ;;  %v1592_v5 = vmax.f32 %v1180_v25, %v1438_v8  ;;  %v1735_v62 = vrot.slane %v5997_v0, 4 }
 0x1a3   : > { %v1452_v16 = vsel %vm1288_vm3, %v1450_v37, %v7842_v59  ;;  %v1595_v22 = vmax.f32 %v1184_v58, %v1445_v63  ;;  %v1736_v48 = vrot.slane %v5999_v17, 4  ;;  %v1742_v47 = vrot.slane %v6003_v11, 4  ;;  %v4012_v37 = vld [vmem:[#allocation2 + $0x2f8] sm:$0xf] }
 0x1a4   : > { %v1598_v46 = vmax.f32 %v1188_v7, %v1452_v16  ;;  %v1743_v26 = vrot.slane %v6005_v50, 4  ;;  %v1749_v28 = vrot.slane %v6007_v52, 4  ;;  %v1750_v1 = vrot.slane %v6009_v33, 4 }
 0x1a5   : > { %v1756_v54 = vrot.slane %v6011_v27, 4  ;;  %v7841_v14 = vrot.slane %v6013_v38, 4  ;;  %v1737_v63 = vsel %vm1601_vm4, %v1735_v62, %v1736_v48  ;;  %v1763_v8 = vrot.slane %v6015_v40, 4 }
 0x1a6   : > { %v1744_v0 = vsel %vm1601_vm4, %v1742_v47, %v1743_v26  ;;  %v7840_v17 = vrot.slane %v6017_v49, 4  ;;  %v1751_v11 = vsel %vm1601_vm4, %v1749_v28, %v1750_v1  ;;  %v1899_v52 = vmax.f32 %v1586_v39, %v1737_v63 }
 0x1a7   : > { %v1758_v50 = vsel %vm1601_vm4, %v1756_v54, %v7841_v14  ;;  %v6110_v33 = vmax.f32 %v1589_v44, %v1744_v0  ;;  %v6115_v25 = vmax.f32 %v1592_v5, %v1751_v11  ;;  %v2025_v40 = vmax.f32 %v5854_v41, %v5959_v60  ;;  %v8074_v44 = vld [vmem:[#allocation6_spill] sm:$0xff]  ;;  %v8075_v41 = vld [vmem:[#allocation9_spill] sm:$0xff] }
 0x1a8   : > { %v1765_v27 = vsel %vm1601_vm4, %v1763_v8, %v7840_v17  ;;  %v1908_v47 = vmax.f32 %v1595_v22, %v1758_v50  ;;  %v6120_v7 = vmax.f32 %v5954_v15, %v1899_v52  ;;  %3941 = vst.msk [vmem:[%s4340_s17 + $0x2ec] sm:$0xf0] %vm3674_vm5, %v1899_v52  ;;  %v622_v39 = vmax.f32 %v5843_v6, %v8074_v44  ;;  %v8079_v50 = vld [vmem:[#allocation11_spill] sm:$0xff] }
 0x1a9   : > { %8070 = vst [vmem:[#allocation7_spill] sm:$0xff] %v6110_v33  ;;  %v1911_v58 = vmax.f32 %v1598_v46, %v1765_v27  ;;  %v6123_v28 = vmax.f32 %v1899_v52, %v6110_v33  ;;  %v1974_v5 = vmax.f32 %v6110_v33, %v6115_v25  ;;  %v6132_v4 = vmax.f32 %v2025_v40, %v1899_v52  ;;  %v8080_v40 = vld [vmem:[#allocation20_spill] sm:$0xff] }
 0x1aa   : > { %8071 = vst [vmem:[#allocation8_spill] sm:$0xff] %v6115_v25  ;;  %v1977_v22 = vmax.f32 %v6115_v25, %v1908_v47  ;;  %v977_v46 = vrot.slane %v8075_v41, 1  ;;  %v6139_v16 = vmax.f32 %v622_v39, %v4012_v37  ;;  %v8076_v6 = vrot.slane %v4498_v53, 1 }
 0x1ab   : > { %8072 = vst [vmem:[#allocation74_spill] sm:$0xff] %v6120_v7  ;;  %v8077_v62 = vrot.slane %v5034_v34, 1  ;;  %v2034_v63 = vmax.f32 %v6120_v7, %v1974_v5  ;;  %v8078_v8 = vrot.slane %v4940_v9, 1  ;;  %v991_v52 = vrot.slane %v8079_v50, 1 }
 0x1ac   : > { %8073 = vst [vmem:[#allocation75_spill] sm:$0xff] %v6123_v28  ;;  %v2037_v0 = vmax.f32 %v6123_v28, %v1977_v22  ;;  %v970_v27 = vrot.slane %v6139_v16, 1  ;;  %v998_v44 = vrot.slane %v8080_v40, 1  ;;  %v8083_v22 = vrot.slane %v8068_v2, 1 }
 0x1ad   : > { %v985_v54 = vsel %vm831_vm2, %v8077_v62, %v8076_v6  ;;  %v978_v11 = vsel %vm831_vm2, %v8078_v8, %v977_v46  ;;  %v6160_v6 = vmax.f32 %v2034_v63, %v1908_v47  ;;  %v7845_v8 = vrot.slane %v6001_v57, 4 }
 0x1ae   : > { %v6155_v39 = vmax.f32 %v4940_v9, %v978_v11  ;;  %v6158_v37 = vmax.f32 %v5034_v34, %v985_v54  ;;  %v6162_v5 = vmax.f32 %v2037_v0, %v1911_v58  ;;  %v992_v62 = vsel %vm831_vm2, %v8083_v22, %v991_v52 }
 0x1af   : > { %8081 = vst [vmem:[#allocation6_spill] sm:$0xff] %v6160_v6  ;;  %v8084_v23 = vrot.slane %v6001_v57, 1  ;;  %v8085_v11 = vrot.slane %v8069_v32, 1  ;;  %v6175_v54 = vmax.f32 %v8068_v2, %v992_v62  ;;  %v8086_v22 = vrot.slane %v6056_v43, 2 }
 0x1b0   : > { %8082 = vst [vmem:[#allocation9_spill] sm:$0xff] %v6162_v5  ;;  %v1432_v47 = vrot.slane %v6155_v39, 2  ;;  %v1439_v0 = vrot.slane %v6158_v37, 2  ;;  %v7850_v14 = vrot.slane %v4940_v9, 4  ;;  %v8089_v28 = vrot.slane %v5034_v34, 4 }
 0x1b1   : > { %v971_v15 = vsel %vm831_vm2, %v8084_v23, %v970_v27  ;;  %v999_v17 = vsel %vm831_vm2, %v8085_v11, %v998_v44  ;;  %v1739_v23 = vsel %vm1601_vm4, %v1736_v48, %v7845_v8  ;;  %v1446_v62 = vrot.slane %v6175_v54, 2 }
 0x1b2   : > { %v6179_v58 = vmax.f32 %v6001_v57, %v971_v15  ;;  %v6182_v63 = vmax.f32 %v8069_v32, %v999_v17  ;;  %v1433_v11 = vsel %vm1288_vm3, %v8086_v22, %v1432_v47  ;;  %v8087_v17 = vrot.slane %v6064_v42, 2 }
 0x1b3   : > { %v1590_v48 = vmax.f32 %v6056_v43, %v1433_v11  ;;  %v8088_v8 = vrot.slane %v6068_v20, 2  ;;  %v1746_v15 = vsel %vm1601_vm4, %v1743_v26, %v7850_v14  ;;  %v1753_v60 = vsel %vm1601_vm4, %v1750_v1, %v8089_v28 }
 0x1b4   : > { %v1425_v59 = vrot.slane %v6179_v58, 2  ;;  %v1440_v55 = vsel %vm1288_vm3, %v8087_v17, %v1439_v0  ;;  %v1453_v5 = vrot.slane %v6182_v63, 2  ;;  %v8090_v17 = vrot.slane %v6052_v45, 2 }
 0x1b5   : > { %v1447_v22 = vsel %vm1288_vm3, %v8088_v8, %v1446_v62  ;;  %v1593_v6 = vmax.f32 %v6064_v42, %v1440_v55  ;;  %v8091_v43 = vrot.slane %v6072_v19, 2  ;;  %v1759_v42 = vrot.slane %v8068_v2, 4 }
 0x1b6   : > { %v1426_v25 = vsel %vm1288_vm3, %v8090_v17, %v1425_v59  ;;  %v1596_v8 = vmax.f32 %v6068_v20, %v1447_v22  ;;  %v1766_v14 = vrot.slane %v8069_v32, 4  ;;  %v6221_v7 = vmax.f32 %v1590_v48, %v1746_v15 }
 0x1b7   : > { %v1454_v11 = vsel %vm1288_vm3, %v8091_v43, %v1453_v5  ;;  %v1587_v55 = vmax.f32 %v6052_v45, %v1426_v25  ;;  %v8093_v1 = vrot.slane %v6013_v38, 4  ;;  %v6226_v17 = vmax.f32 %v1593_v6, %v1753_v60 }
 0x1b8   : > { %v1599_v26 = vmax.f32 %v6072_v19, %v1454_v11  ;;  %8092 = vst [vmem:[#allocation11_spill] sm:$0xff] %v6221_v7  ;;  %v2026_v20 = vmax.f32 %v5876_v61, %v5986_v12  ;;  %v1175_v2 = vmax.f32 %v6139_v16, %v970_v27  ;;  %v8095_v45 = vrot.slane %v6017_v49, 4 }
 0x1b9   : > { %v1760_v28 = vsel %vm1601_vm4, %v8093_v1, %v1759_v42  ;;  %8094 = vst [vmem:[#allocation20_spill] sm:$0xff] %v6226_v17  ;;  %v1900_v25 = vmax.f32 %v1587_v55, %v1739_v23  ;;  %v1179_v15 = vmax.f32 %v8075_v41, %v977_v46  ;;  %v1975_v38 = vmax.f32 %v6221_v7, %v6226_v17 }
 0x1ba   : > { %v1767_v19 = vsel %vm1601_vm4, %v8095_v45, %v1766_v14  ;;  %v1909_v32 = vmax.f32 %v1596_v8, %v1760_v28  ;;  %v8096_v60 = vrot.slane %v4498_v53, 1  ;;  %v1187_v61 = vmax.f32 %v8079_v50, %v991_v52 }
 0x1bb   : > { %v1912_v48 = vmax.f32 %v1599_v26, %v1767_v19  ;;  %v6242_v27 = vmax.f32 %v5971_v29, %v1900_v25  ;;  %v6245_v49 = vmax.f32 %v1900_v25, %v6221_v7  ;;  %v6248_v22 = vmax.f32 %v2026_v20, %v1900_v25  ;;  %3942 = vst.msk [vmem:[%s4340_s17 + $0x2f4] sm:$0xff] %vm180_vm0, %v1900_v25 }
 0x1bc   : > { %v1183_v6 = vmax.f32 %v4498_v53, %v8096_v60  ;;  %v1978_v23 = vmax.f32 %v6226_v17, %v1909_v32  ;;  %v1191_v46 = vmax.f32 %v8080_v40, %v998_v44  ;;  %v1427_v43 = vrot.slane %v1175_v2, 2 }
 0x1bd   : > { %8097 = vst [vmem:[#allocation76_spill] sm:$0xff] %v6242_v27  ;;  %v1434_v11 = vrot.slane %v1179_v15, 2  ;;  %v2035_v55 = vmax.f32 %v6242_v27, %v1975_v38  ;;  %v1448_v44 = vrot.slane %v1187_v61, 2  ;;  %v6269_v15 = vmax.f32 %v5864_v35, %v5932_v56 }
 0x1be   : > { %8098 = vst [vmem:[#allocation77_spill] sm:$0xff] %v6245_v49  ;;  %v1441_v8 = vrot.slane %v1183_v6, 2  ;;  %v2038_v26 = vmax.f32 %v6245_v49, %v1978_v23  ;;  %v1428_v1 = vsel %vm1288_vm3, %v1425_v59, %v1427_v43  ;;  %v1455_v19 = vrot.slane %v1191_v46, 2 }
 0x1bf   : > { %8099 = vst [vmem:[#allocation78_spill] sm:$0xff] %v6248_v22  ;;  %v1435_v28 = vsel %vm1288_vm3, %v1432_v47, %v1434_v11  ;;  %v6262_v2 = vmax.f32 %v2035_v55, %v1909_v32  ;;  %v1588_v25 = vmax.f32 %v6179_v58, %v1428_v1  ;;  %v1449_v38 = vsel %vm1288_vm3, %v1446_v62, %v1448_v44 }
 0x1c0   : > { %v1442_v20 = vsel %vm1288_vm3, %v1439_v0, %v1441_v8  ;;  %v6264_v45 = vmax.f32 %v2038_v26, %v1912_v48  ;;  %v1591_v59 = vmax.f32 %v6155_v39, %v1435_v28  ;;  %v1740_v47 = vrot.slane %v6139_v16, 4 }
 0x1c1   : > { %v1456_v0 = vsel %vm1288_vm3, %v1453_v5, %v1455_v19  ;;  %v1594_v32 = vmax.f32 %v6158_v37, %v1442_v20  ;;  %v1597_v48 = vmax.f32 %v6175_v54, %v1449_v38  ;;  %v1747_v60 = vrot.slane %v8075_v41, 4  ;;  %v8103_v41 = vld [vmem:[#allocation3_spill] sm:$0xff] }
 0x1c2   : > { %8100 = vst [vmem:[#allocation79_spill] sm:$0xff] %v6264_v45  ;;  %v1600_v58 = vmax.f32 %v6182_v63, %v1456_v0  ;;  %v8101_v6 = vrot.slane %v6001_v57, 4  ;;  %v1754_v62 = vrot.slane %v4498_v53, 4  ;;  %v1761_v39 = vrot.slane %v8079_v50, 4 }
 0x1c3   : > { %v8102_v16 = vrot.slane %v4940_v9, 4  ;;  %v1768_v37 = vrot.slane %v8080_v40, 4  ;;  %v8104_v23 = vrot.slane %v8103_v41, 1  ;;  %v8105_v57 = vrot.slane %v5034_v34, 4 }
 0x1c4   : > { %v1741_v61 = vsel %vm1601_vm4, %v8101_v6, %v1740_v47  ;;  %v1762_v53 = vsel %vm1601_vm4, %v1759_v42, %v1761_v39  ;;  %v1607_v9 = vrot.slane %v8103_v41, 4  ;;  %v6312_v34 = vmax.f32 %v5932_v56, %v5973_v21  ;;  %v8109_v47 = vld [vmem:[#allocation13_spill] sm:$0xff] }
 0x1c5   : > { %v1748_v5 = vsel %vm1601_vm4, %v8102_v16, %v1747_v60  ;;  %v6288_v54 = vmax.f32 %v1588_v25, %v1741_v61  ;;  %v1099_v63 = vmax.f32 %v8103_v41, %v8104_v23  ;;  %v1755_v46 = vsel %vm1601_vm4, %v8105_v57, %v1754_v62  ;;  %v8107_v25 = vld [vmem:[#allocation18_spill] sm:$0xff]  ;;  %v8111_v61 = vld [vmem:[#allocation35_spill] sm:$0xff] }
 0x1c6   : > { %v6297_v43 = vmax.f32 %v1591_v59, %v1748_v5  ;;  %v1769_v50 = vsel %vm1601_vm4, %v1766_v14, %v1768_v37  ;;  %v6301_v11 = vmax.f32 %v1594_v32, %v1755_v46  ;;  %v1910_v40 = vmax.f32 %v1597_v48, %v1762_v53  ;;  %v8115_v46 = vld [vmem:[#allocation34_spill] sm:$0xff]  ;;  %v8116_v53 = vld [vmem:[#allocation37_spill] sm:$0xff] }
 0x1c7   : > { %v6305_v8 = vmax.f32 %v5973_v21, %v6288_v54  ;;  %3943 = vst.msk [vmem:[%s4340_s17 + $0x2fc] sm:$0xf] %vm184_vm1, %v6288_v54  ;;  %v1294_v55 = vrot.slane %v1099_v63, 2  ;;  %v8106_v14 = vrot.slane %v4202_v13, 4  ;;  %v1922_v20 = vmax.f32 %v5002_v10, %v4921_v36  ;;  %v8110_v10 = vld [vmem:[#allocation28_spill] sm:$0xff] }
 0x1c8   : > { %v6316_v42 = vmax.f32 %v6288_v54, %v6297_v43  ;;  %v1976_v1 = vmax.f32 %v6297_v43, %v6301_v11  ;;  %v1979_v28 = vmax.f32 %v6301_v11, %v1910_v40  ;;  %v1928_v44 = vmax.f32 %v4923_v18, %v5020_v30  ;;  %v8114_v63 = vld [vmem:[#allocation24_spill] sm:$0xff] }
 0x1c9   : > { %v1608_v26 = vsel %vm1601_vm4, %v8106_v14, %v1607_v9  ;;  %v1913_v19 = vmax.f32 %v1600_v58, %v1769_v50  ;;  %v8108_v38 = vrot.slane %v8107_v25, 2  ;;  %v7868_v13 = vrot.slane %v8109_v47, 1 }
 0x1ca   : > { %v7857_v0 = vrot.slane %v8109_v47, 4  ;;  %v2036_v32 = vmax.f32 %v6305_v8, %v1976_v1  ;;  %v2039_v48 = vmax.f32 %v6316_v42, %v1979_v28  ;;  %v1988_v6 = vmax.f32 %v1922_v20, %v1928_v44  ;;  %v8118_v28 = vld [vmem:[#allocation32_spill] sm:$0xff] }
 0x1cb   : > { %v1295_v59 = vsel %vm1288_vm3, %v8108_v38, %v1294_v55  ;;  %v6339_v36 = vmax.f32 %v8109_v47, %v7868_v13  ;;  %v1931_v58 = vmax.f32 %v5020_v30, %v8110_v10  ;;  %v1994_v62 = vmax.f32 %v1928_v44, %v8111_v61 }
 0x1cc   : > { %v1531_v60 = vmax.f32 %v8107_v25, %v1295_v59  ;;  %v2000_v39 = vmax.f32 %v8111_v61, %v5431_v24  ;;  %v6346_v16 = vmax.f32 %v2036_v32, %v1910_v40  ;;  %v6348_v5 = vmax.f32 %v2039_v48, %v1913_v19  ;;  %v8117_v40 = vld [vmem:[#allocation25_spill] sm:$0xff]  ;;  %v8120_v48 = vld [vmem:[#allocation39_spill] sm:$0xff] }
 0x1cd   : > { %v6351_v41 = vmax.f32 %v1988_v6, %v8110_v10  ;;  %v7864_v23 = vrot.slane %v6339_v36, 2  ;;  %v1991_v57 = vmax.f32 %v8114_v63, %v1931_v58  ;;  %v6356_v30 = vmax.f32 %v1994_v62, %v8115_v46 }
 0x1ce   : > { %8112 = vst [vmem:[#allocation3_spill] sm:$0xff] %v6346_v16  ;;  %v1844_v37 = vmax.f32 %v1531_v60, %v1608_v26  ;;  %v1997_v9 = vmax.f32 %v1931_v58, %v8116_v53  ;;  %v7852_v50 = vrot.slane %v6348_v5, 1 }
 0x1cf   : > { %8113 = vst [vmem:[#allocation18_spill] sm:$0xff] %v6348_v5  ;;  %v7865_v14 = vrot.slane %v6351_v41, 1  ;;  %v7858_v26 = vrot.slane %v6351_v41, 4  ;;  %v2605_v1 = vmax.f32 %v6339_v36, %v7864_v23  ;;  %v6367_v44 = vmax.f32 %v1991_v57, %v8118_v28 }
 0x1d0   : > { %v1916_v55 = vmax.f32 %v1844_v37, %v8117_v40  ;;  %v7854_v19 = vrot.slane %v6356_v30, 1  ;;  %v7862_v25 = vrot.slane %v6356_v30, 4  ;;  %v6374_v38 = vmax.f32 %v6348_v5, %v7852_v50 }
 0x1d1   : > { %v6379_v32 = vmax.f32 %v6351_v41, %v7865_v14  ;;  %v6382_v60 = vmax.f32 %v1997_v9, %v8120_v48  ;;  %v6386_v6 = vmax.f32 %v2605_v1, %v7857_v0  ;;  %v7855_v10 = vrot.slane %v6367_v44, 1  ;;  %v8121_v9 = vld [vmem:[#allocation42_spill] sm:$0xff] }
 0x1d2   : > { %8119 = vst [vmem:[#allocation13_spill] sm:$0xff] %v6374_v38  ;;  %v1982_v59 = vmax.f32 %v1916_v55, %v1922_v20  ;;  %v7867_v58 = vrot.slane %v6367_v44, 4  ;;  %v6393_v20 = vmax.f32 %v6356_v30, %v7854_v19  ;;  %v6408_v40 = vmax.f32 %v2000_v39, %v8121_v9  ;;  %v8122_v55 = vld [vmem:[#allocation50_spill] sm:$0xff]  ;;  %v8123_v19 = vld [vmem:[#allocation45_spill] sm:$0xff] }
 0x1d3   : > { %v7860_v62 = vrot.slane %v6379_v32, 2  ;;  %v7853_v37 = vrot.slane %v6382_v60, 1  ;;  %v7870_v63 = vrot.slane %v6382_v60, 4  ;;  %v6404_v57 = vmax.f32 %v6367_v44, %v7855_v10 }
 0x1d4   : > { %v6396_v61 = vmax.f32 %v1982_v59, %v4923_v18  ;;  %v7856_v46 = vrot.slane %v6393_v20, 2  ;;  %v2003_v18 = vmax.f32 %v8116_v53, %v8122_v55  ;;  %v7861_v9 = vrot.slane %v6408_v40, 1 }
 0x1d5   : > { %v2608_v1 = vmax.f32 %v6379_v32, %v7860_v62  ;;  %v6420_v48 = vmax.f32 %v6382_v60, %v7853_v37  ;;  %v7863_v39 = vrot.slane %v6404_v57, 2 }
 0x1d6   : > { %v7859_v28 = vrot.slane %v6396_v61, 1  ;;  %v7874_v59 = vrot.slane %v6396_v61, 4  ;;  %v2614_v53 = vmax.f32 %v6393_v20, %v7856_v46  ;;  %v6437_v10 = vmax.f32 %v2003_v18, %v8123_v19 }
 0x1d7   : > { %v2828_v29 = vmax.f32 %v2608_v1, %v7858_v26  ;;  %v7866_v37 = vrot.slane %v6420_v48, 2  ;;  %v2611_v46 = vmax.f32 %v6404_v57, %v7863_v39  ;;  %v6447_v1 = vmax.f32 %v6408_v40, %v7861_v9  ;;  %v8124_v26 = vld [vmem:[#allocation51_spill] sm:$0xff] }
 0x1d8   : > { %v6433_v52 = vmax.f32 %v6396_v61, %v7859_v28  ;;  %v2834_v0 = vmax.f32 %v2614_v53, %v7862_v25  ;;  %v2006_v28 = vmax.f32 %v5431_v24, %v8124_v26  ;;  %v7871_v53 = vrot.slane %v6437_v10, 1  ;;  %v8125_v39 = vld [vmem:[#allocation47_spill] sm:$0xff] }
 0x1d9   : > { %v2885_v62 = vmax.f32 %v6386_v6, %v2828_v29  ;;  %3850 = vst.msk [vmem:[%s4340_s17 + $0x10e] sm:$0x3] %vm3626_vm6, %v2828_v29  ;;  %v2617_v18 = vmax.f32 %v6420_v48, %v7866_v37  ;;  %v2831_v9 = vmax.f32 %v2611_v46, %v7867_v58  ;;  %v7872_v24 = vrot.slane %v6447_v1, 2  ;;  %v8126_v58 = vld [vmem:[#allocation53_spill] sm:$0xff] }
 0x1da   : > { %v7869_v19 = vrot.slane %v6433_v52, 2  ;;  %3856 = vst.msk [vmem:[%s4340_s17 + $0x12e] sm:$0x3] %vm3626_vm6, %v2834_v0  ;;  %v6466_v23 = vmax.f32 %v2006_v28, %v8125_v39  ;;  %v6476_v46 = vmax.f32 %v6437_v10, %v7871_v53  ;;  %v2009_v13 = vmax.f32 %v8122_v55, %v8126_v58 }
 0x1db   : > { %v2837_v37 = vmax.f32 %v2617_v18, %v7870_v63  ;;  %v2888_v50 = vmax.f32 %v2828_v29, %v2831_v9  ;;  %3853 = vst.msk [vmem:[%s4340_s17 + $0x11e] sm:$0x3] %vm3626_vm6, %v2831_v9  ;;  %v2891_v28 = vmax.f32 %v2831_v9, %v2834_v0  ;;  %v2620_v39 = vmax.f32 %v6447_v1, %v7872_v24  ;;  %v8128_v29 = vld [vmem:[#allocation58_spill] sm:$0xff] }
 0x1dc   : > { %v2602_v14 = vmax.f32 %v6433_v52, %v7869_v19  ;;  %v7876_v19 = vrot.slane %v6466_v23, 1  ;;  %v7878_v53 = vrot.slane %v6476_v46, 2  ;;  %v8127_v9 = vrot.slane %v6408_v40, 4 }
 0x1dd   : > { %v2894_v63 = vmax.f32 %v2834_v0, %v2837_v37  ;;  %3859 = vst.msk [vmem:[%s4340_s17 + $0x13e] sm:$0x3] %vm3626_vm6, %v2837_v37  ;;  %v2939_v55 = vmax.f32 %v2885_v62, %v2891_v28  ;;  %v6500_v45 = vmax.f32 %v2009_v13, %v5660_v51  ;;  %v2012_v62 = vmax.f32 %v8124_v26, %v8128_v29 }
 0x1de   : > { %v2822_v18 = vmax.f32 %v2602_v14, %v7874_v59  ;;  %v2840_v25 = vmax.f32 %v2620_v39, %v8127_v9  ;;  %v6497_v24 = vmax.f32 %v6466_v23, %v7876_v19  ;;  %v2623_v49 = vmax.f32 %v6476_v46, %v7878_v53 }
 0x1df   : > { %v2942_v59 = vmax.f32 %v2888_v50, %v2894_v63  ;;  %v6508_v39 = vmax.f32 %v2939_v55, %v2837_v37  ;;  %v7881_v51 = vrot.slane %v6500_v45, 1  ;;  %v8132_v55 = vld [vmem:[#allocation55_spill] sm:$0xff] }
 0x1e0   : > { %v2882_v14 = vmax.f32 %v2822_v18, %v6386_v6  ;;  %v2897_v9 = vmax.f32 %v2837_v37, %v2840_v25  ;;  %3862 = vst.msk [vmem:[%s4340_s17 + $0x14e] sm:$0x3] %vm3626_vm6, %v2840_v25  ;;  %v7880_v19 = vrot.slane %v6497_v24, 2  ;;  %v8131_v18 = vrot.slane %v6437_v10, 4 }
 0x1e1   : > { %8129 = vst [vmem:[#allocation28_spill] sm:$0xff] %v6508_v39  ;;  %v6514_v6 = vmax.f32 %v2942_v59, %v2840_v25  ;;  %v6525_v37 = vmax.f32 %v6500_v45, %v7881_v51  ;;  %v8137_v51 = vrot.slane %v6466_v23, 4 }
 0x1e2   : > { %v2936_v13 = vmax.f32 %v2882_v14, %v2888_v50  ;;  %v2843_v12 = vmax.f32 %v2623_v49, %v8131_v18  ;;  %v2945_v17 = vmax.f32 %v2891_v28, %v2897_v9  ;;  %v2626_v26 = vmax.f32 %v6497_v24, %v7880_v19  ;;  %v8134_v49 = vld [vmem:[#allocation63_spill] sm:$0xff]  ;;  %v8135_v18 = vld [vmem:[#allocation65_spill] sm:$0xff] }
 0x1e3   : > { %8130 = vst [vmem:[#allocation35_spill] sm:$0xff] %v6514_v6  ;;  %v6528_v50 = vmax.f32 %v2012_v62, %v8132_v55  ;;  %v2015_v28 = vmax.f32 %v8126_v58, %v8134_v49  ;;  %v2018_v19 = vmax.f32 %v8128_v29, %v8135_v18  ;;  %v7885_v39 = vrot.slane %v6525_v37, 2 }
 0x1e4   : > { %v6530_v59 = vmax.f32 %v2936_v13, %v2834_v0  ;;  %v2900_v14 = vmax.f32 %v2840_v25, %v2843_v12  ;;  %3865 = vst.msk [vmem:[%s4340_s17 + $0x15e] sm:$0x3] %vm3626_vm6, %v2843_v12  ;;  %v6538_v53 = vmax.f32 %v2945_v17, %v2843_v12  ;;  %v2846_v6 = vmax.f32 %v2626_v26, %v8137_v51  ;;  %v8138_v13 = vld [vmem:[#allocation60_spill] sm:$0xff] }
 0x1e5   : > { %v7886_v62 = vrot.slane %v6528_v50, 1  ;;  %v6546_v55 = vmax.f32 %v2015_v28, %v8138_v13  ;;  %v6549_v58 = vmax.f32 %v2018_v19, %v5864_v35  ;;  %v2629_v17 = vmax.f32 %v6525_v37, %v7885_v39 }
 0x1e6   : > { %8133 = vst [vmem:[#allocation24_spill] sm:$0xff] %v6530_v59  ;;  %v2948_v0 = vmax.f32 %v2894_v63, %v2900_v14  ;;  %v2903_v59 = vmax.f32 %v2843_v12, %v2846_v6  ;;  %v8139_v63 = vld [vmem:[#allocation71_spill] sm:$0xff]  ;;  %v8141_v28 = vrot.slane %v6500_v45, 4 }
 0x1e7   : > { %8136 = vst [vmem:[#allocation34_spill] sm:$0xff] %v6538_v53  ;;  %v6559_v29 = vmax.f32 %v6528_v50, %v7886_v62  ;;  %v2021_v51 = vmax.f32 %v8134_v49, %v8139_v63  ;;  %v7887_v35 = vrot.slane %v6546_v55, 1  ;;  %v7888_v19 = vrot.slane %v6549_v58, 1 }
 0x1e8   : > { %3868 = vst.msk [vmem:[%s4340_s17 + $0x16e] sm:$0x3] %vm3626_vm6, %v2846_v6  ;;  %v6563_v26 = vmax.f32 %v2948_v0, %v2846_v6  ;;  %v2849_v13 = vmax.f32 %v2629_v17, %v8141_v28  ;;  %v2951_v39 = vmax.f32 %v2897_v9, %v2903_v59  ;;  %v2024_v9 = vmax.f32 %v8135_v18, %v6269_v15 }
 0x1e9   : > { %v7891_v25 = vrot.slane %v6559_v29, 2  ;;  %v6575_v49 = vmax.f32 %v6546_v55, %v7887_v35  ;;  %v6580_v0 = vmax.f32 %v6549_v58, %v7888_v19  ;;  %v6583_v12 = vmax.f32 %v2021_v51, %v5932_v56 }
 0x1ea   : > { %8140 = vst [vmem:[#allocation37_spill] sm:$0xff] %v6563_v26  ;;  %v2906_v17 = vmax.f32 %v2846_v6, %v2849_v13  ;;  %v6587_v28 = vmax.f32 %v2951_v39, %v2849_v13  ;;  %v2027_v19 = vmax.f32 %v8139_v63, %v6312_v34  ;;  %v8143_v39 = vrot.slane %v6528_v50, 4 }
 0x1eb   : > { %3871 = vst.msk [vmem:[%s4340_s17 + $0x17e] sm:$0x3] %vm3626_vm6, %v2849_v13  ;;  %v2632_v35 = vmax.f32 %v6559_v29, %v7891_v25  ;;  %v7894_v62 = vrot.slane %v6575_v49, 2  ;;  %v7893_v56 = vrot.slane %v6580_v0, 2  ;;  %v6603_v26 = vmax.f32 %v2024_v9, %v5973_v21 }
 0x1ec   : > { %8142 = vst [vmem:[#allocation25_spill] sm:$0xff] %v6587_v28  ;;  %v2954_v28 = vmax.f32 %v2900_v14, %v2906_v17  ;;  %v6606_v25 = vmax.f32 %v2027_v19, %v6288_v54  ;;  %v8145_v6 = vrot.slane %v6583_v12, 1  ;;  %v2030_v21 = vmax.f32 %v6269_v15, %v6305_v8 }
 0x1ed   : > { %v2852_v18 = vmax.f32 %v2632_v35, %v8143_v39  ;;  %v2635_v63 = vmax.f32 %v6575_v49, %v7894_v62  ;;  %v2638_v51 = vmax.f32 %v6580_v0, %v7893_v56  ;;  %v7896_v35 = vrot.slane %v6603_v26, 1 }
 0x1ee   : > { %8144 = vst [vmem:[#allocation32_spill] sm:$0xff] %v6606_v25  ;;  %v6617_v53 = vmax.f32 %v6583_v12, %v8145_v6  ;;  %v8147_v9 = vrot.slane %v6546_v55, 4  ;;  %v8148_v6 = vrot.slane %v6549_v58, 4  ;;  %v7899_v15 = vrot.slane %v6606_v25, 1 }
 0x1ef   : > { %v2909_v14 = vmax.f32 %v2849_v13, %v2852_v18  ;;  %v6621_v54 = vmax.f32 %v2954_v28, %v2852_v18  ;;  %3874 = vst.msk [vmem:[%s4340_s17 + $0x18e] sm:$0x3] %vm3626_vm6, %v2852_v18  ;;  %v6636_v13 = vmax.f32 %v6603_v26, %v7896_v35  ;;  %v6640_v19 = vmax.f32 %v2030_v21, %v6297_v43 }
 0x1f0   : > { %v2855_v39 = vmax.f32 %v2635_v63, %v8147_v9  ;;  %v2858_v56 = vmax.f32 %v2638_v51, %v8148_v6  ;;  %v7897_v62 = vrot.slane %v6617_v53, 2  ;;  %v8153_v35 = vrot.slane %v6583_v12, 4 }
 0x1f1   : > { %8146 = vst [vmem:[#allocation39_spill] sm:$0xff] %v6621_v54  ;;  %v2957_v8 = vmax.f32 %v2903_v59, %v2909_v14  ;;  %v6650_v59 = vmax.f32 %v6606_v25, %v7899_v15  ;;  %v7901_v43 = vrot.slane %v6636_v13, 2  ;;  %v2033_v15 = vmax.f32 %v6312_v34, %v6316_v42 }
 0x1f2   : > { %8149 = vst [vmem:[#allocation42_spill] sm:$0xff] %v6636_v13  ;;  %v2912_v54 = vmax.f32 %v2852_v18, %v2855_v39  ;;  %v2915_v63 = vmax.f32 %v2855_v39, %v2858_v56  ;;  %v2641_v51 = vmax.f32 %v6617_v53, %v7897_v62  ;;  %v7900_v18 = vrot.slane %v6640_v19, 1 }
 0x1f3   : > { %8150 = vst [vmem:[#allocation50_spill] sm:$0xff] %v6640_v19  ;;  %v6652_v9 = vmax.f32 %v2957_v8, %v2855_v39  ;;  %v7903_v27 = vrot.slane %v6650_v59, 2  ;;  %v6686_v42 = vmax.f32 %v2033_v15, %v6301_v11 }
 0x1f4   : > { %3877 = vst.msk [vmem:[%s4340_s17 + $0x19e] sm:$0x3] %vm3626_vm6, %v2855_v39  ;;  %v2960_v6 = vmax.f32 %v2906_v17, %v2912_v54  ;;  %v2861_v62 = vmax.f32 %v2641_v51, %v8153_v35  ;;  %v2963_v28 = vmax.f32 %v2909_v14, %v2915_v63  ;;  %v2644_v39 = vmax.f32 %v6636_v13, %v7901_v43 }
 0x1f5   : > { %8151 = vst [vmem:[#allocation45_spill] sm:$0xff] %v6650_v59  ;;  %v6668_v8 = vmax.f32 %v6640_v19, %v7900_v18  ;;  %v7906_v17 = vrot.slane %v6346_v16, 1  ;;  %v2647_v51 = vmax.f32 %v6650_v59, %v7903_v27  ;;  %v8157_v18 = vrot.slane %v6603_v26, 4 }
 0x1f6   : > { %8152 = vst [vmem:[#allocation51_spill] sm:$0xff] %v6652_v9  ;;  %v6673_v21 = vmax.f32 %v2960_v6, %v2858_v56  ;;  %v2918_v14 = vmax.f32 %v2858_v56, %v2861_v62  ;;  %v6675_v35 = vmax.f32 %v2963_v28, %v2861_v62  ;;  %v8160_v6 = vrot.slane %v6606_v25, 4 }
 0x1f7   : > { %3880 = vst.msk [vmem:[%s4340_s17 + $0x1ae] sm:$0x3] %vm3626_vm6, %v2858_v56  ;;  %v2864_v43 = vmax.f32 %v2644_v39, %v8157_v18  ;;  %v7907_v34 = vrot.slane %v6668_v8, 2  ;;  %v6691_v56 = vmax.f32 %v6346_v16, %v7906_v17  ;;  %v7910_v27 = vrot.slane %v6374_v38, 2 }
 0x1f8   : > { %8154 = vst [vmem:[#allocation47_spill] sm:$0xff] %v6668_v8  ;;  %v2966_v28 = vmax.f32 %v2912_v54, %v2918_v14  ;;  %v7915_v15 = vrot.slane %v6686_v42, 1  ;;  %v8162_v17 = vrot.slane %v6640_v19, 4 }
 0x1f9   : > { %8155 = vst [vmem:[#allocation53_spill] sm:$0xff] %v6673_v21  ;;  %v2921_v9 = vmax.f32 %v2861_v62, %v2864_v43  ;;  %v2650_v11 = vmax.f32 %v6668_v8, %v7907_v34  ;;  %v7917_v18 = vrot.slane %v6691_v56, 2  ;;  %v8164_v8 = vld [vmem:[#allocation15_spill] sm:$0xff] }
 0x1fa   : > { %8156 = vst [vmem:[#allocation58_spill] sm:$0xff] %v6675_v35  ;;  %v2867_v35 = vmax.f32 %v2647_v51, %v8160_v6  ;;  %v6704_v54 = vmax.f32 %v2966_v28, %v2864_v43  ;;  %v6717_v21 = vmax.f32 %v6686_v42, %v7915_v15  ;;  %v8166_v51 = vld [vmem:[#allocation12_spill] sm:$0xff]  ;;  %v8169_v15 = vrot.slane %v6346_v16, 4 }
 0x1fb   : > { %3883 = vst.msk [vmem:[%s4340_s17 + $0x1be] sm:$0x3] %vm3626_vm6, %v2861_v62  ;;  %v2659_v62 = vmax.f32 %v6374_v38, %v7910_v27  ;;  %v2969_v6 = vmax.f32 %v2915_v63, %v2921_v9  ;;  %v2870_v34 = vmax.f32 %v2650_v11, %v8162_v17  ;;  %v8165_v27 = vld [vmem:[#allocation16_spill] sm:$0xff]  ;;  %v8167_v63 = vld [vmem:[#allocation21_spill] sm:$0xff] }
 0x1fc   : > { %8158 = vst [vmem:[#allocation55_spill] sm:$0xff] %v6686_v42  ;;  %v2924_v39 = vmax.f32 %v2864_v43, %v2867_v35  ;;  %v1986_v38 = vmax.f32 %v8165_v27, %v8164_v8  ;;  %v1987_v59 = vmax.f32 %v8167_v63, %v8166_v51  ;;  %v7923_v11 = vrot.slane %v6717_v21, 2  ;;  %v8172_v8 = vld [vmem:[#allocation27_spill] sm:$0xff] }
 0x1fd   : > { %8159 = vst [vmem:[#allocation63_spill] sm:$0xff] %v6691_v56  ;;  %v6727_v19 = vmax.f32 %v2969_v6, %v2867_v35  ;;  %v2927_v17 = vmax.f32 %v2867_v35, %v2870_v34  ;;  %v8173_v6 = vld [vmem:[#allocation26_spill] sm:$0xff] }
 0x1fe   : > { %3886 = vst.msk [vmem:[%s4340_s17 + $0x1ce] sm:$0x3] %vm3626_vm6, %v2864_v43  ;;  %v2656_v43 = vmax.f32 %v6691_v56, %v7917_v18  ;;  %v2972_v28 = vmax.f32 %v2918_v14, %v2924_v39  ;;  %v8171_v56 = vld [vmem:[#allocation4_spill] sm:$0xff]  ;;  %v2047_v7 = vmax.f32 %v1987_v59, %v8172_v8  ;;  %v2165_v63 = vrot.slane %v8173_v6, 1 }
 0x1ff   : > { %8161 = vst [vmem:[#allocation65_spill] sm:$0xff] %v6704_v54  ;;  %v7922_v54 = vrot.slane %v6348_v5, 4  ;;  %v2046_v27 = vmax.f32 %v1986_v38, %v8171_v56  ;;  %v2975_v51 = vmax.f32 %v2921_v9, %v2927_v17  ;;  %v8175_v38 = vrot.slane %v6686_v42, 4 }
 0x200   : > { %3889 = vst.msk [vmem:[%s4340_s17 + $0x1de] sm:$0x3] %vm3626_vm6, %v2867_v35  ;;  %v2876_v31 = vmax.f32 %v2656_v43, %v8169_v15  ;;  %v6734_v18 = vmax.f32 %v2972_v28, %v2870_v34  ;;  %v2653_v35 = vmax.f32 %v6717_v21, %v7923_v11  ;;  %v2171_v43 = vrot.slane %v2047_v7, 1 }
 0x201   : > { %8163 = vst [vmem:[#allocation60_spill] sm:$0xff] %v6717_v21  ;;  %v2879_v14 = vmax.f32 %v2659_v62, %v7922_v54  ;;  %v2170_v15 = vrot.slane %v2046_v27, 1  ;;  %v2665_v28 = vrot.slane %v8173_v6, 4  ;;  %v8176_v8 = vrot.slane %v8109_v47, 1 }
 0x202   : > { %8168 = vst [vmem:[#allocation71_spill] sm:$0xff] %v6727_v19  ;;  %v8174_v19 = vld [vmem:[#allocation14_spill] sm:$0xff]  ;;  %v2873_v56 = vmax.f32 %v2653_v35, %v8175_v38  ;;  %v2670_v54 = vrot.slane %v2046_v27, 4  ;;  %v8177_v5 = vrot.slane %v6351_v41, 1 }
 0x203   : > { %3892 = vst.msk [vmem:[%s4340_s17 + $0x1ee] sm:$0x3] %vm3626_vm6, %v2870_v34  ;;  %v2166_v13 = vrot.slane %v8174_v19, 1  ;;  %v2666_v62 = vrot.slane %v8174_v19, 4  ;;  %v2172_v11 = vsel %vm831_vm2, %v2170_v15, %v2171_v43 }
 0x204   : > { %8170 = vst [vmem:[#allocation15_spill] sm:$0xff] %v6734_v18  ;;  %v2174_v18 = vsel %vm831_vm2, %v2171_v43, %v8177_v5  ;;  %v2930_v25 = vmax.f32 %v2870_v34, %v2873_v56  ;;  %v2933_v42 = vmax.f32 %v2873_v56, %v2876_v31  ;;  %v6759_v35 = vmax.f32 %v2975_v51, %v2873_v56 }
 0x205   : > { %v2167_v59 = vsel %vm831_vm2, %v2165_v63, %v2166_v13  ;;  %v2169_v9 = vsel %vm831_vm2, %v2166_v13, %v8176_v8  ;;  %3895 = vst.msk [vmem:[%s4340_s17 + $0x1fe] sm:$0x3] %vm3626_vm6, %v2873_v56  ;;  %v2326_v63 = vmax.f32 %v2046_v27, %v2172_v11  ;;  %v2327_v38 = vmax.f32 %v2047_v7, %v2174_v18 }
 0x206   : > { %v2323_v21 = vmax.f32 %v8173_v6, %v2167_v59  ;;  %v2324_v16 = vmax.f32 %v8174_v19, %v2169_v9  ;;  %8178 = vst [vmem:[#allocation16_spill] sm:$0xff] %v6759_v35  ;;  %v2667_v15 = vsel %vm1601_vm4, %v2665_v28, %v2666_v62  ;;  %v2978_v3 = vmax.f32 %v2924_v39, %v2930_v25  ;;  %v8189_v59 = vld [vmem:[#allocation23_spill] sm:$0xff] }
 0x207   : > { %v2981_v33 = vmax.f32 %v2927_v17, %v2933_v42  ;;  %v2450_v22 = vrot.slane %v2326_v63, 2  ;;  %v2671_v5 = vrot.slane %v2047_v7, 4  ;;  %v2451_v43 = vrot.slane %v2327_v38, 2  ;;  %v8191_v9 = vld [vmem:[#allocation19_spill] sm:$0xff] }
 0x208   : > { %v2445_v13 = vrot.slane %v2323_v21, 2  ;;  %v2446_v8 = vrot.slane %v2324_v16, 2  ;;  %v8179_v19 = vrot.slane %v6339_v36, 2  ;;  %v6768_v51 = vmax.f32 %v2978_v3, %v2876_v31 }
 0x209   : > { %v6770_v11 = vmax.f32 %v2981_v33, %v2879_v14  ;;  %v2672_v27 = vsel %vm1601_vm4, %v2670_v54, %v2671_v5  ;;  %v2452_v25 = vsel %vm1288_vm3, %v2450_v22, %v2451_v43  ;;  %v8182_v42 = vrot.slane %v6379_v32, 2  ;;  %v8185_v22 = vld [vmem:[#allocation10_spill] sm:$0xff]  ;;  %v8186_v32 = vld [vmem:[#allocation17_spill] sm:$0xff] }
 0x20a   : > { %v2447_v6 = vsel %vm1288_vm3, %v2445_v13, %v2446_v8  ;;  %v2449_v34 = vsel %vm1288_vm3, %v2446_v8, %v8179_v19  ;;  %8180 = vst [vmem:[#allocation12_spill] sm:$0xff] %v6768_v51  ;;  %v8183_v17 = vrot.slane %v8109_v47, 4  ;;  %v2606_v28 = vmax.f32 %v2326_v63, %v2452_v25  ;;  %v8187_v14 = vld [vmem:[#allocation30_spill] sm:$0xff] }
 0x20b   : > { %8181 = vst [vmem:[#allocation21_spill] sm:$0xff] %v6770_v11  ;;  %v2603_v18 = vmax.f32 %v2323_v21, %v2447_v6  ;;  %v2454_v7 = vsel %vm1288_vm3, %v2451_v43, %v8182_v42  ;;  %v2604_v39 = vmax.f32 %v2324_v16, %v2449_v34  ;;  %v8184_v31 = vrot.slane %v6351_v41, 4  ;;  %v8188_v16 = vld [vmem:[#allocation22_spill] sm:$0xff]  ;;  %v8195_v43 = vld [vmem:[#allocation29_spill] sm:$0xff]  ;;  %v8196_v34 = vld [vmem:[#allocation31_spill] sm:$0xff] }
 0x20c   : > { %v2669_v36 = vsel %vm1601_vm4, %v2666_v62, %v8183_v17  ;;  %v2607_v3 = vmax.f32 %v2327_v38, %v2454_v7  ;;  %v1989_v54 = vmax.f32 %v8186_v32, %v8185_v22  ;;  %v1990_v47 = vmax.f32 %v8188_v16, %v8187_v14  ;;  %v8198_v14 = vld [vmem:[#allocation33_spill] sm:$0xff] }
 0x20d   : > { %v6780_v56 = vmax.f32 %v2603_v18, %v2667_v15  ;;  %v2674_v33 = vsel %vm1601_vm4, %v2671_v5, %v8184_v31  ;;  %v6785_v21 = vmax.f32 %v2604_v39, %v2669_v36  ;;  %v8190_v62 = vrot.slane %v8189_v59, 1 }
 0x20e   : > { %v8192_v63 = vrot.slane %v8191_v9, 1  ;;  %v6796_v38 = vmax.f32 %v2606_v28, %v2672_v27  ;;  %v6798_v41 = vmax.f32 %v2607_v3, %v2674_v33  ;;  %v8193_v8 = vrot.slane %v6396_v61, 1 }
 0x20f   : > { %v8194_v15 = vmov %v8190_v62  ;;  %v2049_v19 = vmax.f32 %v1989_v54, %v8195_v43  ;;  %v2050_v18 = vmax.f32 %v1990_v47, %v8196_v34  ;;  %v2660_v42 = vrot.slane %v8191_v9, 4 }
 0x210   : > { %v2162_v13 = vsel %vm831_vm2, %v8192_v63, %v8190_v62  ;;  %v2164_v5 = vsel %vm831_vm2, %v8194_v15, %v8193_v8  ;;  %3848 = vst.msk [vmem:[%s4340_s17 + $0xfe] sm:$0xfc] %vm3623_vm7, %v6796_v38  ;;  %v2661_v17 = vrot.slane %v8189_v59, 4  ;;  %v8197_v32 = vrot.slane %v6396_v61, 4 }
 0x211   : > { %v2320_v6 = vmax.f32 %v8191_v9, %v2162_v13  ;;  %v2321_v25 = vmax.f32 %v8189_v59, %v2164_v5  ;;  %3849 = vst.msk [vmem:[%s4340_s17 + $0x106] sm:$0xff] %vm180_vm0, %v6798_v41  ;;  %v2175_v36 = vrot.slane %v2049_v19, 1  ;;  %v2176_v28 = vrot.slane %v2050_v18, 1 }
 0x212   : > { %v2675_v31 = vrot.slane %v2049_v19, 4  ;;  %v2662_v33 = vsel %vm1601_vm4, %v2660_v42, %v2661_v17  ;;  %v2676_v22 = vrot.slane %v2050_v18, 4  ;;  %v2664_v54 = vsel %vm1601_vm4, %v2661_v17, %v8197_v32  ;;  %v8202_v17 = vld [vmem:[#allocation36_spill] sm:$0xff] }
 0x213   : > { %v2440_v39 = vrot.slane %v2320_v6, 2  ;;  %v2441_v3 = vrot.slane %v2321_v25, 2  ;;  %v2180_v16 = vrot.slane %v8198_v14, 1  ;;  %v2177_v47 = vsel %vm831_vm2, %v2175_v36, %v2176_v28 }
 0x214   : > { %v8199_v59 = vrot.slane %v6367_v44, 1  ;;  %v8200_v63 = vrot.slane %v6433_v52, 2  ;;  %v2329_v8 = vmax.f32 %v2049_v19, %v2177_v47  ;;  %v2677_v61 = vsel %vm1601_vm4, %v2675_v31, %v2676_v22 }
 0x215   : > { %v2442_v9 = vsel %vm1288_vm3, %v2440_v39, %v2441_v3  ;;  %v8201_v34 = vrot.slane %v6367_v44, 4  ;;  %v2181_v36 = vrot.slane %v8202_v17, 1  ;;  %v2681_v52 = vrot.slane %v8202_v17, 4 }
 0x216   : > { %v2179_v62 = vsel %vm831_vm2, %v2176_v28, %v8199_v59  ;;  %v2444_v13 = vsel %vm1288_vm3, %v2441_v3, %v8200_v63  ;;  %v2600_v5 = vmax.f32 %v2320_v6, %v2442_v9  ;;  %v2680_v28 = vrot.slane %v8198_v14, 4 }
 0x217   : > { %v2330_v15 = vmax.f32 %v2050_v18, %v2179_v62  ;;  %v2601_v43 = vmax.f32 %v2321_v25, %v2444_v13  ;;  %v2679_v42 = vsel %vm1601_vm4, %v2676_v22, %v8201_v34  ;;  %v2455_v32 = vrot.slane %v2329_v8, 2  ;;  %v8204_v25 = vld [vmem:[#allocation38_spill] sm:$0xff] }
 0x218   : > { %v2820_v59 = vmax.f32 %v2600_v5, %v2662_v33  ;;  %v2182_v19 = vsel %vm831_vm2, %v2180_v16, %v2181_v36  ;;  %v8203_v6 = vrot.slane %v6356_v30, 1  ;;  %v2185_v44 = vrot.slane %v8204_v25, 1 }
 0x219   : > { %v2456_v39 = vrot.slane %v2330_v15, 2  ;;  %v2821_v3 = vmax.f32 %v2601_v43, %v2664_v54  ;;  %v8205_v47 = vrot.slane %v6404_v57, 2  ;;  %v2332_v33 = vmax.f32 %v8198_v14, %v2182_v19  ;;  %v8207_v57 = vld [vmem:[#allocation40_spill] sm:$0xff] }
 0x21a   : > { %v2184_v18 = vsel %vm831_vm2, %v2181_v36, %v8203_v6  ;;  %v2880_v22 = vmax.f32 %v2820_v59, %v6780_v56  ;;  %v2682_v5 = vsel %vm1601_vm4, %v2680_v28, %v2681_v52  ;;  %v8206_v43 = vrot.slane %v6356_v30, 4 }
 0x21b   : > { %v2457_v31 = vsel %vm1288_vm3, %v2455_v32, %v2456_v39  ;;  %v2459_v62 = vsel %vm1288_vm3, %v2456_v39, %v8205_v47  ;;  %v2881_v16 = vmax.f32 %v2821_v3, %v6785_v21  ;;  %v2333_v63 = vmax.f32 %v8202_v17, %v2184_v18  ;;  %v8209_v3 = vld [vmem:[#allocation41_spill] sm:$0xff] }
 0x21c   : > { %v2609_v9 = vmax.f32 %v2329_v8, %v2457_v31  ;;  %v2610_v54 = vmax.f32 %v2330_v15, %v2459_v62  ;;  %v2460_v13 = vrot.slane %v2332_v33, 2  ;;  %v2684_v34 = vsel %vm1601_vm4, %v2681_v52, %v8206_v43 }
 0x21d   : > { %v2186_v36 = vrot.slane %v8207_v57, 1  ;;  %v2461_v14 = vrot.slane %v2333_v63, 2  ;;  %v2685_v8 = vrot.slane %v8204_v25, 4  ;;  %v8208_v59 = vrot.slane %v6382_v60, 1 }
 0x21e   : > { %v2829_v32 = vmax.f32 %v2609_v9, %v2677_v61  ;;  %v2830_v39 = vmax.f32 %v2610_v54, %v2679_v42  ;;  %v2686_v28 = vrot.slane %v8207_v57, 4  ;;  %v2190_v30 = vrot.slane %v8209_v3, 1 }
 0x21f   : > { %v2187_v15 = vsel %vm831_vm2, %v2185_v44, %v2186_v36  ;;  %v2189_v17 = vsel %vm831_vm2, %v2186_v36, %v8208_v59  ;;  %v2462_v42 = vsel %vm1288_vm3, %v2460_v13, %v2461_v14  ;;  %v8210_v52 = vrot.slane %v6393_v20, 2 }
 0x220   : > { %v6867_v19 = vmax.f32 %v6796_v38, %v2829_v32  ;;  %3851 = vst.msk [vmem:[%s4340_s17 + $0x10e] sm:$0xfc] %vm3623_vm7, %v2829_v32  ;;  %v6872_v61 = vmax.f32 %v6798_v41, %v2830_v39  ;;  %v2612_v18 = vmax.f32 %v2332_v33, %v2462_v42  ;;  %v2335_v31 = vmax.f32 %v8204_v25, %v2187_v15 }
 0x221   : > { %v2464_v6 = vsel %vm1288_vm3, %v2461_v14, %v8210_v52  ;;  %3852 = vst.msk [vmem:[%s4340_s17 + $0x116] sm:$0xff] %vm180_vm0, %v2830_v39  ;;  %v2336_v47 = vmax.f32 %v8207_v57, %v2189_v17  ;;  %v2687_v20 = vsel %vm1601_vm4, %v2685_v8, %v2686_v28  ;;  %v8211_v54 = vrot.slane %v6382_v60, 4  ;;  %v8212_v57 = vld [vmem:[#allocation43_spill] sm:$0xff]  ;;  %v8213_v14 = vld [vmem:[#allocation44_spill] sm:$0xff] }
 0x222   : > { %v2613_v44 = vmax.f32 %v2333_v63, %v2464_v6  ;;  %v6883_v62 = vmax.f32 %v2880_v22, %v6867_v19  ;;  %v6886_v9 = vmax.f32 %v2881_v16, %v6872_v61  ;;  %v6892_v33 = vmax.f32 %v2612_v18, %v2682_v5 }
 0x223   : > { %v2689_v13 = vsel %vm1601_vm4, %v2686_v28, %v8211_v54  ;;  %v2465_v25 = vrot.slane %v2335_v31, 2  ;;  %v2466_v43 = vrot.slane %v2336_v47, 2  ;;  %v2191_v36 = vrot.slane %v8212_v57, 1 }
 0x224   : > { %v6894_v63 = vmax.f32 %v2613_v44, %v2684_v34  ;;  %v2690_v22 = vrot.slane %v8209_v3, 4  ;;  %v2691_v16 = vrot.slane %v8212_v57, 4  ;;  %v2195_v15 = vrot.slane %v8213_v14, 1  ;;  %3854 = vst.msk [vmem:[%s4340_s17 + $0x11e] sm:$0xfc] %vm3623_vm7, %v6892_v33 }
 0x225   : > { %v6901_v8 = vmax.f32 %v2829_v32, %v6892_v33  ;;  %v2467_v5 = vsel %vm1288_vm3, %v2465_v25, %v2466_v43  ;;  %v8214_v34 = vrot.slane %v6420_v48, 2  ;;  %v2192_v32 = vsel %vm831_vm2, %v2190_v30, %v2191_v36 }
 0x226   : > { %v6907_v60 = vmax.f32 %v2830_v39, %v6894_v63  ;;  %3855 = vst.msk [vmem:[%s4340_s17 + $0x126] sm:$0xff] %vm180_vm0, %v6894_v63  ;;  %v2615_v17 = vmax.f32 %v2335_v31, %v2467_v5  ;;  %v8215_v42 = vrot.slane %v6408_v40, 1  ;;  %v2338_v39 = vmax.f32 %v8209_v3, %v2192_v32  ;;  %v8216_v31 = vld [vmem:[#allocation46_spill] sm:$0xff] }
 0x227   : > { %v2469_v59 = vsel %vm1288_vm3, %v2466_v43, %v8214_v34  ;;  %v2692_v48 = vsel %vm1601_vm4, %v2690_v22, %v2691_v16  ;;  %v2196_v54 = vrot.slane %v8216_v31, 1  ;;  %v8218_v22 = vld [vmem:[#allocation48_spill] sm:$0xff] }
 0x228   : > { %v2616_v28 = vmax.f32 %v2336_v47, %v2469_v59  ;;  %v2194_v52 = vsel %vm831_vm2, %v2191_v36, %v8215_v42  ;;  %v6923_v18 = vmax.f32 %v2615_v17, %v2687_v20  ;;  %v2695_v47 = vrot.slane %v8213_v14, 4 }
 0x229   : > { %v2339_v6 = vmax.f32 %v8212_v57, %v2194_v52  ;;  %v2470_v25 = vrot.slane %v2338_v39, 2  ;;  %v2696_v36 = vrot.slane %v8216_v31, 4  ;;  %v2197_v20 = vsel %vm831_vm2, %v2195_v15, %v2196_v54 }
 0x22a   : > { %v6925_v44 = vmax.f32 %v2616_v28, %v2689_v13  ;;  %v6933_v3 = vmax.f32 %v6892_v33, %v6923_v18  ;;  %3857 = vst.msk [vmem:[%s4340_s17 + $0x12e] sm:$0xfc] %vm3623_vm7, %v6923_v18  ;;  %v8217_v13 = vrot.slane %v6437_v10, 1  ;;  %v2200_v5 = vrot.slane %v8218_v22, 1 }
 0x22b   : > { %v2471_v43 = vrot.slane %v2339_v6, 2  ;;  %v8219_v59 = vrot.slane %v6447_v1, 2  ;;  %v2341_v28 = vmax.f32 %v8213_v14, %v2197_v20  ;;  %v8220_v52 = vrot.slane %v6408_v40, 4 }
 0x22c   : > { %v2199_v57 = vsel %vm831_vm2, %v2196_v54, %v8217_v13  ;;  %3858 = vst.msk [vmem:[%s4340_s17 + $0x136] sm:$0xff] %vm180_vm0, %v6925_v44  ;;  %v2697_v13 = vsel %vm1601_vm4, %v2695_v47, %v2696_v36  ;;  %v6960_v14 = vmax.f32 %v6894_v63, %v6925_v44 }
 0x22d   : > { %v2472_v34 = vsel %vm1288_vm3, %v2470_v25, %v2471_v43  ;;  %v2474_v17 = vsel %vm1288_vm3, %v2471_v43, %v8219_v59  ;;  %v2342_v32 = vmax.f32 %v8216_v31, %v2199_v57  ;;  %v2694_v54 = vsel %vm1601_vm4, %v2691_v16, %v8220_v52  ;;  %v8221_v25 = vld [vmem:[#allocation49_spill] sm:$0xff] }
 0x22e   : > { %v2618_v15 = vmax.f32 %v2338_v39, %v2472_v34  ;;  %v2619_v42 = vmax.f32 %v2339_v6, %v2474_v17  ;;  %v2475_v7 = vrot.slane %v2341_v28, 2  ;;  %v2201_v1 = vrot.slane %v8221_v25, 1  ;;  %v8224_v17 = vld [vmem:[#allocation52_spill] sm:$0xff] }
 0x22f   : > { %v2476_v27 = vrot.slane %v2342_v32, 2  ;;  %v2700_v43 = vrot.slane %v8218_v22, 4  ;;  %v2701_v40 = vrot.slane %v8221_v25, 4  ;;  %v8222_v31 = vrot.slane %v6476_v46, 2 }
 0x230   : > { %v6962_v39 = vmax.f32 %v2618_v15, %v2692_v48  ;;  %v6964_v6 = vmax.f32 %v2619_v42, %v2694_v54  ;;  %v2202_v20 = vsel %vm831_vm2, %v2200_v5, %v2201_v1  ;;  %v8223_v57 = vrot.slane %v6466_v23, 1 }
 0x231   : > { %v2477_v16 = vsel %vm1288_vm3, %v2475_v7, %v2476_v27  ;;  %v2479_v47 = vsel %vm1288_vm3, %v2476_v27, %v8222_v31  ;;  %v2205_v46 = vrot.slane %v8224_v17, 1  ;;  %v8225_v27 = vrot.slane %v6437_v10, 4 }
 0x232   : > { %v2204_v34 = vsel %vm831_vm2, %v2201_v1, %v8223_v57  ;;  %v6977_v48 = vmax.f32 %v6923_v18, %v6962_v39  ;;  %3860 = vst.msk [vmem:[%s4340_s17 + $0x13e] sm:$0xfc] %vm3623_vm7, %v6962_v39  ;;  %v2621_v59 = vmax.f32 %v2341_v28, %v2477_v16  ;;  %v2622_v7 = vmax.f32 %v2342_v32, %v2479_v47  ;;  %v8226_v32 = vld [vmem:[#allocation54_spill] sm:$0xff]  ;;  %v8229_v57 = vld [vmem:[#allocation56_spill] sm:$0xff] }
 0x233   : > { %3861 = vst.msk [vmem:[%s4340_s17 + $0x146] sm:$0xff] %vm180_vm0, %v6964_v6  ;;  %v2699_v5 = vsel %vm1601_vm4, %v2696_v36, %v8225_v27  ;;  %v2344_v15 = vmax.f32 %v8218_v22, %v2202_v20  ;;  %v2345_v42 = vmax.f32 %v8221_v25, %v2204_v34  ;;  %v2702_v52 = vsel %vm1601_vm4, %v2700_v43, %v2701_v40 }
 0x234   : > { %v6992_v54 = vmax.f32 %v2621_v59, %v2697_v13  ;;  %v6994_v28 = vmax.f32 %v2622_v7, %v2699_v5  ;;  %v2206_v1 = vrot.slane %v8226_v32, 1  ;;  %v2705_v16 = vrot.slane %v8224_v17, 4 }
 0x235   : > { %v7000_v10 = vmax.f32 %v6925_v44, %v6964_v6  ;;  %v2480_v36 = vrot.slane %v2344_v15, 2  ;;  %v2481_v31 = vrot.slane %v2345_v42, 2  ;;  %v2706_v22 = vrot.slane %v8226_v32, 4 }
 0x236   : > { %3863 = vst.msk [vmem:[%s4340_s17 + $0x14e] sm:$0xfc] %vm3623_vm7, %v6992_v54  ;;  %v8227_v13 = vrot.slane %v6466_v23, 4  ;;  %v2207_v43 = vsel %vm831_vm2, %v2205_v46, %v2206_v1  ;;  %v8228_v47 = vrot.slane %v6500_v45, 1  ;;  %v2210_v34 = vrot.slane %v8229_v57, 1 }
 0x237   : > { %3864 = vst.msk [vmem:[%s4340_s17 + $0x156] sm:$0xff] %vm180_vm0, %v6994_v28  ;;  %v2482_v59 = vsel %vm1288_vm3, %v2480_v36, %v2481_v31  ;;  %v8230_v7 = vrot.slane %v6497_v24, 2  ;;  %v2347_v23 = vmax.f32 %v8224_v17, %v2207_v43  ;;  %v7025_v46 = vmax.f32 %v6962_v39, %v6992_v54  ;;  %v8231_v36 = vld [vmem:[#allocation57_spill] sm:$0xff] }
 0x238   : > { %v2704_v25 = vsel %vm1601_vm4, %v2701_v40, %v8227_v13  ;;  %v2209_v20 = vsel %vm831_vm2, %v2206_v1, %v8228_v47  ;;  %v2624_v5 = vmax.f32 %v2344_v15, %v2482_v59  ;;  %v2707_v13 = vsel %vm1601_vm4, %v2705_v16, %v2706_v22 }
 0x239   : > { %v2484_v27 = vsel %vm1288_vm3, %v2481_v31, %v8230_v7  ;;  %v2348_v40 = vmax.f32 %v8226_v32, %v2209_v20  ;;  %v2485_v47 = vrot.slane %v2347_v23, 2  ;;  %v2211_v11 = vrot.slane %v8231_v36, 1 }
 0x23a   : > { %v2625_v1 = vmax.f32 %v2345_v42, %v2484_v27  ;;  %v2710_v24 = vrot.slane %v8229_v57, 4  ;;  %v7032_v17 = vmax.f32 %v6964_v6, %v6994_v28  ;;  %v7034_v32 = vmax.f32 %v2624_v5, %v2702_v52 }
 0x23b   : > { %v2486_v30 = vrot.slane %v2348_v40, 2  ;;  %v2711_v15 = vrot.slane %v8231_v36, 4  ;;  %v8232_v16 = vrot.slane %v6525_v37, 2  ;;  %v2212_v20 = vsel %vm831_vm2, %v2210_v34, %v2211_v11 }
 0x23c   : > { %v7036_v31 = vmax.f32 %v2625_v1, %v2704_v25  ;;  %v8233_v59 = vrot.slane %v6528_v50, 1  ;;  %3866 = vst.msk [vmem:[%s4340_s17 + $0x15e] sm:$0xfc] %vm3623_vm7, %v7034_v32  ;;  %v8234_v27 = vrot.slane %v6500_v45, 4  ;;  %v8235_v1 = vld [vmem:[#allocation59_spill] sm:$0xff] }
 0x23d   : > { %v2487_v42 = vsel %vm1288_vm3, %v2485_v47, %v2486_v30  ;;  %v2489_v43 = vsel %vm1288_vm3, %v2486_v30, %v8232_v16  ;;  %v2215_v37 = vrot.slane %v8235_v1, 1  ;;  %v7056_v30 = vmax.f32 %v6992_v54, %v7034_v32 }
 0x23e   : > { %v2214_v7 = vsel %vm831_vm2, %v2211_v11, %v8233_v59  ;;  %v2627_v52 = vmax.f32 %v2347_v23, %v2487_v42  ;;  %v2628_v25 = vmax.f32 %v2348_v40, %v2489_v43  ;;  %v2709_v5 = vsel %vm1601_vm4, %v2706_v22, %v8234_v27  ;;  %3867 = vst.msk [vmem:[%s4340_s17 + $0x166] sm:$0xff] %vm180_vm0, %v7036_v31  ;;  %v8237_v22 = vld [vmem:[#allocation61_spill] sm:$0xff] }
 0x23f   : > { %8236 = vst [vmem:[#allocation4_spill] sm:$0xff] %v7056_v30  ;;  %v2350_v11 = vmax.f32 %v8229_v57, %v2212_v20  ;;  %v2351_v34 = vmax.f32 %v8231_v36, %v2214_v7  ;;  %v2712_v23 = vsel %vm1601_vm4, %v2710_v24, %v2711_v15  ;;  %v2216_v47 = vrot.slane %v8237_v22, 1 }
 0x240   : > { %v7064_v45 = vmax.f32 %v2627_v52, %v2707_v13  ;;  %v7066_v40 = vmax.f32 %v2628_v25, %v2709_v5  ;;  %v2715_v42 = vrot.slane %v8235_v1, 4  ;;  %v7072_v16 = vmax.f32 %v6994_v28, %v7036_v31  ;;  %v8241_v52 = vld [vmem:[#allocation62_spill] sm:$0xff] }
 0x241   : > { %v2490_v43 = vrot.slane %v2350_v11, 2  ;;  %v2491_v59 = vrot.slane %v2351_v34, 2  ;;  %v2716_v57 = vrot.slane %v8237_v22, 4  ;;  %v8239_v13 = vrot.slane %v6528_v50, 4 }
 0x242   : > { %8238 = vst [vmem:[#allocation27_spill] sm:$0xff] %v7072_v16  ;;  %v2217_v24 = vsel %vm831_vm2, %v2215_v37, %v2216_v47  ;;  %v8240_v20 = vrot.slane %v6546_v55, 1  ;;  %v2220_v25 = vrot.slane %v8241_v52, 1  ;;  %v8242_v5 = vrot.slane %v6559_v29, 2 }
 0x243   : > { %3869 = vst.msk [vmem:[%s4340_s17 + $0x16e] sm:$0xfc] %vm3623_vm7, %v7064_v45  ;;  %v2714_v36 = vsel %vm1601_vm4, %v2711_v15, %v8239_v13  ;;  %v2492_v27 = vsel %vm1288_vm3, %v2490_v43, %v2491_v59  ;;  %v2353_v50 = vmax.f32 %v8235_v1, %v2217_v24  ;;  %v7097_v37 = vmax.f32 %v7034_v32, %v7064_v45  ;;  %v8244_v43 = vld [vmem:[#allocation64_spill] sm:$0xff] }
 0x244   : > { %v2219_v7 = vsel %vm831_vm2, %v2216_v47, %v8240_v20  ;;  %3870 = vst.msk [vmem:[%s4340_s17 + $0x176] sm:$0xff] %vm180_vm0, %v7066_v40  ;;  %v2494_v51 = vsel %vm1288_vm3, %v2491_v59, %v8242_v5  ;;  %v2630_v47 = vmax.f32 %v2350_v11, %v2492_v27  ;;  %v2717_v20 = vsel %vm1601_vm4, %v2715_v42, %v2716_v57 }
 0x245   : > { %v2354_v15 = vmax.f32 %v8237_v22, %v2219_v7  ;;  %8243 = vst [vmem:[#allocation26_spill] sm:$0xff] %v7097_v37  ;;  %v2631_v13 = vmax.f32 %v2351_v34, %v2494_v51  ;;  %v2495_v35 = vrot.slane %v2353_v50, 2  ;;  %v2221_v30 = vrot.slane %v8244_v43, 1 }
 0x246   : > { %v2720_v29 = vrot.slane %v8241_v52, 4  ;;  %v7104_v1 = vmax.f32 %v7036_v31, %v7066_v40  ;;  %v7106_v22 = vmax.f32 %v2630_v47, %v2712_v23  ;;  %v2721_v11 = vrot.slane %v8244_v43, 4  ;;  %v8249_v47 = vld [vmem:[#allocation66_spill] sm:$0xff] }
 0x247   : > { %v2496_v16 = vrot.slane %v2354_v15, 2  ;;  %v7108_v59 = vmax.f32 %v2631_v13, %v2714_v36  ;;  %v8246_v34 = vrot.slane %v6575_v49, 2  ;;  %v2222_v24 = vsel %vm831_vm2, %v2220_v25, %v2221_v30 }
 0x248   : > { %8245 = vst [vmem:[#allocation14_spill] sm:$0xff] %v7104_v1  ;;  %v8247_v7 = vrot.slane %v6549_v58, 1  ;;  %v8248_v5 = vrot.slane %v6546_v55, 4  ;;  %v2225_v49 = vrot.slane %v8249_v47, 1 }
 0x249   : > { %v2497_v51 = vsel %vm1288_vm3, %v2495_v35, %v2496_v16  ;;  %v2499_v42 = vsel %vm1288_vm3, %v2496_v16, %v8246_v34  ;;  %3872 = vst.msk [vmem:[%s4340_s17 + $0x17e] sm:$0xfc] %vm3623_vm7, %v7106_v22  ;;  %v7128_v16 = vmax.f32 %v7064_v45, %v7106_v22  ;;  %v7144_v34 = vmax.f32 %v7066_v40, %v7108_v59 }
 0x24a   : > { %v2224_v27 = vsel %vm831_vm2, %v2221_v30, %v8247_v7  ;;  %v2633_v23 = vmax.f32 %v2353_v50, %v2497_v51  ;;  %v2634_v36 = vmax.f32 %v2354_v15, %v2499_v42  ;;  %v2719_v35 = vsel %vm1601_vm4, %v2716_v57, %v8248_v5  ;;  %3873 = vst.msk [vmem:[%s4340_s17 + $0x186] sm:$0xff] %vm180_vm0, %v7108_v59  ;;  %v8253_v57 = vld [vmem:[#allocation68_spill] sm:$0xff] }
 0x24b   : > { %8250 = vst [vmem:[#allocation10_spill] sm:$0xff] %v7128_v16  ;;  %v2356_v30 = vmax.f32 %v8241_v52, %v2222_v24  ;;  %v2357_v25 = vmax.f32 %v8244_v43, %v2224_v27  ;;  %v2722_v50 = vsel %vm1601_vm4, %v2720_v29, %v2721_v11  ;;  %v2226_v13 = vrot.slane %v8253_v57, 1 }
 0x24c   : > { %v7136_v55 = vmax.f32 %v2633_v23, %v2717_v20  ;;  %v7138_v15 = vmax.f32 %v2634_v36, %v2719_v35  ;;  %v2725_v51 = vrot.slane %v8249_v47, 4  ;;  %8254 = vst [vmem:[#allocation22_spill] sm:$0xff] %v7144_v34  ;;  %v2726_v52 = vrot.slane %v8253_v57, 4  ;;  %v8257_v23 = vld [vmem:[#allocation70_spill] sm:$0xff] }
 0x24d   : > { %v2500_v42 = vrot.slane %v2356_v30, 2  ;;  %v2501_v7 = vrot.slane %v2357_v25, 2  ;;  %v8255_v20 = vrot.slane %v6549_v58, 4  ;;  %v2227_v29 = vsel %vm831_vm2, %v2225_v49, %v2226_v13 }
 0x24e   : > { %8251 = vst [vmem:[#allocation17_spill] sm:$0xff] %v7136_v55  ;;  %v8256_v24 = vrot.slane %v6583_v12, 1  ;;  %v2230_v36 = vrot.slane %v8257_v23, 1  ;;  %v8258_v35 = vrot.slane %v6580_v0, 2  ;;  %v2359_v58 = vmax.f32 %v8249_v47, %v2227_v29 }
 0x24f   : > { %8252 = vst [vmem:[#allocation30_spill] sm:$0xff] %v7138_v15  ;;  %v2724_v43 = vsel %vm1601_vm4, %v2721_v11, %v8255_v20  ;;  %v2502_v5 = vsel %vm1288_vm3, %v2500_v42, %v2501_v7  ;;  %v7169_v49 = vmax.f32 %v7106_v22, %v7136_v55  ;;  %v8260_v42 = vld [vmem:[#allocation73_spill] sm:$0xff]  ;;  %v2730_v0 = vrot.slane %v8257_v23, 4 }
 0x250   : > { %3875 = vst.msk [vmem:[%s4340_s17 + $0x18e] sm:$0xfc] %vm3623_vm7, %v7136_v55  ;;  %v2229_v27 = vsel %vm831_vm2, %v2226_v13, %v8256_v24  ;;  %v2504_v34 = vsel %vm1288_vm3, %v2501_v7, %v8258_v35  ;;  %v2636_v13 = vmax.f32 %v2356_v30, %v2502_v5  ;;  %v2727_v24 = vsel %vm1601_vm4, %v2725_v51, %v2726_v52 }
 0x251   : > { %3876 = vst.msk [vmem:[%s4340_s17 + $0x196] sm:$0xff] %vm180_vm0, %v7138_v15  ;;  %v2360_v11 = vmax.f32 %v8253_v57, %v2229_v27  ;;  %v2637_v20 = vmax.f32 %v2357_v25, %v2504_v34  ;;  %v2505_v16 = vrot.slane %v2359_v58, 2  ;;  %v2231_v37 = vrot.slane %v8260_v42, 1 }
 0x252   : > { %8259 = vst [vmem:[#allocation23_spill] sm:$0xff] %v7169_v49  ;;  %v7176_v47 = vmax.f32 %v7108_v59, %v7138_v15  ;;  %v7178_v57 = vmax.f32 %v2636_v13, %v2722_v50  ;;  %v2731_v30 = vrot.slane %v8260_v42, 4  ;;  %v8263_v51 = vrot.slane %v6617_v53, 2  ;;  %v8281_v49 = vld [vmem:[#allocation67_spill] sm:$0xff] }
 0x253   : > { %v2506_v1 = vrot.slane %v2360_v11, 2  ;;  %v7180_v7 = vmax.f32 %v2637_v20, %v2724_v43  ;;  %v2232_v29 = vsel %vm831_vm2, %v2230_v36, %v2231_v37  ;;  %v8264_v27 = vrot.slane %v6603_v26, 1 }
 0x254   : > { %8261 = vst [vmem:[#allocation19_spill] sm:$0xff] %v7176_v47  ;;  %v8265_v35 = vrot.slane %v6583_v12, 4  ;;  %v2235_v53 = vrot.slane %v6132_v4, 1  ;;  %v2732_v36 = vsel %vm1601_vm4, %v2730_v0, %v2731_v30  ;;  %v2735_v20 = vrot.slane %v6132_v4, 4 }
 0x255   : > { %8262 = vst [vmem:[#allocation29_spill] sm:$0xff] %v7178_v57  ;;  %v2507_v25 = vsel %vm1288_vm3, %v2505_v16, %v2506_v1  ;;  %v2509_v34 = vsel %vm1288_vm3, %v2506_v1, %v8263_v51  ;;  %v2234_v5 = vsel %vm831_vm2, %v2231_v37, %v8264_v27  ;;  %v7200_v1 = vmax.f32 %v7136_v55, %v7178_v57  ;;  %v8269_v27 = vld [vmem:[#allocation7_spill] sm:$0xff] }
 0x256   : > { %3878 = vst.msk [vmem:[%s4340_s17 + $0x19e] sm:$0xfc] %vm3623_vm7, %v7178_v57  ;;  %v2639_v50 = vmax.f32 %v2359_v58, %v2507_v25  ;;  %v2640_v43 = vmax.f32 %v2360_v11, %v2509_v34  ;;  %v2729_v13 = vsel %vm1601_vm4, %v2726_v52, %v8265_v35  ;;  %v2362_v37 = vmax.f32 %v8257_v23, %v2232_v29  ;;  %v8268_v58 = vld [vmem:[#allocation78_spill] sm:$0xff]  ;;  %v8270_v35 = vld [vmem:[#allocation5_spill] sm:$0xff] }
 0x257   : > { %8266 = vst [vmem:[#allocation31_spill] sm:$0xff] %v7200_v1  ;;  %v2363_v16 = vmax.f32 %v8260_v42, %v2234_v5  ;;  %v2236_v11 = vrot.slane %v8268_v58, 1  ;;  %v2736_v34 = vrot.slane %v8268_v58, 4  ;;  %v8271_v23 = vld [vmem:[#allocation74_spill] sm:$0xff]  ;;  %v7221_v42 = vmax.f32 %v7138_v15, %v7180_v7 }
 0x258   : > { %3879 = vst.msk [vmem:[%s4340_s17 + $0x1a6] sm:$0xff] %vm180_vm0, %v7180_v7  ;;  %v7208_v12 = vmax.f32 %v2639_v50, %v2727_v24  ;;  %v7210_v52 = vmax.f32 %v2640_v43, %v2729_v13  ;;  %v2510_v25 = vrot.slane %v2362_v37, 2  ;;  %v8272_v29 = vmax.f32 %v8270_v35, %v8271_v23  ;;  %v8275_v50 = vld [vmem:[#allocation32_spill] sm:$0xff]  ;;  %v8277_v35 = vld [vmem:[#allocation42_spill] sm:$0xff] }
 0x259   : > { %v2511_v51 = vrot.slane %v2363_v16, 2  ;;  %8273 = vst [vmem:[#allocation36_spill] sm:$0xff] %v7221_v42  ;;  %v8274_v24 = vrot.slane %v6603_v26, 4  ;;  %v2237_v5 = vsel %vm831_vm2, %v2235_v53, %v2236_v11  ;;  %v8276_v43 = vrot.slane %v8275_v50, 1 }
 0x25a   : > { %8267 = vst [vmem:[#allocation33_spill] sm:$0xff] %v7210_v52  ;;  %v2088_v1 = vmax.f32 %v8272_v29, %v8269_v27  ;;  %v8278_v23 = vrot.slane %v8277_v35, 2  ;;  %v2365_v42 = vmax.f32 %v6132_v4, %v2237_v5  ;;  %v8282_v35 = vld [vmem:[#allocation76_spill] sm:$0xff] }
 0x25b   : > { %3881 = vst.msk [vmem:[%s4340_s17 + $0x1ae] sm:$0xfc] %vm3623_vm7, %v7208_v12  ;;  %v2734_v0 = vsel %vm1601_vm4, %v2731_v30, %v8274_v24  ;;  %v2239_v13 = vsel %vm831_vm2, %v2236_v11, %v8276_v43  ;;  %v2512_v27 = vsel %vm1288_vm3, %v2510_v25, %v2511_v51  ;;  %v7244_v30 = vmax.f32 %v7178_v57, %v7208_v12  ;;  %v8280_v25 = vld [vmem:[#allocation11_spill] sm:$0xff] }
 0x25c   : > { %3882 = vst.msk [vmem:[%s4340_s17 + $0x1b6] sm:$0xff] %vm180_vm0, %v7210_v52  ;;  %v2514_v29 = vsel %vm1288_vm3, %v2511_v51, %v8278_v23  ;;  %v2366_v26 = vmax.f32 %v8268_v58, %v2239_v13  ;;  %v2642_v53 = vmax.f32 %v2362_v37, %v2512_v27  ;;  %v2737_v24 = vsel %vm1601_vm4, %v2735_v20, %v2736_v34  ;;  %v8284_v23 = vld [vmem:[#allocation8_spill] sm:$0xff]  ;;  %v8285_v37 = vld [vmem:[#allocation69_spill] sm:$0xff]  ;;  %v8286_v27 = vld [vmem:[#allocation75_spill] sm:$0xff] }
 0x25d   : > { %8279 = vst [vmem:[#allocation38_spill] sm:$0xff] %v7244_v30  ;;  %v2643_v11 = vmax.f32 %v2363_v16, %v2514_v29  ;;  %v2515_v43 = vrot.slane %v2365_v42, 2  ;;  %v8283_v15 = vmax.f32 %v8281_v49, %v8282_v35  ;;  %v2240_v4 = vrot.slane %v2088_v1, 1  ;;  %v8288_v30 = vld [vmem:[#allocation45_spill] sm:$0xff] }
 0x25e   : > { %v2516_v47 = vrot.slane %v2366_v26, 2  ;;  %v7251_v5 = vmax.f32 %v2642_v53, %v2732_v36  ;;  %v2740_v13 = vrot.slane %v2088_v1, 4  ;;  %v8287_v16 = vmax.f32 %v8285_v37, %v8286_v27  ;;  %v8296_v37 = vld [vmem:[#allocation20_spill] sm:$0xff] }
 0x25f   : > { %v2089_v51 = vmax.f32 %v8283_v15, %v8280_v25  ;;  %v7253_v58 = vmax.f32 %v2643_v11, %v2734_v0  ;;  %v8289_v57 = vrot.slane %v8288_v30, 2  ;;  %v7265_v36 = vmax.f32 %v7180_v7, %v7210_v52  ;;  %v8297_v27 = vld [vmem:[#allocation72_spill] sm:$0xff] }
 0x260   : > { %v2091_v29 = vmax.f32 %v8287_v16, %v8284_v23  ;;  %v2517_v20 = vsel %vm1288_vm3, %v2515_v43, %v2516_v47  ;;  %3884 = vst.msk [vmem:[%s4340_s17 + $0x1be] sm:$0xfc] %vm3623_vm7, %v7251_v5  ;;  %v8291_v11 = vrot.slane %v8275_v50, 4  ;;  %v7275_v30 = vmax.f32 %v7208_v12, %v7251_v5 }
 0x261   : > { %v2519_v55 = vsel %vm1288_vm3, %v2516_v47, %v8289_v57  ;;  %v2241_v49 = vrot.slane %v2089_v51, 1  ;;  %v2741_v15 = vrot.slane %v2089_v51, 4  ;;  %8290 = vst [vmem:[#allocation40_spill] sm:$0xff] %v7265_v36  ;;  %v2645_v0 = vmax.f32 %v2365_v42, %v2517_v20  ;;  %v8293_v57 = vld [vmem:[#allocation50_spill] sm:$0xff] }
 0x262   : > { %v2646_v53 = vmax.f32 %v2366_v26, %v2519_v55  ;;  %v2739_v43 = vsel %vm1601_vm4, %v2736_v34, %v8291_v11  ;;  %8292 = vst [vmem:[#allocation41_spill] sm:$0xff] %v7275_v30  ;;  %v8294_v25 = vrot.slane %v8293_v57, 1  ;;  %v7291_v23 = vmax.f32 %v7210_v52, %v7253_v58  ;;  %v8300_v30 = vld [vmem:[#allocation3_spill] sm:$0xff] }
 0x263   : > { %3885 = vst.msk [vmem:[%s4340_s17 + $0x1c6] sm:$0xff] %vm180_vm0, %v7253_v58  ;;  %v2242_v47 = vsel %vm831_vm2, %v2240_v4, %v2241_v49  ;;  %v2742_v55 = vsel %vm1601_vm4, %v2740_v13, %v2741_v15  ;;  %v7285_v26 = vmax.f32 %v2645_v0, %v2737_v24  ;;  %v8298_v4 = vld [vmem:[#allocation77_spill] sm:$0xff]  ;;  %v2245_v11 = vrot.slane %v2091_v29, 1 }
 0x264   : > { %v2244_v42 = vsel %vm831_vm2, %v2241_v49, %v8294_v25  ;;  %v7287_v50 = vmax.f32 %v2646_v53, %v2739_v43  ;;  %v2368_v34 = vmax.f32 %v2088_v1, %v2242_v47  ;;  %8295 = vst [vmem:[#allocation43_spill] sm:$0xff] %v7291_v23  ;;  %v8299_v16 = vmax.f32 %v8297_v27, %v8298_v4  ;;  %v8304_v4 = vld [vmem:[#allocation47_spill] sm:$0xff] }
 0x265   : > { %v2369_v35 = vmax.f32 %v2089_v51, %v2244_v42  ;;  %v8301_v49 = vrot.slane %v8300_v30, 1  ;;  %v8302_v13 = vrot.slane %v6262_v2, 1  ;;  %3887 = vst.msk [vmem:[%s4340_s17 + $0x1ce] sm:$0xfc] %vm3623_vm7, %v7285_v26  ;;  %v8303_v0 = vrot.slane %v8293_v57, 4  ;;  %v8306_v23 = vld [vmem:[#allocation55_spill] sm:$0xff] }
 0x266   : > { %v2092_v20 = vmax.f32 %v8299_v16, %v8296_v37  ;;  %v2520_v1 = vrot.slane %v2368_v34, 2  ;;  %v2745_v43 = vrot.slane %v2091_v29, 4  ;;  %3888 = vst.msk [vmem:[%s4340_s17 + $0x1d6] sm:$0xff] %vm180_vm0, %v7287_v50  ;;  %v8305_v16 = vrot.slane %v8304_v4, 2 }
 0x267   : > { %v2254_v24 = vsel %vm831_vm2, %v8302_v13, %v8301_v49  ;;  %v2521_v51 = vrot.slane %v2369_v35, 2  ;;  %v2744_v53 = vsel %vm1601_vm4, %v2741_v15, %v8303_v0  ;;  %v2982_v15 = vmax.f32 %v6883_v62, %v6892_v33 }
 0x268   : > { %v2246_v47 = vrot.slane %v2092_v20, 1  ;;  %v2746_v25 = vrot.slane %v2092_v20, 4  ;;  %v7312_v42 = vmax.f32 %v6262_v2, %v2254_v24  ;;  %v2983_v57 = vmax.f32 %v6886_v9, %v6894_v63 }
 0x269   : > { %v2522_v27 = vsel %vm1288_vm3, %v2520_v1, %v2521_v51  ;;  %v2524_v49 = vsel %vm1288_vm3, %v2521_v51, %v8305_v16  ;;  %v8307_v36 = vrot.slane %v8306_v23, 1  ;;  %v7331_v62 = vmax.f32 %v7251_v5, %v7285_v26 }
 0x26a   : > { %v2648_v13 = vmax.f32 %v2368_v34, %v2522_v27  ;;  %v2649_v0 = vmax.f32 %v2369_v35, %v2524_v49  ;;  %v2247_v24 = vsel %vm831_vm2, %v2245_v11, %v2246_v47  ;;  %v2747_v51 = vsel %vm1601_vm4, %v2745_v43, %v2746_v25  ;;  %v8313_v49 = vld [vmem:[#allocation60_spill] sm:$0xff] }
 0x26b   : > { %v2249_v37 = vsel %vm831_vm2, %v2246_v47, %v8307_v36  ;;  %v2371_v1 = vmax.f32 %v2091_v29, %v2247_v24  ;;  %v7958_v4 = vrot.slane %v7312_v42, 2  ;;  %v8308_v63 = vrot.slane %v8300_v30, 4  ;;  %v8315_v24 = vld [vmem:[#allocation24_spill] sm:$0xff] }
 0x26c   : > { %v2372_v52 = vmax.f32 %v2092_v20, %v2249_v37  ;;  %v7333_v9 = vmax.f32 %v2648_v13, %v2742_v55  ;;  %v7335_v33 = vmax.f32 %v2649_v0, %v2744_v53  ;;  %v8309_v34 = vrot.slane %v6262_v2, 4  ;;  %v8310_v20 = vld [vmem:[#allocation63_spill] sm:$0xff] }
 0x26d   : > { %v2525_v36 = vrot.slane %v2371_v1, 2  ;;  %v8311_v11 = vrot.slane %v8310_v20, 2  ;;  %v3078_v47 = vrot.slane %v2982_v15, 1  ;;  %v7349_v55 = vmax.f32 %v7253_v58, %v7287_v50 }
 0x26e   : > { %v2754_v29 = vsel %vm1601_vm4, %v8309_v34, %v8308_v63  ;;  %v2526_v35 = vrot.slane %v2372_v52, 2  ;;  %3890 = vst.msk [vmem:[%s4340_s17 + $0x1de] sm:$0xfc] %vm3623_vm7, %v7333_v9  ;;  %v8312_v53 = vrot.slane %v8306_v23, 4  ;;  %v3079_v27 = vrot.slane %v2983_v57, 1 }
 0x26f   : > { %v2534_v43 = vsel %vm1288_vm3, %v7958_v4, %v8311_v11  ;;  %3891 = vst.msk [vmem:[%s4340_s17 + $0x1e6] sm:$0xff] %vm180_vm0, %v7335_v33  ;;  %v8314_v13 = vrot.slane %v8313_v49, 2  ;;  %v3081_v63 = vrot.slane %v8315_v24, 1  ;;  %v3446_v34 = vrot.slane %v2982_v15, 4 }
 0x270   : > { %v2655_v30 = vmax.f32 %v7312_v42, %v2534_v43  ;;  %v2749_v37 = vsel %vm1601_vm4, %v2746_v25, %v8312_v53  ;;  %v2527_v16 = vsel %vm1288_vm3, %v2525_v36, %v2526_v35  ;;  %v3080_v23 = vsel %vm831_vm2, %v3078_v47, %v3079_v27 }
 0x271   : > { %v2529_v0 = vsel %vm1288_vm3, %v2526_v35, %v8314_v13  ;;  %v2651_v20 = vmax.f32 %v2371_v1, %v2527_v16  ;;  %v3082_v25 = vsel %vm831_vm2, %v3079_v27, %v3081_v63  ;;  %v3206_v53 = vmax.f32 %v2982_v15, %v3080_v23 }
 0x272   : > { %v2652_v11 = vmax.f32 %v2372_v52, %v2529_v0  ;;  %v7366_v43 = vmax.f32 %v2655_v30, %v2754_v29  ;;  %v3447_v4 = vrot.slane %v2983_v57, 4  ;;  %v3208_v36 = vmax.f32 %v8315_v24, %v3081_v63 }
 0x273   : > { %v7373_v35 = vmax.f32 %v7285_v26, %v7333_v9  ;;  %v7375_v49 = vmax.f32 %v2651_v20, %v2747_v51  ;;  %v3207_v52 = vmax.f32 %v2983_v57, %v3082_v25  ;;  %v3302_v29 = vrot.slane %v3206_v53, 2 }
 0x274   : > { %v7377_v1 = vmax.f32 %v2652_v11, %v2749_v37  ;;  %v3448_v30 = vsel %vm1601_vm4, %v3446_v34, %v3447_v4  ;;  %v3449_v47 = vrot.slane %v8315_v24, 4  ;;  %v8316_v15 = vmax.f32 %v6780_v56, %v6796_v38  ;;  %v8318_v24 = vld [vmem:[#allocation28_spill] sm:$0xff] }
 0x275   : > { %v7387_v16 = vmax.f32 %v7287_v50, %v7335_v33  ;;  %v2928_v51 = vmax.f32 %v7333_v9, %v7375_v49  ;;  %3893 = vst.msk [vmem:[%s4340_s17 + $0x1ee] sm:$0xfc] %vm3623_vm7, %v7375_v49  ;;  %v3303_v57 = vrot.slane %v3207_v52, 2  ;;  %v3305_v37 = vrot.slane %v3208_v36, 2 }
 0x276   : > { %v2937_v27 = vmax.f32 %v8316_v15, %v6901_v8  ;;  %3894 = vst.msk [vmem:[%s4340_s17 + $0x1f6] sm:$0xff] %vm180_vm0, %v7377_v1  ;;  %v3450_v13 = vsel %vm1601_vm4, %v3447_v4, %v3449_v47  ;;  %v8317_v56 = vmax.f32 %v6785_v21, %v6798_v41  ;;  %v3086_v63 = vrot.slane %v8318_v24, 1 }
 0x277   : > { %v3304_v34 = vsel %vm1288_vm3, %v3302_v29, %v3303_v57  ;;  %v3306_v20 = vsel %vm1288_vm3, %v3303_v57, %v3305_v37  ;;  %v3454_v11 = vrot.slane %v8318_v24, 4  ;;  %v2940_v23 = vmax.f32 %v6867_v19, %v6933_v3 }
 0x278   : > { %v2938_v38 = vmax.f32 %v8317_v56, %v6907_v60  ;;  %v2985_v0 = vmax.f32 %v2937_v27, %v6923_v18  ;;  %v3414_v25 = vmax.f32 %v3206_v53, %v3304_v34  ;;  %v3415_v4 = vmax.f32 %v3207_v52, %v3306_v20  ;;  %v8319_v56 = vld [vmem:[#allocation35_spill] sm:$0xff] }
 0x279   : > { %v3211_v18 = vmax.f32 %v8318_v24, %v3086_v63  ;;  %v2941_v29 = vmax.f32 %v6872_v61, %v6960_v14  ;;  %v2988_v47 = vmax.f32 %v2940_v23, %v6962_v39 }
 0x27a   : > { %v2986_v36 = vmax.f32 %v2938_v38, %v6925_v44  ;;  %v3083_v21 = vrot.slane %v2985_v0, 1  ;;  %v3451_v41 = vrot.slane %v2985_v0, 4  ;;  %v3558_v15 = vmax.f32 %v3414_v25, %v3448_v30 }
 0x27b   : > { %v3559_v27 = vmax.f32 %v3415_v4, %v3450_v13  ;;  %v3310_v19 = vrot.slane %v3211_v18, 2  ;;  %v2989_v53 = vmax.f32 %v2941_v29, %v6964_v6  ;;  %v3088_v52 = vrot.slane %v2988_v47, 1 }
 0x27c   : > { %v3084_v57 = vrot.slane %v2986_v36, 1  ;;  %v3452_v37 = vrot.slane %v2986_v36, 4  ;;  %v3091_v44 = vrot.slane %v8319_v56, 1  ;;  %3590 = vst.msk [vmem:[%s4340_s17] sm:$0xff] %vm180_vm0, %v3558_v15  ;;  %v3456_v20 = vrot.slane %v2988_v47, 4 }
 0x27d   : > { %3591 = vst.msk [vmem:[%s4340_s17 + $0x8] sm:$0xff] %vm180_vm0, %v3559_v27  ;;  %v3089_v34 = vrot.slane %v2989_v53, 1  ;;  %v3457_v6 = vrot.slane %v2989_v53, 4  ;;  %v3459_v25 = vrot.slane %v8319_v56, 4  ;;  %v2943_v4 = vmax.f32 %v6901_v8, %v6977_v48 }
 0x27e   : > { %v3085_v38 = vsel %vm831_vm2, %v3083_v21, %v3084_v57  ;;  %v3087_v24 = vsel %vm831_vm2, %v3084_v57, %v3086_v63  ;;  %v3453_v61 = vsel %vm1601_vm4, %v3451_v41, %v3452_v37  ;;  %v3455_v39 = vsel %vm1601_vm4, %v3452_v37, %v3454_v11 }
 0x27f   : > { %v3209_v30 = vmax.f32 %v2985_v0, %v3085_v38  ;;  %v3210_v13 = vmax.f32 %v2986_v36, %v3087_v24  ;;  %v3214_v23 = vmax.f32 %v8319_v56, %v3091_v44  ;;  %v3090_v41 = vsel %vm831_vm2, %v3088_v52, %v3089_v34 }
 0x280   : > { %v3092_v11 = vsel %vm831_vm2, %v3089_v34, %v3091_v44  ;;  %v3212_v18 = vmax.f32 %v2988_v47, %v3090_v41  ;;  %v3458_v0 = vsel %vm1601_vm4, %v3456_v20, %v3457_v6  ;;  %v3460_v57 = vsel %vm1601_vm4, %v3457_v6, %v3459_v25  ;;  %v8320_v44 = vld [vmem:[#allocation34_spill] sm:$0xff] }
 0x281   : > { %v3307_v21 = vrot.slane %v3209_v30, 2  ;;  %v3308_v63 = vrot.slane %v3210_v13, 2  ;;  %v3213_v29 = vmax.f32 %v2989_v53, %v3092_v11  ;;  %v3315_v36 = vrot.slane %v3214_v23, 2 }
 0x282   : > { %v2944_v8 = vmax.f32 %v6907_v60, %v7000_v10  ;;  %v3312_v52 = vrot.slane %v3212_v18, 2  ;;  %v2991_v47 = vmax.f32 %v2943_v4, %v6992_v54  ;;  %v3096_v24 = vrot.slane %v8320_v44, 1 }
 0x283   : > { %v3309_v15 = vsel %vm1288_vm3, %v3307_v21, %v3308_v63  ;;  %v3311_v27 = vsel %vm1288_vm3, %v3308_v63, %v3310_v19  ;;  %v3313_v38 = vrot.slane %v3213_v29, 2  ;;  %v3464_v34 = vrot.slane %v8320_v44, 4 }
 0x284   : > { %v3416_v37 = vmax.f32 %v3209_v30, %v3309_v15  ;;  %v3417_v56 = vmax.f32 %v3210_v13, %v3311_v27  ;;  %v2992_v53 = vmax.f32 %v2944_v8, %v6994_v28  ;;  %v3093_v13 = vrot.slane %v2991_v47, 1 }
 0x285   : > { %v3314_v6 = vsel %vm1288_vm3, %v3312_v52, %v3313_v38  ;;  %v3316_v60 = vsel %vm1288_vm3, %v3313_v38, %v3315_v36  ;;  %v3461_v54 = vrot.slane %v2991_v47, 4  ;;  %v3217_v4 = vmax.f32 %v8320_v44, %v3096_v24  ;;  %v8322_v52 = vld [vmem:[#allocation4_spill] sm:$0xff] }
 0x286   : > { %v3560_v19 = vmax.f32 %v3416_v37, %v3453_v61  ;;  %v3561_v20 = vmax.f32 %v3417_v56, %v3455_v39  ;;  %v3418_v30 = vmax.f32 %v3212_v18, %v3314_v6  ;;  %v3419_v23 = vmax.f32 %v3213_v29, %v3316_v60 }
 0x287   : > { %v3094_v25 = vrot.slane %v2992_v53, 1  ;;  %v3462_v28 = vrot.slane %v2992_v53, 4  ;;  %v2946_v61 = vmax.f32 %v6933_v3, %v7025_v46  ;;  %v3320_v36 = vrot.slane %v3217_v4, 2 }
 0x288   : > { %3592 = vst.msk [vmem:[%s4340_s17 + $0x10] sm:$0xff] %vm180_vm0, %v3560_v19  ;;  %v3562_v39 = vmax.f32 %v3418_v30, %v3458_v0  ;;  %v3563_v21 = vmax.f32 %v3419_v23, %v3460_v57  ;;  %v2947_v3 = vmax.f32 %v6960_v14, %v7032_v17  ;;  %v8321_v0 = vld [vmem:[#allocation37_spill] sm:$0xff]  ;;  %v2949_v38 = vmax.f32 %v6977_v48, %v8322_v52 }
 0x289   : > { %3593 = vst.msk [vmem:[%s4340_s17 + $0x18] sm:$0xff] %vm180_vm0, %v3561_v20  ;;  %v3095_v63 = vsel %vm831_vm2, %v3093_v13, %v3094_v25  ;;  %v3097_v41 = vsel %vm831_vm2, %v3094_v25, %v3096_v24  ;;  %v3463_v29 = vsel %vm1601_vm4, %v3461_v54, %v3462_v28  ;;  %v3465_v15 = vsel %vm1601_vm4, %v3462_v28, %v3464_v34  ;;  %v8323_v34 = vld [vmem:[#allocation27_spill] sm:$0xff]  ;;  %v8324_v25 = vld [vmem:[#allocation25_spill] sm:$0xff] }
 0x28a   : > { %v3215_v11 = vmax.f32 %v2991_v47, %v3095_v63  ;;  %v3216_v18 = vmax.f32 %v2992_v53, %v3097_v41  ;;  %3594 = vst.msk [vmem:[%s4340_s17 + $0x20] sm:$0xff] %vm180_vm0, %v3562_v39  ;;  %v2994_v27 = vmax.f32 %v2946_v61, %v7034_v32  ;;  %v3101_v57 = vrot.slane %v8321_v0, 1 }
 0x28b   : > { %3595 = vst.msk [vmem:[%s4340_s17 + $0x28] sm:$0xff] %vm180_vm0, %v3563_v21  ;;  %v3469_v56 = vrot.slane %v8321_v0, 4  ;;  %v2995_v47 = vmax.f32 %v2947_v3, %v7036_v31  ;;  %v2950_v19 = vmax.f32 %v7000_v10, %v8323_v34  ;;  %v2997_v20 = vmax.f32 %v2949_v38, %v7064_v45  ;;  %v8325_v3 = vld [vmem:[#allocation26_spill] sm:$0xff] }
 0x28c   : > { %v3317_v8 = vrot.slane %v3215_v11, 2  ;;  %v3318_v37 = vrot.slane %v3216_v18, 2  ;;  %v3098_v53 = vrot.slane %v2994_v27, 1  ;;  %v3466_v44 = vrot.slane %v2994_v27, 4 }
 0x28d   : > { %v3220_v24 = vmax.f32 %v8321_v0, %v3101_v57  ;;  %v3099_v30 = vrot.slane %v2995_v47, 1  ;;  %v3467_v48 = vrot.slane %v2995_v47, 4  ;;  %v2998_v31 = vmax.f32 %v2950_v19, %v7066_v40 }
 0x28e   : > { %v3319_v14 = vsel %vm1288_vm3, %v3317_v8, %v3318_v37  ;;  %v3321_v32 = vsel %vm1288_vm3, %v3318_v37, %v3320_v36  ;;  %v3103_v13 = vrot.slane %v2997_v20, 1  ;;  %v3106_v54 = vrot.slane %v8324_v25, 1 }
 0x28f   : > { %v3420_v6 = vmax.f32 %v3215_v11, %v3319_v14  ;;  %v3421_v60 = vmax.f32 %v3216_v18, %v3321_v32  ;;  %v3325_v23 = vrot.slane %v3220_v24, 2  ;;  %v3100_v61 = vsel %vm831_vm2, %v3098_v53, %v3099_v30  ;;  %v8326_v32 = vld [vmem:[#allocation14_spill] sm:$0xff] }
 0x290   : > { %v3102_v10 = vsel %vm831_vm2, %v3099_v30, %v3101_v57  ;;  %v3218_v39 = vmax.f32 %v2994_v27, %v3100_v61  ;;  %v3468_v21 = vsel %vm1601_vm4, %v3466_v44, %v3467_v48  ;;  %v3470_v63 = vsel %vm1601_vm4, %v3467_v48, %v3469_v56  ;;  %v8327_v30 = vld [vmem:[#allocation39_spill] sm:$0xff] }
 0x291   : > { %v3564_v28 = vmax.f32 %v3420_v6, %v3463_v29  ;;  %v3565_v4 = vmax.f32 %v3421_v60, %v3465_v15  ;;  %v3219_v45 = vmax.f32 %v2995_v47, %v3102_v10  ;;  %v3104_v41 = vrot.slane %v2998_v31, 1 }
 0x292   : > { %v3471_v40 = vrot.slane %v2997_v20, 4  ;;  %v3472_v11 = vrot.slane %v2998_v31, 4  ;;  %v3223_v18 = vmax.f32 %v8324_v25, %v3106_v54  ;;  %v3322_v29 = vrot.slane %v3218_v39, 2 }
 0x293   : > { %3596 = vst.msk [vmem:[%s4340_s17 + $0x30] sm:$0xff] %vm180_vm0, %v3564_v28  ;;  %v3323_v36 = vrot.slane %v3219_v45, 2  ;;  %v3474_v15 = vrot.slane %v8324_v25, 4  ;;  %v2952_v27 = vmax.f32 %v7025_v46, %v8325_v3  ;;  %v3105_v0 = vsel %vm831_vm2, %v3103_v13, %v3104_v41 }
 0x294   : > { %3597 = vst.msk [vmem:[%s4340_s17 + $0x38] sm:$0xff] %vm180_vm0, %v3565_v4  ;;  %v3107_v57 = vsel %vm831_vm2, %v3104_v41, %v3106_v54  ;;  %v3473_v8 = vsel %vm1601_vm4, %v3471_v40, %v3472_v11  ;;  %v3330_v37 = vrot.slane %v3223_v18, 2  ;;  %v3221_v47 = vmax.f32 %v2997_v20, %v3105_v0  ;;  %v8330_v41 = vld [vmem:[#allocation51_spill] sm:$0xff] }
 0x295   : > { %v3324_v56 = vsel %vm1288_vm3, %v3322_v29, %v3323_v36  ;;  %v3326_v38 = vsel %vm1288_vm3, %v3323_v36, %v3325_v23  ;;  %v3222_v53 = vmax.f32 %v2998_v31, %v3107_v57  ;;  %v3475_v14 = vsel %vm1601_vm4, %v3472_v11, %v3474_v15 }
 0x296   : > { %v3422_v44 = vmax.f32 %v3218_v39, %v3324_v56  ;;  %v3423_v24 = vmax.f32 %v3219_v45, %v3326_v38  ;;  %v2953_v46 = vmax.f32 %v7032_v17, %v8326_v32  ;;  %v3327_v19 = vrot.slane %v3221_v47, 2 }
 0x297   : > { %v3328_v6 = vrot.slane %v3222_v53, 2  ;;  %v3000_v60 = vmax.f32 %v2952_v27, %v7106_v22  ;;  %v3111_v48 = vrot.slane %v8327_v30, 1  ;;  %v3479_v23 = vrot.slane %v8327_v30, 4 }
 0x298   : > { %v3566_v13 = vmax.f32 %v3422_v44, %v3468_v21  ;;  %v3567_v25 = vmax.f32 %v3423_v24, %v3470_v63  ;;  %v3001_v20 = vmax.f32 %v2953_v46, %v7108_v59  ;;  %v8328_v59 = vld [vmem:[#allocation10_spill] sm:$0xff]  ;;  %v3116_v40 = vrot.slane %v8330_v41, 1  ;;  %v8333_v24 = vld [vmem:[#allocation23_spill] sm:$0xff] }
 0x299   : > { %v3329_v31 = vsel %vm1288_vm3, %v3327_v19, %v3328_v6  ;;  %v3331_v54 = vsel %vm1288_vm3, %v3328_v6, %v3330_v37  ;;  %v3108_v28 = vrot.slane %v3000_v60, 1  ;;  %v3476_v4 = vrot.slane %v3000_v60, 4  ;;  %v8329_v21 = vld [vmem:[#allocation22_spill] sm:$0xff]  ;;  %v8331_v37 = vld [vmem:[#allocation17_spill] sm:$0xff] }
 0x29a   : > { %3598 = vst.msk [vmem:[%s4340_s17 + $0x40] sm:$0xff] %vm180_vm0, %v3566_v13  ;;  %v3424_v17 = vmax.f32 %v3221_v47, %v3329_v31  ;;  %v3425_v61 = vmax.f32 %v3222_v53, %v3331_v54  ;;  %v3109_v22 = vrot.slane %v3001_v20, 1  ;;  %v3477_v10 = vrot.slane %v3001_v20, 4 }
 0x29b   : > { %3599 = vst.msk [vmem:[%s4340_s17 + $0x48] sm:$0xff] %vm180_vm0, %v3567_v25  ;;  %v3226_v39 = vmax.f32 %v8327_v30, %v3111_v48  ;;  %v2955_v45 = vmax.f32 %v8322_v52, %v8328_v59  ;;  %v2956_v63 = vmax.f32 %v8323_v34, %v8329_v21  ;;  %v2929_v15 = vmax.f32 %v7335_v33, %v7377_v1  ;;  %v8334_v25 = vld [vmem:[#allocation19_spill] sm:$0xff] }
 0x29c   : > { %v3568_v11 = vmax.f32 %v3424_v17, %v3473_v8  ;;  %v3569_v18 = vmax.f32 %v3425_v61, %v3475_v14  ;;  %v3110_v29 = vsel %vm831_vm2, %v3108_v28, %v3109_v22  ;;  %v3112_v36 = vsel %vm831_vm2, %v3109_v22, %v3111_v48  ;;  %v8332_v8 = vld [vmem:[#allocation30_spill] sm:$0xff] }
 0x29d   : > { %v3224_v27 = vmax.f32 %v3000_v60, %v3110_v29  ;;  %v3225_v0 = vmax.f32 %v3001_v20, %v3112_v36  ;;  %v3478_v57 = vsel %vm1601_vm4, %v3476_v4, %v3477_v10  ;;  %v3335_v52 = vrot.slane %v3226_v39, 2  ;;  %v8335_v39 = vld [vmem:[#allocation29_spill] sm:$0xff] }
 0x29e   : > { %3600 = vst.msk [vmem:[%s4340_s17 + $0x50] sm:$0xff] %vm180_vm0, %v3568_v11  ;;  %v3480_v34 = vsel %vm1601_vm4, %v3477_v10, %v3479_v23  ;;  %v3003_v56 = vmax.f32 %v2955_v45, %v8331_v37  ;;  %v3004_v38 = vmax.f32 %v2956_v63, %v8332_v8  ;;  %v3229_v44 = vmax.f32 %v8330_v41, %v3116_v40 }
 0x29f   : > { %3601 = vst.msk [vmem:[%s4340_s17 + $0x58] sm:$0xff] %vm180_vm0, %v3569_v18  ;;  %v3332_v47 = vrot.slane %v3224_v27, 2  ;;  %v3333_v53 = vrot.slane %v3225_v0, 2  ;;  %v2958_v14 = vmax.f32 %v8325_v3, %v8333_v24  ;;  %v3484_v13 = vrot.slane %v8330_v41, 4  ;;  %v8336_v18 = vld [vmem:[#allocation53_spill] sm:$0xff] }
 0x2a0   : > { %v3113_v46 = vrot.slane %v3003_v56, 1  ;;  %v3114_v19 = vrot.slane %v3004_v38, 1  ;;  %v3481_v6 = vrot.slane %v3003_v56, 4  ;;  %v3482_v60 = vrot.slane %v3004_v38, 4 }
 0x2a1   : > { %v3334_v30 = vsel %vm1288_vm3, %v3332_v47, %v3333_v53  ;;  %v3336_v48 = vsel %vm1288_vm3, %v3333_v53, %v3335_v52  ;;  %v2959_v20 = vmax.f32 %v8326_v32, %v8334_v25  ;;  %v3340_v61 = vrot.slane %v3229_v44, 2 }
 0x2a2   : > { %v3426_v23 = vmax.f32 %v3224_v27, %v3334_v30  ;;  %v3427_v31 = vmax.f32 %v3225_v0, %v3336_v48  ;;  %v3115_v54 = vsel %vm831_vm2, %v3113_v46, %v3114_v19  ;;  %v3117_v3 = vsel %vm831_vm2, %v3114_v19, %v3116_v40  ;;  %v8338_v30 = vld [vmem:[#allocation36_spill] sm:$0xff] }
 0x2a3   : > { %v3227_v28 = vmax.f32 %v3003_v56, %v3115_v54  ;;  %v3228_v4 = vmax.f32 %v3004_v38, %v3117_v3  ;;  %v3483_v17 = vsel %vm1601_vm4, %v3481_v6, %v3482_v60  ;;  %v3006_v45 = vmax.f32 %v2958_v14, %v8335_v39  ;;  %v8340_v3 = vld [vmem:[#allocation33_spill] sm:$0xff] }
 0x2a4   : > { %v3570_v22 = vmax.f32 %v3426_v23, %v3478_v57  ;;  %v3571_v10 = vmax.f32 %v3427_v31, %v3480_v34  ;;  %v3007_v63 = vmax.f32 %v2959_v20, %v7180_v7  ;;  %v3485_v11 = vsel %vm1601_vm4, %v3482_v60, %v3484_v13  ;;  %v8337_v34 = vld [vmem:[#allocation31_spill] sm:$0xff]  ;;  %v8339_v23 = vld [vmem:[#allocation58_spill] sm:$0xff] }
 0x2a5   : > { %v3337_v32 = vrot.slane %v3227_v28, 2  ;;  %v3338_v41 = vrot.slane %v3228_v4, 2  ;;  %v3121_v29 = vrot.slane %v8336_v18, 1  ;;  %v3118_v40 = vrot.slane %v3006_v45, 1 }
 0x2a6   : > { %3602 = vst.msk [vmem:[%s4340_s17 + $0x60] sm:$0xff] %vm180_vm0, %v3570_v22  ;;  %v3119_v36 = vrot.slane %v3007_v63, 1  ;;  %v3486_v27 = vrot.slane %v3006_v45, 4  ;;  %v3487_v0 = vrot.slane %v3007_v63, 4  ;;  %v2961_v37 = vmax.f32 %v8328_v59, %v8337_v34 }
 0x2a7   : > { %3603 = vst.msk [vmem:[%s4340_s17 + $0x68] sm:$0xff] %vm180_vm0, %v3571_v10  ;;  %v3339_v57 = vsel %vm1288_vm3, %v3337_v32, %v3338_v41  ;;  %v3341_v52 = vsel %vm1288_vm3, %v3338_v41, %v3340_v61  ;;  %v3232_v7 = vmax.f32 %v8336_v18, %v3121_v29  ;;  %v3489_v46 = vrot.slane %v8336_v18, 4  ;;  %v8342_v61 = vld [vmem:[#allocation40_spill] sm:$0xff]  ;;  %v8343_v18 = vld [vmem:[#allocation65_spill] sm:$0xff] }
 0x2a8   : > { %v3428_v56 = vmax.f32 %v3227_v28, %v3339_v57  ;;  %v3429_v8 = vmax.f32 %v3228_v4, %v3341_v52  ;;  %v3120_v38 = vsel %vm831_vm2, %v3118_v40, %v3119_v36  ;;  %v3122_v47 = vsel %vm831_vm2, %v3119_v36, %v3121_v29  ;;  %v8341_v4 = vld [vmem:[#allocation38_spill] sm:$0xff] }
 0x2a9   : > { %v3230_v53 = vmax.f32 %v3006_v45, %v3120_v38  ;;  %v3231_v44 = vmax.f32 %v3007_v63, %v3122_v47  ;;  %v3488_v14 = vsel %vm1601_vm4, %v3486_v27, %v3487_v0  ;;  %v3345_v60 = vrot.slane %v3232_v7, 2 }
 0x2aa   : > { %v3572_v19 = vmax.f32 %v3428_v56, %v3483_v17  ;;  %v3573_v6 = vmax.f32 %v3429_v8, %v3485_v11  ;;  %v2962_v59 = vmax.f32 %v8329_v21, %v8338_v30  ;;  %v3009_v20 = vmax.f32 %v2961_v37, %v7208_v12 }
 0x2ab   : > { %v3342_v48 = vrot.slane %v3230_v53, 2  ;;  %v3343_v13 = vrot.slane %v3231_v44, 2  ;;  %v3126_v31 = vrot.slane %v8339_v23, 1  ;;  %v3490_v54 = vsel %vm1601_vm4, %v3487_v0, %v3489_v46 }
 0x2ac   : > { %3604 = vst.msk [vmem:[%s4340_s17 + $0x70] sm:$0xff] %vm180_vm0, %v3572_v19  ;;  %v3010_v28 = vmax.f32 %v2962_v59, %v8340_v3  ;;  %v2964_v17 = vmax.f32 %v8333_v24, %v8341_v4  ;;  %v2965_v22 = vmax.f32 %v8334_v25, %v8342_v61  ;;  %v3123_v10 = vrot.slane %v3009_v20, 1 }
 0x2ad   : > { %3605 = vst.msk [vmem:[%s4340_s17 + $0x78] sm:$0xff] %vm180_vm0, %v3573_v6  ;;  %v3344_v21 = vsel %vm1288_vm3, %v3342_v48, %v3343_v13  ;;  %v3346_v12 = vsel %vm1288_vm3, %v3343_v13, %v3345_v60  ;;  %v3491_v39 = vrot.slane %v3009_v20, 4  ;;  %v3235_v11 = vmax.f32 %v8339_v23, %v3126_v31  ;;  %v8344_v6 = vld [vmem:[#allocation41_spill] sm:$0xff] }
 0x2ae   : > { %v3430_v45 = vmax.f32 %v3230_v53, %v3344_v21  ;;  %v3431_v63 = vmax.f32 %v3231_v44, %v3346_v12  ;;  %v3124_v32 = vrot.slane %v3010_v28, 1  ;;  %v3492_v41 = vrot.slane %v3010_v28, 4  ;;  %v8345_v21 = vld [vmem:[#allocation43_spill] sm:$0xff] }
 0x2af   : > { %v3012_v24 = vmax.f32 %v2964_v17, %v7251_v5  ;;  %v3013_v25 = vmax.f32 %v2965_v22, %v7253_v58  ;;  %v3131_v29 = vrot.slane %v8343_v18, 1  ;;  %v3494_v37 = vrot.slane %v8339_v23, 4 }
 0x2b0   : > { %v3574_v40 = vmax.f32 %v3430_v45, %v3488_v14  ;;  %v3575_v36 = vmax.f32 %v3431_v63, %v3490_v54  ;;  %v3125_v27 = vsel %vm831_vm2, %v3123_v10, %v3124_v32  ;;  %v3127_v0 = vsel %vm831_vm2, %v3124_v32, %v3126_v31  ;;  %v8346_v45 = vld [vmem:[#allocation71_spill] sm:$0xff] }
 0x2b1   : > { %v3233_v57 = vmax.f32 %v3009_v20, %v3125_v27  ;;  %v3234_v52 = vmax.f32 %v3010_v28, %v3127_v0  ;;  %v3493_v7 = vsel %vm1601_vm4, %v3491_v39, %v3492_v41  ;;  %v3350_v5 = vrot.slane %v3235_v11, 2 }
 0x2b2   : > { %3606 = vst.msk [vmem:[%s4340_s17 + $0x80] sm:$0xff] %vm180_vm0, %v3574_v40  ;;  %v3128_v56 = vrot.slane %v3012_v24, 1  ;;  %v3129_v8 = vrot.slane %v3013_v25, 1  ;;  %v3496_v58 = vrot.slane %v3012_v24, 4  ;;  %v3497_v53 = vrot.slane %v3013_v25, 4 }
 0x2b3   : > { %3607 = vst.msk [vmem:[%s4340_s17 + $0x88] sm:$0xff] %vm180_vm0, %v3575_v36  ;;  %v3347_v38 = vrot.slane %v3233_v57, 2  ;;  %v3348_v47 = vrot.slane %v3234_v52, 2  ;;  %v3238_v44 = vmax.f32 %v8343_v18, %v3131_v29  ;;  %v3495_v14 = vsel %vm1601_vm4, %v3492_v41, %v3494_v37 }
 0x2b4   : > { %v3130_v46 = vsel %vm831_vm2, %v3128_v56, %v3129_v8  ;;  %v3132_v19 = vsel %vm831_vm2, %v3129_v8, %v3131_v29  ;;  %v2967_v60 = vmax.f32 %v8337_v34, %v8344_v6  ;;  %v3498_v54 = vsel %vm1601_vm4, %v3496_v58, %v3497_v53 }
 0x2b5   : > { %v3349_v59 = vsel %vm1288_vm3, %v3347_v38, %v3348_v47  ;;  %v3351_v48 = vsel %vm1288_vm3, %v3348_v47, %v3350_v5  ;;  %v3236_v13 = vmax.f32 %v3012_v24, %v3130_v46  ;;  %v3237_v20 = vmax.f32 %v3013_v25, %v3132_v19 }
 0x2b6   : > { %v3432_v23 = vmax.f32 %v3233_v57, %v3349_v59  ;;  %v3433_v31 = vmax.f32 %v3234_v52, %v3351_v48  ;;  %v3499_v3 = vrot.slane %v8343_v18, 4  ;;  %v3355_v22 = vrot.slane %v3238_v44, 2  ;;  %v8347_v52 = vld [vmem:[#allocation15_spill] sm:$0xff] }
 0x2b7   : > { %v3352_v28 = vrot.slane %v3236_v13, 2  ;;  %v3353_v17 = vrot.slane %v3237_v20, 2  ;;  %v2968_v34 = vmax.f32 %v8338_v30, %v8345_v21  ;;  %v3015_v39 = vmax.f32 %v2967_v60, %v7285_v26 }
 0x2b8   : > { %v3576_v12 = vmax.f32 %v3432_v23, %v3493_v7  ;;  %v3577_v10 = vmax.f32 %v3433_v31, %v3495_v14  ;;  %v3136_v63 = vrot.slane %v8346_v45, 1  ;;  %v3500_v11 = vsel %vm1601_vm4, %v3497_v53, %v3499_v3 }
 0x2b9   : > { %v3354_v32 = vsel %vm1288_vm3, %v3352_v28, %v3353_v17  ;;  %v3356_v41 = vsel %vm1288_vm3, %v3353_v17, %v3355_v22  ;;  %v3016_v24 = vmax.f32 %v2968_v34, %v7287_v50  ;;  %v3133_v30 = vrot.slane %v3015_v39, 1  ;;  %v8348_v28 = vld [vmem:[#allocation16_spill] sm:$0xff] }
 0x2ba   : > { %3608 = vst.msk [vmem:[%s4340_s17 + $0x90] sm:$0xff] %vm180_vm0, %v3576_v12  ;;  %v3434_v25 = vmax.f32 %v3236_v13, %v3354_v32  ;;  %v3435_v18 = vmax.f32 %v3237_v20, %v3356_v41  ;;  %v3501_v29 = vrot.slane %v3015_v39, 4  ;;  %v3241_v36 = vmax.f32 %v8346_v45, %v3136_v63 }
 0x2bb   : > { %3609 = vst.msk [vmem:[%s4340_s17 + $0x98] sm:$0xff] %vm180_vm0, %v3577_v10  ;;  %v3134_v26 = vrot.slane %v3016_v24, 1  ;;  %v3502_v40 = vrot.slane %v3016_v24, 4  ;;  %v2970_v27 = vmax.f32 %v8341_v4, %v7331_v62  ;;  %v2971_v50 = vmax.f32 %v8342_v61, %v7349_v55 }
 0x2bc   : > { %v3578_v0 = vmax.f32 %v3434_v25, %v3498_v54  ;;  %v3579_v57 = vmax.f32 %v3435_v18, %v3500_v11  ;;  %v3141_v7 = vrot.slane %v8347_v52, 1  ;;  %v3504_v8 = vrot.slane %v8346_v45, 4 }
 0x2bd   : > { %v3135_v37 = vsel %vm831_vm2, %v3133_v30, %v3134_v26  ;;  %v3137_v5 = vsel %vm831_vm2, %v3134_v26, %v3136_v63  ;;  %v3503_v56 = vsel %vm1601_vm4, %v3501_v29, %v3502_v40  ;;  %v3360_v4 = vrot.slane %v3241_v36, 2  ;;  %v8349_v36 = vld [vmem:[#allocation6_spill] sm:$0xff] }
 0x2be   : > { %3610 = vst.msk [vmem:[%s4340_s17 + $0xa0] sm:$0xff] %vm180_vm0, %v3578_v0  ;;  %v3239_v58 = vmax.f32 %v3015_v39, %v3135_v37  ;;  %v3240_v38 = vmax.f32 %v3016_v24, %v3137_v5  ;;  %v3018_v47 = vmax.f32 %v2970_v27, %v7333_v9  ;;  %v3505_v61 = vsel %vm1601_vm4, %v3502_v40, %v3504_v8 }
 0x2bf   : > { %3611 = vst.msk [vmem:[%s4340_s17 + $0xa8] sm:$0xff] %vm180_vm0, %v3579_v57  ;;  %v3019_v53 = vmax.f32 %v2971_v50, %v7335_v33  ;;  %v3244_v44 = vmax.f32 %v8347_v52, %v3141_v7  ;;  %v2973_v14 = vmax.f32 %v8344_v6, %v7373_v35  ;;  %v3509_v20 = vrot.slane %v8347_v52, 4 }
 0x2c0   : > { %v3357_v46 = vrot.slane %v3239_v58, 2  ;;  %v3358_v19 = vrot.slane %v3240_v38, 2  ;;  %v3138_v60 = vrot.slane %v3018_v47, 1  ;;  %v3506_v59 = vrot.slane %v3018_v47, 4 }
 0x2c1   : > { %v3139_v48 = vrot.slane %v3019_v53, 1  ;;  %v3507_v13 = vrot.slane %v3019_v53, 4  ;;  %v2974_v23 = vmax.f32 %v8345_v21, %v7387_v16  ;;  %v3021_v3 = vmax.f32 %v2973_v14, %v7375_v49 }
 0x2c2   : > { %v3359_v31 = vsel %vm1288_vm3, %v3357_v46, %v3358_v19  ;;  %v3361_v54 = vsel %vm1288_vm3, %v3358_v19, %v3360_v4  ;;  %v3146_v17 = vrot.slane %v8348_v28, 1  ;;  %v3365_v45 = vrot.slane %v3244_v44, 2 }
 0x2c3   : > { %v3436_v6 = vmax.f32 %v3239_v58, %v3359_v31  ;;  %v3437_v22 = vmax.f32 %v3240_v38, %v3361_v54  ;;  %v3140_v34 = vsel %vm831_vm2, %v3138_v60, %v3139_v48  ;;  %v3142_v12 = vsel %vm831_vm2, %v3139_v48, %v3141_v7  ;;  %v8353_v31 = vld [vmem:[#allocation9_spill] sm:$0xff] }
 0x2c4   : > { %v3242_v10 = vmax.f32 %v3018_v47, %v3140_v34  ;;  %v3243_v39 = vmax.f32 %v3019_v53, %v3142_v12  ;;  %v3508_v21 = vsel %vm1601_vm4, %v3506_v59, %v3507_v13  ;;  %v3022_v41 = vmax.f32 %v2974_v23, %v7377_v1  ;;  %v8356_v12 = vld [vmem:[#allocation18_spill] sm:$0xff] }
 0x2c5   : > { %v3580_v63 = vmax.f32 %v3436_v6, %v3503_v56  ;;  %v3581_v32 = vmax.f32 %v3437_v22, %v3505_v61  ;;  %v3143_v11 = vrot.slane %v3021_v3, 1  ;;  %v3511_v18 = vrot.slane %v3021_v3, 4  ;;  %v8354_v6 = vld [vmem:[#allocation79_spill] sm:$0xff] }
 0x2c6   : > { %v3362_v24 = vrot.slane %v3242_v10, 2  ;;  %v3363_v25 = vrot.slane %v3243_v39, 2  ;;  %v3247_v30 = vmax.f32 %v8348_v28, %v3146_v17  ;;  %v3510_v29 = vsel %vm1601_vm4, %v3507_v13, %v3509_v20  ;;  %v8352_v20 = vld [vmem:[#allocation12_spill] sm:$0xff] }
 0x2c7   : > { %3612 = vst.msk [vmem:[%s4340_s17 + $0xb0] sm:$0xff] %vm180_vm0, %v3580_v63  ;;  %v3144_v26 = vrot.slane %v3022_v41, 1  ;;  %v3512_v40 = vrot.slane %v3022_v41, 4  ;;  %v2250_v27 = vrot.slane %v8349_v36, 1  ;;  %v3514_v50 = vrot.slane %v8348_v28, 4 }
 0x2c8   : > { %3613 = vst.msk [vmem:[%s4340_s17 + $0xb8] sm:$0xff] %vm180_vm0, %v3581_v32  ;;  %v3364_v0 = vsel %vm1288_vm3, %v3362_v24, %v3363_v25  ;;  %v3366_v57 = vsel %vm1288_vm3, %v3363_v25, %v3365_v45  ;;  %v2750_v52 = vrot.slane %v8349_v36, 4  ;;  %v3370_v4 = vrot.slane %v3247_v30, 2 }
 0x2c9   : > { %v3438_v7 = vmax.f32 %v3242_v10, %v3364_v0  ;;  %v3439_v37 = vmax.f32 %v3243_v39, %v3366_v57  ;;  %v3145_v5 = vsel %vm831_vm2, %v3143_v11, %v3144_v26  ;;  %v3147_v56 = vsel %vm831_vm2, %v3144_v26, %v3146_v17 }
 0x2ca   : > { %v3245_v8 = vmax.f32 %v3021_v3, %v3145_v5  ;;  %v3246_v58 = vmax.f32 %v3022_v41, %v3147_v56  ;;  %v3513_v38 = vsel %vm1601_vm4, %v3511_v18, %v3512_v40  ;;  %v8350_v53 = vrot.slane %v6262_v2, 1  ;;  %v8359_v56 = vld [vmem:[#allocation13_spill] sm:$0xff] }
 0x2cb   : > { %v3582_v47 = vmax.f32 %v3438_v7, %v3508_v21  ;;  %v3583_v61 = vmax.f32 %v3439_v37, %v3510_v29  ;;  %v8351_v14 = vrot.slane %v6262_v2, 4  ;;  %v3515_v59 = vsel %vm1601_vm4, %v3512_v40, %v3514_v50 }
 0x2cc   : > { %v2252_v44 = vsel %vm831_vm2, %v2250_v27, %v8350_v53  ;;  %v3367_v19 = vrot.slane %v3245_v8, 2  ;;  %v3368_v60 = vrot.slane %v3246_v58, 2  ;;  %v2976_v13 = vmax.f32 %v7331_v62, %v2928_v51 }
 0x2cd   : > { %v2752_v46 = vsel %vm1601_vm4, %v2750_v52, %v8351_v14  ;;  %v2374_v48 = vmax.f32 %v8349_v36, %v2252_v44  ;;  %3614 = vst.msk [vmem:[%s4340_s17 + $0xc0] sm:$0xff] %vm180_vm0, %v3582_v47  ;;  %v2977_v2 = vmax.f32 %v7349_v55, %v2929_v15  ;;  %v3151_v23 = vrot.slane %v8352_v20, 1 }
 0x2ce   : > { %v2255_v54 = vrot.slane %v8353_v31, 1  ;;  %3615 = vst.msk [vmem:[%s4340_s17 + $0xc8] sm:$0xff] %vm180_vm0, %v3583_v61  ;;  %v3369_v3 = vsel %vm1288_vm3, %v3367_v19, %v3368_v60  ;;  %v3371_v28 = vsel %vm1288_vm3, %v3368_v60, %v3370_v4  ;;  %v2256_v9 = vrot.slane %v8354_v6, 1 }
 0x2cf   : > { %v2530_v17 = vrot.slane %v2374_v48, 2  ;;  %v3440_v22 = vmax.f32 %v3245_v8, %v3369_v3  ;;  %v3441_v62 = vmax.f32 %v3246_v58, %v3371_v28  ;;  %v3025_v33 = vmax.f32 %v2977_v2, %v7366_v43 }
 0x2d0   : > { %v3519_v55 = vrot.slane %v8352_v20, 4  ;;  %v8355_v51 = vrot.slane %v7312_v42, 2  ;;  %v2257_v34 = vsel %vm831_vm2, %v2255_v54, %v2256_v9  ;;  %v8357_v10 = vrot.slane %v8356_v12, 1 }
 0x2d1   : > { %v2755_v21 = vrot.slane %v8353_v31, 4  ;;  %v3584_v45 = vmax.f32 %v3440_v22, %v3513_v38  ;;  %v3585_v63 = vmax.f32 %v3441_v62, %v3515_v59  ;;  %v3149_v41 = vrot.slane %v3025_v33, 1 }
 0x2d2   : > { %v2532_v15 = vsel %vm1288_vm3, %v2530_v17, %v8355_v51  ;;  %v2259_v39 = vsel %vm831_vm2, %v2256_v9, %v8357_v10  ;;  %v3517_v11 = vrot.slane %v3025_v33, 4  ;;  %v3250_v24 = vmax.f32 %v8352_v20, %v3151_v23  ;;  %v8361_v20 = vld [vmem:[#allocation21_spill] sm:$0xff] }
 0x2d3   : > { %v2654_v32 = vmax.f32 %v2374_v48, %v2532_v15  ;;  %v2377_v42 = vmax.f32 %v8353_v31, %v2257_v34  ;;  %v2378_v25 = vmax.f32 %v8354_v6, %v2259_v39  ;;  %v2932_v18 = vmax.f32 %v7377_v1, %v7366_v43  ;;  %3616 = vst.msk [vmem:[%s4340_s17 + $0xd0] sm:$0xff] %vm180_vm0, %v3584_v45 }
 0x2d4   : > { %v3152_v29 = vsel %vm831_vm2, %v3149_v41, %v3151_v23  ;;  %v2756_v26 = vrot.slane %v8354_v6, 4  ;;  %3617 = vst.msk [vmem:[%s4340_s17 + $0xd8] sm:$0xff] %vm180_vm0, %v3585_v63  ;;  %v3520_v36 = vsel %vm1601_vm4, %v3517_v11, %v3519_v55  ;;  %v8358_v52 = vrot.slane %v8356_v12, 4 }
 0x2d5   : > { %v2874_v30 = vmax.f32 %v2654_v32, %v2752_v46  ;;  %v3249_v40 = vmax.f32 %v3025_v33, %v3152_v29  ;;  %v2535_v27 = vrot.slane %v2377_v42, 2  ;;  %v2536_v0 = vrot.slane %v2378_v25, 2 }
 0x2d6   : > { %v2757_v50 = vsel %vm1601_vm4, %v2755_v21, %v2756_v26  ;;  %v2759_v43 = vsel %vm1601_vm4, %v2756_v26, %v8358_v52  ;;  %v3375_v37 = vrot.slane %v3250_v24, 2  ;;  %v8360_v8 = vrot.slane %v8359_v56, 2 }
 0x2d7   : > { %v3024_v57 = vmax.f32 %v2976_v13, %v2874_v30  ;;  %v2931_v1 = vmax.f32 %v7375_v49, %v2874_v30  ;;  %v3373_v7 = vrot.slane %v3249_v40, 2  ;;  %v2537_v5 = vsel %vm1288_vm3, %v2535_v27, %v2536_v0 }
 0x2d8   : > { %v2539_v58 = vsel %vm1288_vm3, %v2536_v0, %v8360_v8  ;;  %v2657_v47 = vmax.f32 %v2377_v42, %v2537_v5  ;;  %v2980_v14 = vmax.f32 %v7387_v16, %v2932_v18  ;;  %v3156_v23 = vrot.slane %v8361_v20, 1 }
 0x2d9   : > { %v3148_v38 = vrot.slane %v3024_v57, 1  ;;  %v3516_v4 = vrot.slane %v3024_v57, 4  ;;  %v2658_v61 = vmax.f32 %v2378_v25, %v2539_v58  ;;  %v3376_v53 = vsel %vm1288_vm3, %v3373_v7, %v3375_v37 }
 0x2da   : > { %v2979_v44 = vmax.f32 %v7373_v35, %v2931_v1  ;;  %v3443_v19 = vmax.f32 %v3249_v40, %v3376_v53  ;;  %v2877_v60 = vmax.f32 %v2657_v47, %v2757_v50  ;;  %v3524_v6 = vrot.slane %v8361_v20, 4 }
 0x2db   : > { %v3150_v49 = vsel %vm831_vm2, %v3148_v38, %v3149_v41  ;;  %v3518_v46 = vsel %vm1601_vm4, %v3516_v4, %v3517_v11  ;;  %v2878_v48 = vmax.f32 %v2658_v61, %v2759_v43  ;;  %v3253_v22 = vmax.f32 %v8361_v20, %v3156_v23 }
 0x2dc   : > { %v3248_v59 = vmax.f32 %v3024_v57, %v3150_v49  ;;  %v3587_v13 = vmax.f32 %v3443_v19, %v3520_v36  ;;  %v3027_v2 = vmax.f32 %v2979_v44, %v2877_v60 }
 0x2dd   : > { %v3028_v54 = vmax.f32 %v2980_v14, %v2878_v48  ;;  %v3380_v21 = vrot.slane %v3253_v22, 2 }
 0x2de   : > { %v3372_v31 = vrot.slane %v3248_v59, 2  ;;  %3619 = vst.msk [vmem:[%s4340_s17 + $0xe8] sm:$0xff] %vm180_vm0, %v3587_v13  ;;  %v3153_v35 = vrot.slane %v3027_v2, 1  ;;  %v3521_v3 = vrot.slane %v3027_v2, 4 }
 0x2df   : > { %v3154_v28 = vrot.slane %v3028_v54, 1  ;;  %v3522_v17 = vrot.slane %v3028_v54, 4 }
 0x2e0   : > { %v3374_v16 = vsel %vm1288_vm3, %v3372_v31, %v3373_v7 }
 0x2e1   : > { %v3442_v9 = vmax.f32 %v3248_v59, %v3374_v16  ;;  %v3155_v62 = vsel %vm831_vm2, %v3153_v35, %v3154_v28  ;;  %v3157_v33 = vsel %vm831_vm2, %v3154_v28, %v3156_v23  ;;  %v3523_v55 = vsel %vm1601_vm4, %v3521_v3, %v3522_v17 }
 0x2e2   : > { %v3525_v51 = vsel %vm1601_vm4, %v3522_v17, %v3524_v6  ;;  %v3251_v34 = vmax.f32 %v3027_v2, %v3155_v62  ;;  %v3252_v12 = vmax.f32 %v3028_v54, %v3157_v33 }
 0x2e3   : > { %v3586_v15 = vmax.f32 %v3442_v9, %v3518_v46 }
 0x2e4   : > { %v3377_v10 = vrot.slane %v3251_v34, 2  ;;  %v3378_v39 = vrot.slane %v3252_v12, 2 }
 0x2e5   : > { %3618 = vst.msk [vmem:[%s4340_s17 + $0xe0] sm:$0xff] %vm180_vm0, %v3586_v15 }
 0x2e6   : > { %v3379_v45 = vsel %vm1288_vm3, %v3377_v10, %v3378_v39  ;;  %v3381_v63 = vsel %vm1288_vm3, %v3378_v39, %v3380_v21 }
 0x2e7   : > { %v3444_v32 = vmax.f32 %v3251_v34, %v3379_v45  ;;  %v3445_v41 = vmax.f32 %v3252_v12, %v3381_v63 }
 0x2e9   : > { %v3588_v11 = vmax.f32 %v3444_v32, %v3523_v55  ;;  %v3589_v24 = vmax.f32 %v3445_v41, %v3525_v51 }
 0x2eb   : > { %3620 = vst.msk [vmem:[%s4340_s17 + $0xf0] sm:$0xff] %vm180_vm0, %v3588_v11 }
 0x2ec   : > { %3621 = vst.msk [vmem:[%s4340_s17 + $0xf8] sm:$0xff] %vm180_vm0, %v3589_v24 }
 0x2ed PF: > { %s11_s8 = sadd.s32 1, %s4035_s8   ;;  %s8362_s6 = smov %s4031_s7 }
 0x2ee   : > { %p8_p5 = scmp.ge.s32.totalorder %s11_s8, 4   ;;  %s8363_s7 = smov %s8365_s9 }
 0x2f0   :  { %10 = sbr.rel (!%p8_p5) target bundleno = 2 (0x2), region = 58 }

</bundles_post_ra>
